<compile_context>
chip_gen: v5e
topology: v5e:2x2
jax: 0.10.0
libtpu: 0.0.40
codegen_flags: <defaults>
</compile_context>

<pallas_src>
import functools

import jax
import jax.numpy as jnp
from jax.experimental import pallas as pl
from jax.experimental.pallas import tpu as pltpu

BN_EPS = 1e-3        # ultralytics Conv: nn.BatchNorm2d(c2, eps=1e-3)
GN_EPS = 1e-5        # nn.GroupNorm default eps
SIMAM_LAMBDA = 1e-4  # SimAM e_lambda
SA_GROUPS = 8        # ShuffleAttention default G


def _sigmoid(v):
    # exp + reciprocal run on the EUP slot.
    return 1.0 / (1.0 + jnp.exp(-v))


# ----------------------------------------------------------------------------
# Kernel A: Conv1x1 + folded BN + SiLU + ShuffleAttention (channel shuffle folded)
# ----------------------------------------------------------------------------
def _cv1_sa_kernel(x_ref, w_ref, b_ref, mask_ref, cw_ref, cb_ref,
                   sg_ref, sb_ref, o_ref, *, hw, gn_eps):
    # x_ref: (1, Cin, HW)  w_ref: (C, Cin)  others: (C, 1)  o_ref: (1, C, HW)
    x = x_ref[0].astype(jnp.float32)
    w = w_ref[...].astype(jnp.float32)
    y = jnp.dot(w, x, preferred_element_type=jnp.float32,
                precision=jax.lax.Precision.HIGHEST)
    y = y + b_ref[...]                               # folded BatchNorm bias
    t = y * _sigmoid(y)                              # SiLU -> (C, HW)

    inv_hw = 1.0 / hw
    m = jnp.sum(t, axis=-1, keepdims=True) * inv_hw  # per-row mean (avg_pool / GN mean)
    # channel-attention branch: per-row scalar gate
    g_ch = _sigmoid(cw_ref[...] * m + cb_ref[...])
    # spatial branch: per-channel GroupNorm folded into a single scale/shift FMA
    d = t - m
    var = jnp.sum(d * d, axis=-1, keepdims=True) * inv_hw      # biased var (GroupNorm)
    inv_std = pl.reciprocal(jnp.sqrt(var + gn_eps), approx=False)
    scale = sg_ref[...] * inv_std
    shift = sb_ref[...] - m * scale
    g_sp = _sigmoid(t * scale + shift)
    mask = mask_ref[...]                              # 1 -> channel branch, 0 -> spatial
    gate = mask * g_ch + (1.0 - mask) * g_sp
    o_ref[0] = (t * gate).astype(o_ref.dtype)


# ----------------------------------------------------------------------------
# Kernel B / C: (Conv as matmul) + folded BN + SiLU [+ fused SimAM]
# ----------------------------------------------------------------------------
def _conv_bn_silu_kernel(x_ref, w_ref, b_ref, o_ref):
    x = x_ref[0].astype(jnp.float32)
    w = w_ref[...].astype(jnp.float32)
    y = jnp.dot(w, x, preferred_element_type=jnp.float32,
                precision=jax.lax.Precision.HIGHEST) + b_ref[...]
    o_ref[0] = (y * _sigmoid(y)).astype(o_ref.dtype)


def _conv_bn_silu_simam_kernel(x_ref, w_ref, b_ref, o_ref, *, hw, e_lambda):
    x = x_ref[0].astype(jnp.float32)
    w = w_ref[...].astype(jnp.float32)
    y = jnp.dot(w, x, preferred_element_type=jnp.float32,
                precision=jax.lax.Precision.HIGHEST) + b_ref[...]
    t = y * _sigmoid(y)                               # SiLU -> (C, HW)
    mu = jnp.sum(t, axis=-1, keepdims=True) * (1.0 / hw)
    d = t - mu
    d2 = d * d
    s = jnp.sum(d2, axis=-1, keepdims=True)
    inv_den = pl.reciprocal(4.0 * (s * (1.0 / (hw - 1.0)) + e_lambda), approx=False)
    e = d2 * inv_den + 0.5
    o_ref[0] = (t * _sigmoid(e)).astype(o_ref.dtype)


# ----------------------------------------------------------------------------
# Kernel D: multi-input Conv1x1 + folded BN + SiLU (concat folded into the matmul)
# ----------------------------------------------------------------------------
def _concat_conv_kernel(*refs, n_in):
    x_refs = refs[:n_in]
    w_refs = refs[n_in:2 * n_in]
    b_ref = refs[2 * n_in]
    o_ref = refs[2 * n_in + 1]
    acc = None
    for xr, wr in zip(x_refs, w_refs):
        part = jnp.dot(wr[...].astype(jnp.float32), xr[0].astype(jnp.float32),
                       preferred_element_type=jnp.float32,
                       precision=jax.lax.Precision.HIGHEST)
        acc = part if acc is None else acc + part
    y = acc + b_ref[...]
    o_ref[0] = (y * _sigmoid(y)).astype(o_ref.dtype)


# ----------------------------------------------------------------------------
# Wrappers
# ----------------------------------------------------------------------------
def _fold_bn(p):
    scale = p["gamma"] * jax.lax.rsqrt(p["rvar"] + BN_EPS)
    bias = p["beta"] - p["rmean"] * scale
    return scale, bias


def _im2col3(x):
    # TODO(synk): wrapper-side zero-pad + im2col (9x data); an in-kernel halo-DMA
    # variant would avoid this for large feature maps.
    N, Cin, H, W = x.shape
    xp = jnp.pad(x, ((0, 0), (0, 0), (1, 1), (1, 1)))
    cols = jnp.stack(
        [xp[:, :, dy:dy + H, dx:dx + W] for dy in range(3) for dx in range(3)],
        axis=1)                                       # (N, 9, Cin, H, W)
    return cols.reshape(N, 9 * Cin, H * W)


def cv1_shuffle_attention(x, p_conv, p_sa, G=SA_GROUPS):
    """Conv(1x1)+BN+SiLU, then ShuffleAttention + channel_shuffle(2), in one kernel."""
    N, Cin, H, W = x.shape
    HW = H * W
    Cout = p_conv["w"].shape[0]                       # 2 * self.c
    assert Cout % (2 * G) == 0
    Cg = Cout // G
    C2g = Cg // 2

    scale, bias = _fold_bn(p_conv)
    w2 = p_conv["w"].reshape(Cout, Cin) * scale[:, None]

    # Fold the trailing channel_shuffle(groups=2) into the output-row order:
    # shuffled channel j == pre-shuffle channel perm[j].
    j = jnp.arange(Cout)
    perm = (j % 2) * (Cout // 2) + (j // 2)
    w2 = w2[perm]
    b2 = bias[perm].reshape(Cout, 1)

    i_in_g = perm % Cg                                # index within the b*G group view
    is_ch = i_in_g < C2g                              # first half -> channel branch
    pidx = jnp.where(is_ch, i_in_g, i_in_g - C2g)
    mask = is_ch.astype(jnp.float32).reshape(Cout, 1)
    cw = p_sa["cweight"][pidx].reshape(Cout, 1)
    cb = p_sa["cbias"][pidx].reshape(Cout, 1)
    sg = (p_sa["sweight"] * p_sa["gn_gamma"])[pidx].reshape(Cout, 1)   # fold GN affine
    sb = (p_sa["sweight"] * p_sa["gn_beta"] + p_sa["sbias"])[pidx].reshape(Cout, 1)

    x3 = x.reshape(N, Cin, HW)
    vec_spec = lambda: pl.BlockSpec((Cout, 1), lambda n: (0, 0))
    out = pl.pallas_call(
        functools.partial(_cv1_sa_kernel, hw=float(HW), gn_eps=GN_EPS),
        out_shape=jax.ShapeDtypeStruct((N, Cout, HW), x.dtype),
        grid_spec=pltpu.PrefetchScalarGridSpec(
            num_scalar_prefetch=0,
            grid=(N,),
            in_specs=[
                pl.BlockSpec((1, Cin, HW), lambda n: (n, 0, 0)),
                pl.BlockSpec((Cout, Cin), lambda n: (0, 0)),    # weight VMEM-resident
                vec_spec(), vec_spec(), vec_spec(), vec_spec(), vec_spec(), vec_spec(),
            ],
            out_specs=pl.BlockSpec((1, Cout, HW), lambda n: (n, 0, 0)),
        ),
        compiler_params=pltpu.CompilerParams(dimension_semantics=("parallel",)),
    )(x3, w2, b2, mask, cw, cb, sg, sb)
    return out.reshape(N, Cout, H, W)


def conv_bn_silu(x, p, k, *, fuse_simam=False):
    """Ultralytics Conv (Conv2d bias=False + BN eval + SiLU), k in {1,3}; optional SimAM."""
    N, Cin, H, W = x.shape
    HW = H * W
    Cout = p["w"].shape[0]
    scale, bias = _fold_bn(p)
    b2 = bias.reshape(Cout, 1)
    if k == 1:
        w2 = p["w"].reshape(Cout, Cin) * scale[:, None]
        x3 = x.reshape(N, Cin, HW)
        K = Cin
    elif k == 3:
        x3 = _im2col3(x)
        w2 = p["w"].transpose(0, 2, 3, 1).reshape(Cout, 9 * Cin) * scale[:, None]
        K = 9 * Cin
    else:
        raise ValueError(f"unsupported kernel size {k}")

    if fuse_simam:
        kern = functools.partial(_conv_bn_silu_simam_kernel,
                                 hw=float(HW), e_lambda=float(SIMAM_LAMBDA))
    else:
        kern = _conv_bn_silu_kernel

    out = pl.pallas_call(
        kern,
        out_shape=jax.ShapeDtypeStruct((N, Cout, HW), x.dtype),
        grid_spec=pltpu.PrefetchScalarGridSpec(
            num_scalar_prefetch=0,
            grid=(N,),
            in_specs=[
                pl.BlockSpec((1, K, HW), lambda n: (n, 0, 0)),
                pl.BlockSpec((Cout, K), lambda n: (0, 0)),
                pl.BlockSpec((Cout, 1), lambda n: (0, 0)),
            ],
            out_specs=pl.BlockSpec((1, Cout, HW), lambda n: (n, 0, 0)),
        ),
        compiler_params=pltpu.CompilerParams(dimension_semantics=("parallel",)),
    )(x3, w2, b2)
    return out.reshape(N, Cout, H, W)


def cv2_concat_conv(inputs, p):
    """Conv1x1+BN+SiLU over the channel-concatenation of `inputs`, without materializing
    the concat: one kernel does sum_i W_i @ x_i + b."""
    N, _, H, W = inputs[0].shape
    HW = H * W
    Cout = p["w"].shape[0]
    scale, bias = _fold_bn(p)
    w_full = p["w"].reshape(Cout, -1) * scale[:, None]
    cis = [a.shape[1] for a in inputs]
    offs = [0]
    for ci in cis:
        offs.append(offs[-1] + ci)
    w_parts = [w_full[:, offs[i]:offs[i + 1]] for i in range(len(cis))]
    b2 = bias.reshape(Cout, 1)
    x3s = [a.reshape(N, ci, HW) for a, ci in zip(inputs, cis)]
    n_in = len(inputs)

    in_specs = (
        [pl.BlockSpec((1, ci, HW), lambda n: (n, 0, 0)) for ci in cis]
        + [pl.BlockSpec((Cout, ci), lambda n: (0, 0)) for ci in cis]
        + [pl.BlockSpec((Cout, 1), lambda n: (0, 0))]
    )
    out = pl.pallas_call(
        functools.partial(_concat_conv_kernel, n_in=n_in),
        out_shape=jax.ShapeDtypeStruct((N, Cout, HW), inputs[0].dtype),
        grid_spec=pltpu.PrefetchScalarGridSpec(
            num_scalar_prefetch=0,
            grid=(N,),
            in_specs=in_specs,
            out_specs=pl.BlockSpec((1, Cout, HW), lambda n: (n, 0, 0)),
        ),
        compiler_params=pltpu.CompilerParams(dimension_semantics=("parallel",)),
    )(*x3s, *w_parts, b2)
    return out.reshape(N, Cout, H, W)


# ----------------------------------------------------------------------------
# Full C2f_Attention forward
# ----------------------------------------------------------------------------
def c2f_attention_forward(x, params, *, n=1, shortcut=False):
    # t is already in channel_shuffle(2) order (folded into kernel A), so chunk == slice.
    t = cv1_shuffle_attention(x, params["cv1"], params["sa"], G=SA_GROUPS)
    c = t.shape[1] // 2
    branch_inputs = [t]                    # channels [y0 | y1]
    cur = t[:, c:]                         # y1
    for i in range(n):
        z = conv_bn_silu(cur, params[f"m{i}_cv1"], k=3)
        z = conv_bn_silu(z, params[f"m{i}_cv2"], k=3, fuse_simam=True)   # + SimAM
        cur = cur + z if shortcut else z   # Bottleneck_Attention.add
        branch_inputs.append(cur)
    return cv2_concat_conv(branch_inputs, params["cv2"])


# ----------------------------------------------------------------------------
# Pure-JAX reference (mirrors the PyTorch module) and parameter init
# ----------------------------------------------------------------------------
def _conv_bn_silu_ref(x, p, k):
    pad = (k - 1) // 2
    y = jax.lax.conv_general_dilated(
        x, p["w"], window_strides=(1, 1), padding=[(pad, pad), (pad, pad)],
        dimension_numbers=("NCHW", "OIHW", "NCHW"),
        precision=jax.lax.Precision.HIGHEST)
    scale = (p["gamma"] / jnp.sqrt(p["rvar"] + BN_EPS)).reshape(1, -1, 1, 1)
    y = (y - p["rmean"].reshape(1, -1, 1, 1)) * scale + p["beta"].reshape(1, -1, 1, 1)
    return y * jax.nn.sigmoid(y)


def _simam_ref(x, e_lambda=SIMAM_LAMBDA):
    _, _, h, w = x.shape
    mu = jnp.mean(x, axis=(2, 3), keepdims=True)
    d2 = (x - mu) ** 2
    y = d2 / (4.0 * (jnp.sum(d2, axis=(2, 3), keepdims=True) / (h * w - 1) + e_lambda)) + 0.5
    return x * jax.nn.sigmoid(y)


def _shuffle_attention_ref(x, p, G=SA_GROUPS):
    b, c, h, w = x.shape
    xg = x.reshape(b * G, -1, h, w)
    c2g = xg.shape[1] // 2
    x0, x1 = xg[:, :c2g], xg[:, c2g:]
    v = lambda q: q.reshape(1, c2g, 1, 1)
    xc = jnp.mean(x0, axis=(2, 3), keepdims=True)
    xc = x0 * jax.nn.sigmoid(v(p["cweight"]) * xc + v(p["cbias"]))
    mu = jnp.mean(x1, axis=(2, 3), keepdims=True)
    var = jnp.mean((x1 - mu) ** 2, axis=(2, 3), keepdims=True)
    xs = (x1 - mu) / jnp.sqrt(var + GN_EPS) * v(p["gn_gamma"]) + v(p["gn_beta"])
    xs = x1 * jax.nn.sigmoid(v(p["sweight"]) * xs + v(p["sbias"]))
    out = jnp.concatenate([xc, xs], axis=1).reshape(b, c, h, w)
    return out.reshape(b, 2, c // 2, h, w).transpose(0, 2, 1, 3, 4).reshape(b, c, h, w)


def c2f_attention_ref(x, params, *, n=1, shortcut=False):
    t = _conv_bn_silu_ref(x, params["cv1"], 1)
    t = _shuffle_attention_ref(t, params["sa"])
    c = t.shape[1] // 2
    ys = [t[:, :c], t[:, c:]]
    for i in range(n):
        cur = ys[-1]
        z = _conv_bn_silu_ref(cur, params[f"m{i}_cv1"], 3)
        z = _conv_bn_silu_ref(z, params[f"m{i}_cv2"], 3)
        z = _simam_ref(z)
        ys.append(cur + z if shortcut else z)
    return _conv_bn_silu_ref(jnp.concatenate(ys, axis=1), params["cv2"], 1)


def _conv_params(key, cout, cin, k):
    kw, kg, kb, km, kv = jax.random.split(key, 5)
    fan_in = cin * k * k
    return {
        "w": jax.random.normal(kw, (cout, cin, k, k), jnp.float32) * (fan_in ** -0.5),
        "gamma": 1.0 + 0.1 * jax.random.normal(kg, (cout,), jnp.float32),
        "beta": 0.1 * jax.random.normal(kb, (cout,), jnp.float32),
        "rmean": 0.1 * jax.random.normal(km, (cout,), jnp.float32),
        "rvar": jax.random.uniform(kv, (cout,), jnp.float32, minval=0.5, maxval=1.5),
    }


def _sa_params(key, channel, G=SA_GROUPS):
    c2g = channel // (2 * G)
    ks = jax.random.split(key, 6)
    # torch inits cweight/sweight=0, cbias/sbias=1; random values here so the
    # correctness check exercises every term of the attention math.
    return {
        "cweight": 0.5 * jax.random.normal(ks[0], (c2g,), jnp.float32),
        "cbias": 1.0 + 0.1 * jax.random.normal(ks[1], (c2g,), jnp.float32),
        "sweight": 0.5 * jax.random.normal(ks[2], (c2g,), jnp.float32),
        "sbias": 1.0 + 0.1 * jax.random.normal(ks[3], (c2g,), jnp.float32),
        "gn_gamma": 1.0 + 0.1 * jax.random.normal(ks[4], (c2g,), jnp.float32),
        "gn_beta": 0.1 * jax.random.normal(ks[5], (c2g,), jnp.float32),
    }


def init_params(key, c1, c2, n=1, e=0.5):
    c = int(c2 * e)
    keys = jax.random.split(key, 3 + 2 * n)
    params = {
        "cv1": _conv_params(keys[0], 2 * c, c1, 1),
        "sa": _sa_params(keys[1], 2 * c),
        "cv2": _conv_params(keys[2], c2, (2 + n) * c, 1),
    }
    for i in range(n):
        params[f"m{i}_cv1"] = _conv_params(keys[3 + 2 * i], c, c, 3)
        params[f"m{i}_cv2"] = _conv_params(keys[3 + 2 * i + 1], c, c, 3)
    return params


if __name__ == "__main__":
    key = jax.random.PRNGKey(0)
    k_params, k_x = jax.random.split(key)

    # c1=c2=32 -> self.c=16, ShuffleAttention(channel=32, G=8), H*W=256 (lane-dense)
    N, C1, C2, H, W = 2, 32, 32, 16, 16
    n_bottleneck = 1
    params = init_params(k_params, C1, C2, n=n_bottleneck)
    x = jax.random.normal(k_x, (N, C1, H, W), dtype=jnp.float32)

    fwd = jax.jit(functools.partial(c2f_attention_forward, n=n_bottleneck, shortcut=False))
    out = jax.block_until_ready(fwd(x, params))

    ref = c2f_attention_ref(x, params, n=n_bottleneck, shortcut=False)
    assert out.shape == (N, C2, H, W), out.shape
    max_err = float(jnp.max(jnp.abs(out - ref)))
    assert jnp.allclose(out, ref, atol=1e-3, rtol=1e-3), f"mismatch, max abs err={max_err}"

    print("KERNEL_OK")
</pallas_src>

<mosaic_0001>
module attributes {stable_mosaic.version = 11 : i64} {
  func.func @_cv1_sa_kernel(%arg0: i32, %arg1: memref<1x32x256xf32, #tpu.memory_space<vmem>>, %arg2: memref<32x32xf32, #tpu.memory_space<vmem>>, %arg3: memref<32x1xf32, #tpu.memory_space<vmem>>, %arg4: memref<32x1xf32, #tpu.memory_space<vmem>>, %arg5: memref<32x1xf32, #tpu.memory_space<vmem>>, %arg6: memref<32x1xf32, #tpu.memory_space<vmem>>, %arg7: memref<32x1xf32, #tpu.memory_space<vmem>>, %arg8: memref<32x1xf32, #tpu.memory_space<vmem>>, %arg9: memref<1x32x256xf32, #tpu.memory_space<vmem>>) attributes {dimension_semantics = [#tpu.dimension_semantics<parallel>], iteration_bounds = array<i64: 2>, scalar_prefetch = 0 : i64, scratch_operands = 0 : i64, tpu.core_type = #tpu.core_type<tc>, window_params = [{transform_indices = @transform_0, window_bounds = array<i64: 1, 32, 256>}, {pipeline_mode = #tpu.pipeline_mode<synchronous>, transform_indices = @transform_1, window_bounds = array<i64: 32, 32>}, {pipeline_mode = #tpu.pipeline_mode<synchronous>, transform_indices = @transform_2, window_bounds = array<i64: 32, 1>}, {pipeline_mode = #tpu.pipeline_mode<synchronous>, transform_indices = @transform_3, window_bounds = array<i64: 32, 1>}, {pipeline_mode = #tpu.pipeline_mode<synchronous>, transform_indices = @transform_4, window_bounds = array<i64: 32, 1>}, {pipeline_mode = #tpu.pipeline_mode<synchronous>, transform_indices = @transform_5, window_bounds = array<i64: 32, 1>}, {pipeline_mode = #tpu.pipeline_mode<synchronous>, transform_indices = @transform_6, window_bounds = array<i64: 32, 1>}, {pipeline_mode = #tpu.pipeline_mode<synchronous>, transform_indices = @transform_7, window_bounds = array<i64: 32, 1>}, {transform_indices = @transform_8, window_bounds = array<i64: 1, 32, 256>}]} {
    %c0 = arith.constant 0 : index
    %c0_0 = arith.constant 0 : index
    %c0_1 = arith.constant 0 : index
    %0 = vector.load %arg1[%c0, %c0_0, %c0_1] : memref<1x32x256xf32, #tpu.memory_space<vmem>>, vector<1x32x256xf32>
    %1 = vector.shape_cast %0 : vector<1x32x256xf32> to vector<32x256xf32>
    %c0_2 = arith.constant 0 : index
    %c0_3 = arith.constant 0 : index
    %2 = vector.load %arg2[%c0_2, %c0_3] : memref<32x32xf32, #tpu.memory_space<vmem>>, vector<32x32xf32>
    %cst = arith.constant dense<0.000000e+00> : vector<32x256xf32>
    %3 = tpu.matmul %2, %1, %cst {dimension_numbers = #tpu.dot_dimension_numbers<[1], [0], [0], [1], [0, 0, 1, 1], [], []>, precision = #tpu.contract_precision<fp32>} : vector<32x32xf32>, vector<32x256xf32>, vector<32x256xf32> -> vector<32x256xf32>
    %c0_4 = arith.constant 0 : index
    %c0_5 = arith.constant 0 : index
    %4 = vector.load %arg3[%c0_4, %c0_5] : memref<32x1xf32, #tpu.memory_space<vmem>>, vector<32x1xf32>
    %5 = vector.broadcast %4 : vector<32x1xf32> to vector<32x256xf32>
    %6 = arith.addf %3, %5 : vector<32x256xf32>
    %cst_6 = arith.constant 0.000000e+00 : f32
    %7 = vector.broadcast %cst_6 : f32 to vector<32x256xf32>
    %8 = arith.subf %7, %6 : vector<32x256xf32>
    %9 = math.exp %8 : vector<32x256xf32>
    %cst_7 = arith.constant 1.000000e+00 : f32
    %10 = vector.broadcast %cst_7 : f32 to vector<32x256xf32>
    %11 = arith.addf %10, %9 : vector<32x256xf32>
    %cst_8 = arith.constant 1.000000e+00 : f32
    %12 = vector.broadcast %cst_8 : f32 to vector<32x256xf32>
    %13 = arith.divf %12, %11 : vector<32x256xf32>
    %14 = arith.mulf %6, %13 : vector<32x256xf32>
    %cst_9 = arith.constant dense<0.000000e+00> : vector<32xf32>
    %15 = vector.multi_reduction <add>, %14, %cst_9 [1] : vector<32x256xf32> to vector<32xf32>
    %16 = vector.shape_cast %15 : vector<32xf32> to vector<32x1xf32>
    %cst_10 = arith.constant 3.906250e-03 : f32
    %17 = vector.broadcast %cst_10 : f32 to vector<32x1xf32>
    %18 = arith.mulf %16, %17 : vector<32x1xf32>
    %c0_11 = arith.constant 0 : index
    %c0_12 = arith.constant 0 : index
    %19 = vector.load %arg5[%c0_11, %c0_12] : memref<32x1xf32, #tpu.memory_space<vmem>>, vector<32x1xf32>
    %20 = arith.mulf %19, %18 : vector<32x1xf32>
    %c0_13 = arith.constant 0 : index
    %c0_14 = arith.constant 0 : index
    %21 = vector.load %arg6[%c0_13, %c0_14] : memref<32x1xf32, #tpu.memory_space<vmem>>, vector<32x1xf32>
    %22 = arith.addf %20, %21 : vector<32x1xf32>
    %cst_15 = arith.constant 0.000000e+00 : f32
    %23 = vector.broadcast %cst_15 : f32 to vector<32x1xf32>
    %24 = arith.subf %23, %22 : vector<32x1xf32>
    %25 = math.exp %24 : vector<32x1xf32>
    %cst_16 = arith.constant 1.000000e+00 : f32
    %26 = vector.broadcast %cst_16 : f32 to vector<32x1xf32>
    %27 = arith.addf %26, %25 : vector<32x1xf32>
    %cst_17 = arith.constant 1.000000e+00 : f32
    %28 = vector.broadcast %cst_17 : f32 to vector<32x1xf32>
    %29 = arith.divf %28, %27 : vector<32x1xf32>
    %30 = vector.broadcast %18 : vector<32x1xf32> to vector<32x256xf32>
    %31 = arith.subf %14, %30 : vector<32x256xf32>
    %32 = arith.mulf %31, %31 : vector<32x256xf32>
    %cst_18 = arith.constant dense<0.000000e+00> : vector<32xf32>
    %33 = vector.multi_reduction <add>, %32, %cst_18 [1] : vector<32x256xf32> to vector<32xf32>
    %34 = vector.shape_cast %33 : vector<32xf32> to vector<32x1xf32>
    %cst_19 = arith.constant 3.906250e-03 : f32
    %35 = vector.broadcast %cst_19 : f32 to vector<32x1xf32>
    %36 = arith.mulf %34, %35 : vector<32x1xf32>
    %cst_20 = arith.constant 9.99999974E-6 : f32
    %37 = vector.broadcast %cst_20 : f32 to vector<32x1xf32>
    %38 = arith.addf %36, %37 : vector<32x1xf32>
    %39 = math.sqrt %38 : vector<32x1xf32>
    %40 = tpu.reciprocal %39 : vector<32x1xf32> -> vector<32x1xf32>
    %c0_21 = arith.constant 0 : index
    %c0_22 = arith.constant 0 : index
    %41 = vector.load %arg7[%c0_21, %c0_22] : memref<32x1xf32, #tpu.memory_space<vmem>>, vector<32x1xf32>
    %42 = arith.mulf %41, %40 : vector<32x1xf32>
    %c0_23 = arith.constant 0 : index
    %c0_24 = arith.constant 0 : index
    %43 = vector.load %arg8[%c0_23, %c0_24] : memref<32x1xf32, #tpu.memory_space<vmem>>, vector<32x1xf32>
    %44 = arith.mulf %18, %42 : vector<32x1xf32>
    %45 = arith.subf %43, %44 : vector<32x1xf32>
    %46 = vector.broadcast %42 : vector<32x1xf32> to vector<32x256xf32>
    %47 = arith.mulf %14, %46 : vector<32x256xf32>
    %48 = vector.broadcast %45 : vector<32x1xf32> to vector<32x256xf32>
    %49 = arith.addf %47, %48 : vector<32x256xf32>
    %cst_25 = arith.constant 0.000000e+00 : f32
    %50 = vector.broadcast %cst_25 : f32 to vector<32x256xf32>
    %51 = arith.subf %50, %49 : vector<32x256xf32>
    %52 = math.exp %51 : vector<32x256xf32>
    %cst_26 = arith.constant 1.000000e+00 : f32
    %53 = vector.broadcast %cst_26 : f32 to vector<32x256xf32>
    %54 = arith.addf %53, %52 : vector<32x256xf32>
    %cst_27 = arith.constant 1.000000e+00 : f32
    %55 = vector.broadcast %cst_27 : f32 to vector<32x256xf32>
    %56 = arith.divf %55, %54 : vector<32x256xf32>
    %c0_28 = arith.constant 0 : index
    %c0_29 = arith.constant 0 : index
    %57 = vector.load %arg4[%c0_28, %c0_29] : memref<32x1xf32, #tpu.memory_space<vmem>>, vector<32x1xf32>
    %58 = arith.mulf %57, %29 : vector<32x1xf32>
    %cst_30 = arith.constant 1.000000e+00 : f32
    %59 = vector.broadcast %cst_30 : f32 to vector<32x1xf32>
    %60 = arith.subf %59, %57 : vector<32x1xf32>
    %61 = vector.broadcast %60 : vector<32x1xf32> to vector<32x256xf32>
    %62 = arith.mulf %61, %56 : vector<32x256xf32>
    %63 = vector.broadcast %58 : vector<32x1xf32> to vector<32x256xf32>
    %64 = arith.addf %63, %62 : vector<32x256xf32>
    %65 = arith.mulf %14, %64 : vector<32x256xf32>
    %c0_31 = arith.constant 0 : index
    %c0_32 = arith.constant 0 : index
    %c0_33 = arith.constant 0 : index
    %66 = vector.load %arg9[%c0_31, %c0_32, %c0_33] : memref<1x32x256xf32, #tpu.memory_space<vmem>>, vector<1x32x256xf32>
    %67 = vector.shape_cast %66 : vector<1x32x256xf32> to vector<32x256xf32>
    %68 = vector.shape_cast %65 : vector<32x256xf32> to vector<1x32x256xf32>
    tpu.vector_store %arg9[%c0_31, %c0_32, %c0_33], %68 {strides = array<i32>} : memref<1x32x256xf32, #tpu.memory_space<vmem>>, vector<1x32x256xf32>,
    return
  }
  func.func @transform_0(%arg0: i32) -> (i32, i32, i32) {
    %c0_i32 = arith.constant 0 : i32
    %c0_i32_0 = arith.constant 0 : i32
    %c0_i32_1 = arith.constant 0 : i32
    return %arg0, %c0_i32, %c0_i32_0 : i32, i32, i32
  }
  func.func @transform_1(%arg0: i32) -> (i32, i32) {
    %c0_i32 = arith.constant 0 : i32
    %c0_i32_0 = arith.constant 0 : i32
    %c0_i32_1 = arith.constant 0 : i32
    return %c0_i32, %c0_i32_0 : i32, i32
  }
  func.func @transform_2(%arg0: i32) -> (i32, i32) {
    %c0_i32 = arith.constant 0 : i32
    %c0_i32_0 = arith.constant 0 : i32
    %c0_i32_1 = arith.constant 0 : i32
    return %c0_i32, %c0_i32_0 : i32, i32
  }
  func.func @transform_3(%arg0: i32) -> (i32, i32) {
    %c0_i32 = arith.constant 0 : i32
    %c0_i32_0 = arith.constant 0 : i32
    %c0_i32_1 = arith.constant 0 : i32
    return %c0_i32, %c0_i32_0 : i32, i32
  }
  func.func @transform_4(%arg0: i32) -> (i32, i32) {
    %c0_i32 = arith.constant 0 : i32
    %c0_i32_0 = arith.constant 0 : i32
    %c0_i32_1 = arith.constant 0 : i32
    return %c0_i32, %c0_i32_0 : i32, i32
  }
  func.func @transform_5(%arg0: i32) -> (i32, i32) {
    %c0_i32 = arith.constant 0 : i32
    %c0_i32_0 = arith.constant 0 : i32
    %c0_i32_1 = arith.constant 0 : i32
    return %c0_i32, %c0_i32_0 : i32, i32
  }
  func.func @transform_6(%arg0: i32) -> (i32, i32) {
    %c0_i32 = arith.constant 0 : i32
    %c0_i32_0 = arith.constant 0 : i32
    %c0_i32_1 = arith.constant 0 : i32
    return %c0_i32, %c0_i32_0 : i32, i32
  }
  func.func @transform_7(%arg0: i32) -> (i32, i32) {
    %c0_i32 = arith.constant 0 : i32
    %c0_i32_0 = arith.constant 0 : i32
    %c0_i32_1 = arith.constant 0 : i32
    return %c0_i32, %c0_i32_0 : i32, i32
  }
  func.func @transform_8(%arg0: i32) -> (i32, i32, i32) {
    %c0_i32 = arith.constant 0 : i32
    %c0_i32_0 = arith.constant 0 : i32
    %c0_i32_1 = arith.constant 0 : i32
    return %arg0, %c0_i32, %c0_i32_0 : i32, i32, i32
  }
}

module attributes {stable_mosaic.version = 11 : i64} {
  func.func @_conv_bn_silu_kernel(%arg0: i32, %arg1: memref<1x144x256xf32, #tpu.memory_space<vmem>>, %arg2: memref<16x144xf32, #tpu.memory_space<vmem>>, %arg3: memref<16x1xf32, #tpu.memory_space<vmem>>, %arg4: memref<1x16x256xf32, #tpu.memory_space<vmem>>) attributes {dimension_semantics = [#tpu.dimension_semantics<parallel>], iteration_bounds = array<i64: 2>, scalar_prefetch = 0 : i64, scratch_operands = 0 : i64, tpu.core_type = #tpu.core_type<tc>, window_params = [{transform_indices = @transform_0, window_bounds = array<i64: 1, 144, 256>}, {pipeline_mode = #tpu.pipeline_mode<synchronous>, transform_indices = @transform_1, window_bounds = array<i64: 16, 144>}, {pipeline_mode = #tpu.pipeline_mode<synchronous>, transform_indices = @transform_2, window_bounds = array<i64: 16, 1>}, {transform_indices = @transform_3, window_bounds = array<i64: 1, 16, 256>}]} {
    %c0 = arith.constant 0 : index
    %c0_0 = arith.constant 0 : index
    %c0_1 = arith.constant 0 : index
    %0 = vector.load %arg1[%c0, %c0_0, %c0_1] : memref<1x144x256xf32, #tpu.memory_space<vmem>>, vector<1x144x256xf32>
    %1 = vector.shape_cast %0 : vector<1x144x256xf32> to vector<144x256xf32>
    %c0_2 = arith.constant 0 : index
    %c0_3 = arith.constant 0 : index
    %2 = vector.load %arg2[%c0_2, %c0_3] : memref<16x144xf32, #tpu.memory_space<vmem>>, vector<16x144xf32>
    %cst = arith.constant dense<0.000000e+00> : vector<16x256xf32>
    %3 = tpu.matmul %2, %1, %cst {dimension_numbers = #tpu.dot_dimension_numbers<[1], [0], [0], [1], [0, 0, 1, 1], [], []>, precision = #tpu.contract_precision<fp32>} : vector<16x144xf32>, vector<144x256xf32>, vector<16x256xf32> -> vector<16x256xf32>
    %c0_4 = arith.constant 0 : index
    %c0_5 = arith.constant 0 : index
    %4 = vector.load %arg3[%c0_4, %c0_5] : memref<16x1xf32, #tpu.memory_space<vmem>>, vector<16x1xf32>
    %5 = vector.broadcast %4 : vector<16x1xf32> to vector<16x256xf32>
    %6 = arith.addf %3, %5 : vector<16x256xf32>
    %cst_6 = arith.constant 0.000000e+00 : f32
    %7 = vector.broadcast %cst_6 : f32 to vector<16x256xf32>
    %8 = arith.subf %7, %6 : vector<16x256xf32>
    %9 = math.exp %8 : vector<16x256xf32>
    %cst_7 = arith.constant 1.000000e+00 : f32
    %10 = vector.broadcast %cst_7 : f32 to vector<16x256xf32>
    %11 = arith.addf %10, %9 : vector<16x256xf32>
    %cst_8 = arith.constant 1.000000e+00 : f32
    %12 = vector.broadcast %cst_8 : f32 to vector<16x256xf32>
    %13 = arith.divf %12, %11 : vector<16x256xf32>
    %14 = arith.mulf %6, %13 : vector<16x256xf32>
    %c0_9 = arith.constant 0 : index
    %c0_10 = arith.constant 0 : index
    %c0_11 = arith.constant 0 : index
    %15 = vector.load %arg4[%c0_9, %c0_10, %c0_11] : memref<1x16x256xf32, #tpu.memory_space<vmem>>, vector<1x16x256xf32>
    %16 = vector.shape_cast %15 : vector<1x16x256xf32> to vector<16x256xf32>
    %17 = vector.shape_cast %14 : vector<16x256xf32> to vector<1x16x256xf32>
    tpu.vector_store %arg4[%c0_9, %c0_10, %c0_11], %17 {strides = array<i32>} : memref<1x16x256xf32, #tpu.memory_space<vmem>>, vector<1x16x256xf32>,
    return
  }
  func.func @transform_0(%arg0: i32) -> (i32, i32, i32) {
    %c0_i32 = arith.constant 0 : i32
    %c0_i32_0 = arith.constant 0 : i32
    %c0_i32_1 = arith.constant 0 : i32
    return %arg0, %c0_i32, %c0_i32_0 : i32, i32, i32
  }
  func.func @transform_1(%arg0: i32) -> (i32, i32) {
    %c0_i32 = arith.constant 0 : i32
    %c0_i32_0 = arith.constant 0 : i32
    %c0_i32_1 = arith.constant 0 : i32
    return %c0_i32, %c0_i32_0 : i32, i32
  }
  func.func @transform_2(%arg0: i32) -> (i32, i32) {
    %c0_i32 = arith.constant 0 : i32
    %c0_i32_0 = arith.constant 0 : i32
    %c0_i32_1 = arith.constant 0 : i32
    return %c0_i32, %c0_i32_0 : i32, i32
  }
  func.func @transform_3(%arg0: i32) -> (i32, i32, i32) {
    %c0_i32 = arith.constant 0 : i32
    %c0_i32_0 = arith.constant 0 : i32
    %c0_i32_1 = arith.constant 0 : i32
    return %arg0, %c0_i32, %c0_i32_0 : i32, i32, i32
  }
}

module attributes {stable_mosaic.version = 11 : i64} {
  func.func @_conv_bn_silu_simam_kernel(%arg0: i32, %arg1: memref<1x144x256xf32, #tpu.memory_space<vmem>>, %arg2: memref<16x144xf32, #tpu.memory_space<vmem>>, %arg3: memref<16x1xf32, #tpu.memory_space<vmem>>, %arg4: memref<1x16x256xf32, #tpu.memory_space<vmem>>) attributes {dimension_semantics = [#tpu.dimension_semantics<parallel>], iteration_bounds = array<i64: 2>, scalar_prefetch = 0 : i64, scratch_operands = 0 : i64, tpu.core_type = #tpu.core_type<tc>, window_params = [{transform_indices = @transform_0, window_bounds = array<i64: 1, 144, 256>}, {pipeline_mode = #tpu.pipeline_mode<synchronous>, transform_indices = @transform_1, window_bounds = array<i64: 16, 144>}, {pipeline_mode = #tpu.pipeline_mode<synchronous>, transform_indices = @transform_2, window_bounds = array<i64: 16, 1>}, {transform_indices = @transform_3, window_bounds = array<i64: 1, 16, 256>}]} {
    %c0 = arith.constant 0 : index
    %c0_0 = arith.constant 0 : index
    %c0_1 = arith.constant 0 : index
    %0 = vector.load %arg1[%c0, %c0_0, %c0_1] : memref<1x144x256xf32, #tpu.memory_space<vmem>>, vector<1x144x256xf32>
    %1 = vector.shape_cast %0 : vector<1x144x256xf32> to vector<144x256xf32>
    %c0_2 = arith.constant 0 : index
    %c0_3 = arith.constant 0 : index
    %2 = vector.load %arg2[%c0_2, %c0_3] : memref<16x144xf32, #tpu.memory_space<vmem>>, vector<16x144xf32>
    %cst = arith.constant dense<0.000000e+00> : vector<16x256xf32>
    %3 = tpu.matmul %2, %1, %cst {dimension_numbers = #tpu.dot_dimension_numbers<[1], [0], [0], [1], [0, 0, 1, 1], [], []>, precision = #tpu.contract_precision<fp32>} : vector<16x144xf32>, vector<144x256xf32>, vector<16x256xf32> -> vector<16x256xf32>
    %c0_4 = arith.constant 0 : index
    %c0_5 = arith.constant 0 : index
    %4 = vector.load %arg3[%c0_4, %c0_5] : memref<16x1xf32, #tpu.memory_space<vmem>>, vector<16x1xf32>
    %5 = vector.broadcast %4 : vector<16x1xf32> to vector<16x256xf32>
    %6 = arith.addf %3, %5 : vector<16x256xf32>
    %cst_6 = arith.constant 0.000000e+00 : f32
    %7 = vector.broadcast %cst_6 : f32 to vector<16x256xf32>
    %8 = arith.subf %7, %6 : vector<16x256xf32>
    %9 = math.exp %8 : vector<16x256xf32>
    %cst_7 = arith.constant 1.000000e+00 : f32
    %10 = vector.broadcast %cst_7 : f32 to vector<16x256xf32>
    %11 = arith.addf %10, %9 : vector<16x256xf32>
    %cst_8 = arith.constant 1.000000e+00 : f32
    %12 = vector.broadcast %cst_8 : f32 to vector<16x256xf32>
    %13 = arith.divf %12, %11 : vector<16x256xf32>
    %14 = arith.mulf %6, %13 : vector<16x256xf32>
    %cst_9 = arith.constant dense<0.000000e+00> : vector<16xf32>
    %15 = vector.multi_reduction <add>, %14, %cst_9 [1] : vector<16x256xf32> to vector<16xf32>
    %16 = vector.shape_cast %15 : vector<16xf32> to vector<16x1xf32>
    %cst_10 = arith.constant 3.906250e-03 : f32
    %17 = vector.broadcast %cst_10 : f32 to vector<16x1xf32>
    %18 = arith.mulf %16, %17 : vector<16x1xf32>
    %19 = vector.broadcast %18 : vector<16x1xf32> to vector<16x256xf32>
    %20 = arith.subf %14, %19 : vector<16x256xf32>
    %21 = arith.mulf %20, %20 : vector<16x256xf32>
    %cst_11 = arith.constant dense<0.000000e+00> : vector<16xf32>
    %22 = vector.multi_reduction <add>, %21, %cst_11 [1] : vector<16x256xf32> to vector<16xf32>
    %23 = vector.shape_cast %22 : vector<16xf32> to vector<16x1xf32>
    %cst_12 = arith.constant 0.00392156886 : f32
    %24 = vector.broadcast %cst_12 : f32 to vector<16x1xf32>
    %25 = arith.mulf %23, %24 : vector<16x1xf32>
    %cst_13 = arith.constant 9.99999974E-5 : f32
    %26 = vector.broadcast %cst_13 : f32 to vector<16x1xf32>
    %27 = arith.addf %25, %26 : vector<16x1xf32>
    %cst_14 = arith.constant 4.000000e+00 : f32
    %28 = vector.broadcast %cst_14 : f32 to vector<16x1xf32>
    %29 = arith.mulf %28, %27 : vector<16x1xf32>
    %30 = tpu.reciprocal %29 : vector<16x1xf32> -> vector<16x1xf32>
    %31 = vector.broadcast %30 : vector<16x1xf32> to vector<16x256xf32>
    %32 = arith.mulf %21, %31 : vector<16x256xf32>
    %cst_15 = arith.constant 5.000000e-01 : f32
    %33 = vector.broadcast %cst_15 : f32 to vector<16x256xf32>
    %34 = arith.addf %32, %33 : vector<16x256xf32>
    %cst_16 = arith.constant 0.000000e+00 : f32
    %35 = vector.broadcast %cst_16 : f32 to vector<16x256xf32>
    %36 = arith.subf %35, %34 : vector<16x256xf32>
    %37 = math.exp %36 : vector<16x256xf32>
    %cst_17 = arith.constant 1.000000e+00 : f32
    %38 = vector.broadcast %cst_17 : f32 to vector<16x256xf32>
    %39 = arith.addf %38, %37 : vector<16x256xf32>
    %cst_18 = arith.constant 1.000000e+00 : f32
    %40 = vector.broadcast %cst_18 : f32 to vector<16x256xf32>
    %41 = arith.divf %40, %39 : vector<16x256xf32>
    %42 = arith.mulf %14, %41 : vector<16x256xf32>
    %c0_19 = arith.constant 0 : index
    %c0_20 = arith.constant 0 : index
    %c0_21 = arith.constant 0 : index
    %43 = vector.load %arg4[%c0_19, %c0_20, %c0_21] : memref<1x16x256xf32, #tpu.memory_space<vmem>>, vector<1x16x256xf32>
    %44 = vector.shape_cast %43 : vector<1x16x256xf32> to vector<16x256xf32>
    %45 = vector.shape_cast %42 : vector<16x256xf32> to vector<1x16x256xf32>
    tpu.vector_store %arg4[%c0_19, %c0_20, %c0_21], %45 {strides = array<i32>} : memref<1x16x256xf32, #tpu.memory_space<vmem>>, vector<1x16x256xf32>,
    return
  }
  func.func @transform_0(%arg0: i32) -> (i32, i32, i32) {
    %c0_i32 = arith.constant 0 : i32
    %c0_i32_0 = arith.constant 0 : i32
    %c0_i32_1 = arith.constant 0 : i32
    return %arg0, %c0_i32, %c0_i32_0 : i32, i32, i32
  }
  func.func @transform_1(%arg0: i32) -> (i32, i32) {
    %c0_i32 = arith.constant 0 : i32
    %c0_i32_0 = arith.constant 0 : i32
    %c0_i32_1 = arith.constant 0 : i32
    return %c0_i32, %c0_i32_0 : i32, i32
  }
  func.func @transform_2(%arg0: i32) -> (i32, i32) {
    %c0_i32 = arith.constant 0 : i32
    %c0_i32_0 = arith.constant 0 : i32
    %c0_i32_1 = arith.constant 0 : i32
    return %c0_i32, %c0_i32_0 : i32, i32
  }
  func.func @transform_3(%arg0: i32) -> (i32, i32, i32) {
    %c0_i32 = arith.constant 0 : i32
    %c0_i32_0 = arith.constant 0 : i32
    %c0_i32_1 = arith.constant 0 : i32
    return %arg0, %c0_i32, %c0_i32_0 : i32, i32, i32
  }
}

module attributes {stable_mosaic.version = 11 : i64} {
  func.func @_concat_conv_kernel(%arg0: i32, %arg1: memref<1x32x256xf32, #tpu.memory_space<vmem>>, %arg2: memref<1x16x256xf32, #tpu.memory_space<vmem>>, %arg3: memref<32x32xf32, #tpu.memory_space<vmem>>, %arg4: memref<32x16xf32, #tpu.memory_space<vmem>>, %arg5: memref<32x1xf32, #tpu.memory_space<vmem>>, %arg6: memref<1x32x256xf32, #tpu.memory_space<vmem>>) attributes {dimension_semantics = [#tpu.dimension_semantics<parallel>], iteration_bounds = array<i64: 2>, scalar_prefetch = 0 : i64, scratch_operands = 0 : i64, tpu.core_type = #tpu.core_type<tc>, window_params = [{transform_indices = @transform_0, window_bounds = array<i64: 1, 32, 256>}, {transform_indices = @transform_1, window_bounds = array<i64: 1, 16, 256>}, {pipeline_mode = #tpu.pipeline_mode<synchronous>, transform_indices = @transform_2, window_bounds = array<i64: 32, 32>}, {pipeline_mode = #tpu.pipeline_mode<synchronous>, transform_indices = @transform_3, window_bounds = array<i64: 32, 16>}, {pipeline_mode = #tpu.pipeline_mode<synchronous>, transform_indices = @transform_4, window_bounds = array<i64: 32, 1>}, {transform_indices = @transform_5, window_bounds = array<i64: 1, 32, 256>}]} {
    %c0 = arith.constant 0 : index
    %c0_0 = arith.constant 0 : index
    %0 = vector.load %arg3[%c0, %c0_0] : memref<32x32xf32, #tpu.memory_space<vmem>>, vector<32x32xf32>
    %c0_1 = arith.constant 0 : index
    %c0_2 = arith.constant 0 : index
    %c0_3 = arith.constant 0 : index
    %1 = vector.load %arg1[%c0_1, %c0_2, %c0_3] : memref<1x32x256xf32, #tpu.memory_space<vmem>>, vector<1x32x256xf32>
    %2 = vector.shape_cast %1 : vector<1x32x256xf32> to vector<32x256xf32>
    %cst = arith.constant dense<0.000000e+00> : vector<32x256xf32>
    %3 = tpu.matmul %0, %2, %cst {dimension_numbers = #tpu.dot_dimension_numbers<[1], [0], [0], [1], [0, 0, 1, 1], [], []>, precision = #tpu.contract_precision<fp32>} : vector<32x32xf32>, vector<32x256xf32>, vector<32x256xf32> -> vector<32x256xf32>
    %c0_4 = arith.constant 0 : index
    %c0_5 = arith.constant 0 : index
    %4 = vector.load %arg4[%c0_4, %c0_5] : memref<32x16xf32, #tpu.memory_space<vmem>>, vector<32x16xf32>
    %c0_6 = arith.constant 0 : index
    %c0_7 = arith.constant 0 : index
    %c0_8 = arith.constant 0 : index
    %5 = vector.load %arg2[%c0_6, %c0_7, %c0_8] : memref<1x16x256xf32, #tpu.memory_space<vmem>>, vector<1x16x256xf32>
    %6 = vector.shape_cast %5 : vector<1x16x256xf32> to vector<16x256xf32>
    %cst_9 = arith.constant dense<0.000000e+00> : vector<32x256xf32>
    %7 = tpu.matmul %4, %6, %cst_9 {dimension_numbers = #tpu.dot_dimension_numbers<[1], [0], [0], [1], [0, 0, 1, 1], [], []>, precision = #tpu.contract_precision<fp32>} : vector<32x16xf32>, vector<16x256xf32>, vector<32x256xf32> -> vector<32x256xf32>
    %8 = arith.addf %3, %7 : vector<32x256xf32>
    %c0_10 = arith.constant 0 : index
    %c0_11 = arith.constant 0 : index
    %9 = vector.load %arg5[%c0_10, %c0_11] : memref<32x1xf32, #tpu.memory_space<vmem>>, vector<32x1xf32>
    %10 = vector.broadcast %9 : vector<32x1xf32> to vector<32x256xf32>
    %11 = arith.addf %8, %10 : vector<32x256xf32>
    %cst_12 = arith.constant 0.000000e+00 : f32
    %12 = vector.broadcast %cst_12 : f32 to vector<32x256xf32>
    %13 = arith.subf %12, %11 : vector<32x256xf32>
    %14 = math.exp %13 : vector<32x256xf32>
    %cst_13 = arith.constant 1.000000e+00 : f32
    %15 = vector.broadcast %cst_13 : f32 to vector<32x256xf32>
    %16 = arith.addf %15, %14 : vector<32x256xf32>
    %cst_14 = arith.constant 1.000000e+00 : f32
    %17 = vector.broadcast %cst_14 : f32 to vector<32x256xf32>
    %18 = arith.divf %17, %16 : vector<32x256xf32>
    %19 = arith.mulf %11, %18 : vector<32x256xf32>
    %c0_15 = arith.constant 0 : index
    %c0_16 = arith.constant 0 : index
    %c0_17 = arith.constant 0 : index
    %20 = vector.load %arg6[%c0_15, %c0_16, %c0_17] : memref<1x32x256xf32, #tpu.memory_space<vmem>>, vector<1x32x256xf32>
    %21 = vector.shape_cast %20 : vector<1x32x256xf32> to vector<32x256xf32>
    %22 = vector.shape_cast %19 : vector<32x256xf32> to vector<1x32x256xf32>
    tpu.vector_store %arg6[%c0_15, %c0_16, %c0_17], %22 {strides = array<i32>} : memref<1x32x256xf32, #tpu.memory_space<vmem>>, vector<1x32x256xf32>,
    return
  }
  func.func @transform_0(%arg0: i32) -> (i32, i32, i32) {
    %c0_i32 = arith.constant 0 : i32
    %c0_i32_0 = arith.constant 0 : i32
    %c0_i32_1 = arith.constant 0 : i32
    return %arg0, %c0_i32, %c0_i32_0 : i32, i32, i32
  }
  func.func @transform_1(%arg0: i32) -> (i32, i32, i32) {
    %c0_i32 = arith.constant 0 : i32
    %c0_i32_0 = arith.constant 0 : i32
    %c0_i32_1 = arith.constant 0 : i32
    return %arg0, %c0_i32, %c0_i32_0 : i32, i32, i32
  }
  func.func @transform_2(%arg0: i32) -> (i32, i32) {
    %c0_i32 = arith.constant 0 : i32
    %c0_i32_0 = arith.constant 0 : i32
    %c0_i32_1 = arith.constant 0 : i32
    return %c0_i32, %c0_i32_0 : i32, i32
  }
  func.func @transform_3(%arg0: i32) -> (i32, i32) {
    %c0_i32 = arith.constant 0 : i32
    %c0_i32_0 = arith.constant 0 : i32
    %c0_i32_1 = arith.constant 0 : i32
    return %c0_i32, %c0_i32_0 : i32, i32
  }
  func.func @transform_4(%arg0: i32) -> (i32, i32) {
    %c0_i32 = arith.constant 0 : i32
    %c0_i32_0 = arith.constant 0 : i32
    %c0_i32_1 = arith.constant 0 : i32
    return %c0_i32, %c0_i32_0 : i32, i32
  }
  func.func @transform_5(%arg0: i32) -> (i32, i32, i32) {
    %c0_i32 = arith.constant 0 : i32
    %c0_i32_0 = arith.constant 0 : i32
    %c0_i32_1 = arith.constant 0 : i32
    return %arg0, %c0_i32, %c0_i32_0 : i32, i32, i32
  }
}

</mosaic_0001>

<bundles_post_ra>
// kernel: c2f_attention_forward.4
= control target key start
LH: loop header
LB: loop body
LE: loop exit
PB: predicated region body
PF: predicated region fallthrough
CT: control target
= control target key end

     0   :  { %s1861_s27 = smov 0   ;;  %s2553_s0 = inlined_call_operand.vmem [shape: f32[2,32,256], index: 0, kind: input, shape index: {}]   ;;  %s2554_s1 = inlined_call_operand.vmem [shape: f32[32,32], index: 1, kind: input, shape index: {}]   ;;  %s2555_s2 = inlined_call_operand.vmem [shape: f32[32,1], index: 2, kind: input, shape index: {}]   ;;  %s2556_s3 = inlined_call_operand.vmem [shape: f32[32,1], index: 3, kind: input, shape index: {}]   ;;  %s2557_s4 = inlined_call_operand.vmem [shape: f32[32,1], index: 4, kind: input, shape index: {}]   ;;  %s2558_s5 = inlined_call_operand.vmem [shape: f32[32,1], index: 5, kind: input, shape index: {}]   ;;  %s2559_s6 = inlined_call_operand.vmem [shape: f32[32,1], index: 6, kind: input, shape index: {}]   ;;  %s2560_s7 = inlined_call_operand.vmem [shape: f32[32,1], index: 7, kind: input, shape index: {}]   ;;  %s2561_s8 = inlined_call_operand.vmem [shape: f32[2,32,256], index: 8, kind: output, shape index: {}]  }
   0x1 LB: > { %s1686_s28 = sadd.s32 4294967295, %s1813_s27   ;;  %p1690_p0 = scmp.ge.s32.totalorder %s1813_s27, 1  ;;  %s1813_s27 = sphi %s1861_s27, %s18_s27  }
   0x2   : > { %p262_p1 = scmp.lt.s32.totalorder %s1813_s27, 3 }
   0x4   : > { %p263_p2 = pnand %p1690_p0, %p262_p1 }
   0x5   : > { %p296_p3 = scmp.lt.s32.totalorder (!%p263_p2), %s1686_s28, 1 }
   0x6   : > { %266 = sbr.rel (%p263_p2) target bundleno = 732 (0x2dc), region = 52 }
   0xb   : > { %v314_v0 = vld [vmem:[%s2554_s1] sm:$0xff]  ;;  %vm342_vm0 = vcmask 261120   ;;  %v315_v1 = vld [vmem:[%s2554_s1 + $0x8] sm:$0xff]  ;;  %v1815_v4 = vmov 0   ;;  %s2577_s28 = smov (!%p296_p3, %s1686_s28), 1  ;;  %v316_v8 = vld [vmem:[%s2554_s1 + $0x10] sm:$0xff] }
   0xc   : > { %v344_v2 = vsel %vm342_vm0, %v314_v0, 0  ;;  %v347_v3 = vsel %vm342_vm0, %v315_v1, 0  ;;  %1708 = vset.pattern.permute.xlu0 %v1815_v4  ;;  %v318_v5 = vld [vmem:[%s2555_s2] sm:$0xff]  ;;  %1709 = vset.pattern.permute.xlu1 %v1815_v4  ;;  %s1697_s15 = sshll.u32 %s2577_s28, 6  ;;  %v350_v15 = vsel %vm342_vm0, %v316_v8, 0  ;;  %v319_v25 = vld [vmem:[%s2555_s2 + $0x8] sm:$0xff] }
   0xd   : > { %v1882_v6 = vand.u32 4294901760, %v344_v2  ;;  %v1884_v7 = vand.u32 4294901760, %v347_v3  ;;  %324 = vperm.xlu0 %1708, %v318_v5   ;;  %1710 = vset.pattern.permute.xlu2 %v1815_v4  ;;  %s1898_s18 = scalar_lea.vmem %s2553_s0, %s1697_s15  ;;  %v1949_v34 = vand.u32 4294901760, %v350_v15  ;;  %v317_v49 = vld [vmem:[%s2554_s1 + $0x18] sm:$0xff]  ;;  %s2487_s11 = scalar_lea.vmem %s2561_s8, %s1697_s15 }
   0xe   : > { %v312_v10 = vld [vmem:[%s1898_s18 + $0x30] sm:$0xff]  ;;  %v310_v11 = vld [vmem:[%s1898_s18 + $0x20] sm:$0xff]  ;;  %v313_v20 = vld [vmem:[%s1898_s18 + $0x38] sm:$0xff]  ;;  %v353_v60 = vsel %vm342_vm0, %v317_v49, 0 }
   0xf   : > { %v1891_v9 = vsub.f32 %v344_v2, %v1882_v6  ;;  %v308_v12 = vld [vmem:[%s1898_s18 + $0x10] sm:$0xff]  ;;  %v1907_v14 = vsub.f32 %v347_v3, %v1884_v7  ;;  %v1910_v16 = vand.u32 4294901760, %v312_v10  ;;  %v1912_v17 = vand.u32 4294901760, %v310_v11  ;;  %v306_v19 = vld [vmem:[%s1898_s18] sm:$0xff]  ;;  %v311_v21 = vld [vmem:[%s1898_s18 + $0x28] sm:$0xff] }
  0x10   : > { %v1914_v18 = vand.u32 4294901760, %v308_v12  ;;  %v1919_v22 = vand.u32 4294901760, %v306_v19  ;;  %v1923_v24 = vand.u32 4294901760, %v313_v20  ;;  %v1937_v29 = vand.u32 4294901760, %v311_v21  ;;  %v309_v30 = vld [vmem:[%s1898_s18 + $0x18] sm:$0xff]  ;;  %v307_v50 = vld [vmem:[%s1898_s18 + $0x8] sm:$0xff] }
  0x11   : > { %v1904_v13 = vand.u32 4294901760, %v1891_v9  ;;  %368 = vmatpush.msra.mxu0 %v1910_v16  ;;  %v421_v26 = vsub.f32 %v312_v10, %v1910_v16  ;;  %v1931_v27 = vsub.f32 %v310_v11, %v1912_v17  ;;  %519 = vmatpush.msra.mxu3 %v1910_v16  ;;  %v1947_v33 = vand.u32 4294901760, %v1907_v14 }
  0x12   : > { %v1935_v28 = vsub.f32 %v308_v12, %v1914_v18  ;;  %v1941_v31 = vsub.f32 %v306_v19, %v1919_v22  ;;  %v1944_v32 = vsub.f32 %v313_v20, %v1923_v24  ;;  %v1955_v38 = vsub.f32 %v311_v21, %v1937_v29  ;;  %v320_v19 = vld [vmem:[%s2555_s2 + $0x10] sm:$0xff] }
  0x13   : > { %v378_v23 = vsub.f32 %v1891_v9, %v1904_v13  ;;  %370 = vmatpush.msra.mxu0 %v1912_v17  ;;  %475 = vmatpush.msra.mxu2 %v421_v26  ;;  %v422_v35 = vand.u32 4294901760, %v421_v26  ;;  %v428_v36 = vand.u32 4294901760, %v1931_v27  ;;  %v1962_v42 = vand.u32 4294901760, %v309_v30 }
  0x14   : > { %v434_v37 = vand.u32 4294901760, %v1935_v28  ;;  %521 = vmatpush.msra.mxu3 %v1912_v17  ;;  %v700_v40 = vand.u32 4294901760, %v1944_v32  ;;  %v440_v41 = vand.u32 4294901760, %v1941_v31  ;;  %v706_v46 = vand.u32 4294901760, %v1955_v38  ;;  %334 = vperm.xlu1 %1709, %v320_v19  }
  0x15   : > { %329 = vperm.xlu0 %1708, %v319_v25   ;;  %v1957_v39 = vand.u32 4294901760, %v378_v23  ;;  %372 = vmatpush.msra.mxu0 %v1914_v18  ;;  %v423_v43 = vsub.f32 %v421_v26, %v422_v35  ;;  %v429_v44 = vsub.f32 %v1931_v27, %v428_v36  ;;  %v1974_v48 = vsub.f32 %v309_v30, %v1962_v42 }
  0x16   : > { %478 = vmatpush.msra.mxu2 %v1931_v27  ;;  %v435_v45 = vsub.f32 %v1935_v28, %v434_v37  ;;  %523 = vmatpush.msra.mxu3 %v1914_v18  ;;  %v701_v47 = vsub.f32 %v1944_v32, %v700_v40  ;;  %v441_v53 = vsub.f32 %v1941_v31, %v440_v41  ;;  %v1998_v61 = vand.u32 4294901760, %v307_v50 }
  0x17   : > { %374 = vmatpush.msra.mxu0 %v1919_v22  ;;  %v424_v51 = vand.u32 4294901760, %v423_v43  ;;  %v430_v52 = vand.u32 4294901760, %v429_v44  ;;  %v707_v54 = vsub.f32 %v1955_v38, %v706_v46  ;;  %v386_v56 = vsub.f32 %v1907_v14, %v1947_v33 }
  0x18   : > { %481 = vmatpush.msra.mxu2 %v1935_v28  ;;  %380 = vmatmul.f32.vlgmr.msra.gmra.mxu0 %v1957_v39  ;;  %v702_v55 = vand.u32 4294901760, %v701_v47  ;;  %v1993_v57 = vsub.f32 %v350_v15, %v1949_v34  ;;  %v712_v58 = vand.u32 4294901760, %v1974_v48  ;;  %v436_v59 = vand.u32 4294901760, %v435_v45 }
  0x19   : > { %525 = vmatpush.msra.mxu3 %v1919_v22  ;;  %425 = vmatpush.msra.mxu1 %v424_v51  ;;  %v708_v62 = vand.u32 4294901760, %v707_v54  ;;  %v442_v63 = vand.u32 4294901760, %v441_v53  ;;  %v717_v1 = vsub.f32 %v307_v50, %v1998_v61  ;;  %v2005_v2 = vand.u32 4294901760, %v386_v56 }
  0x1a   : > { %484 = vmatpush.msra.mxu2 %v1941_v31  ;;  %529 = vmatmul.f32.vlgmr.msra.gmra.mxu3 %v1904_v13  ;;  %v713_v0 = vsub.f32 %v1974_v48, %v712_v58  ;;  %v2008_v3 = vand.u32 4294901760, %v1993_v57  ;;  %v2010_v4 = vand.u32 4294901760, %v353_v60 }
  0x1b   : > { %487 = vmatmul.f32.vlgmr.msra.gmra.mxu2 %v1891_v9  ;;  %431 = vmatpush.msra.mxu1 %v430_v52  ;;  %v718_v5 = vand.u32 4294901760, %v717_v1 }
  0x1c   : > { %646 = vmatpush.msrb.mxu2 %v1923_v24  ;;  %566 = vmatpush.msrb.mxu0 %v422_v35  ;;  %v714_v8 = vand.u32 4294901760, %v713_v0  ;;  %v394_v11 = vsub.f32 %v1993_v57, %v2008_v3  ;;  %v2019_v12 = vsub.f32 %v353_v60, %v2010_v4 }
  0x1d   : > { %703 = vmatpush.msrb.mxu3 %v702_v55  ;;  %437 = vmatpush.msra.mxu1 %v436_v59  ;;  %v719_v10 = vsub.f32 %v717_v1, %v718_v5 }
  0x1e   : > { %648 = vmatpush.msrb.mxu2 %v1937_v29  ;;  %570 = vmatpush.msrb.mxu0 %v428_v36  ;;  %v395_v20 = vand.u32 4294901760, %v394_v11  ;;  %v2029_v21 = vand.u32 4294901760, %v2019_v12 }
  0x1f   : > { %709 = vmatpush.msrb.mxu3 %v708_v62  ;;  %443 = vmatpush.msra.mxu1 %v442_v63  ;;  %v720_v15 = vand.u32 4294901760, %v719_v10 }
  0x20   : > { %650 = vmatpush.msrb.mxu2 %v1962_v42  ;;  %388 = vmatmul.f32.gmra.mxu0 %v2005_v2 }
  0x21   : > { %445 = vmatmul.f32.vlgmr.msra.gmra.mxu1 %v1882_v6  ;;  %574 = vmatpush.msrb.mxu0 %v434_v37 }
  0x22   : > { %609 = vmatpush.msrb.mxu1 %v1910_v16  ;;  %535 = vmatmul.f32.gmra.mxu3 %v1947_v33  ;;  %v402_v16 = vsub.f32 %v2019_v12, %v2029_v21 }
  0x23   : > { %492 = vmatmul.f32.gmra.mxu2 %v1907_v14  ;;  %715 = vmatpush.msrb.mxu3 %v714_v8 }
  0x24   : > { %611 = vmatpush.msrb.mxu1 %v1912_v17  ;;  %652 = vmatpush.msrb.mxu2 %v1998_v61  ;;  %v321_v17 = vld [vmem:[%s2555_s2 + $0x18] sm:$0xff] }
  0x25   : > { %578 = vmatpush.msrb.mxu0 %v440_v41  ;;  %721 = vmatpush.msrb.mxu3 %v720_v15 }
  0x26   : > { %613 = vmatpush.msrb.mxu1 %v1914_v18  ;;  %844 = vmatpush.msra.mxu2 %v700_v40  ;;  %v403_v18 = vand.u32 4294901760, %v402_v16 }
  0x27   : > { %753 = vmatpush.msra.mxu0 %v1944_v32  ;;  %887 = vmatpush.msra.mxu3 %v1923_v24 }
  0x28   : > { %615 = vmatpush.msrb.mxu1 %v1919_v22  ;;  %396 = vmatmul.f32.gmra.mxu0 %v395_v20 }
  0x29   : > { %449 = vmatmul.f32.gmra.mxu1 %v1884_v7  ;;  %848 = vmatpush.msra.mxu2 %v706_v46 }
  0x2a   : > { %797 = vmatpush.msra.mxu1 %v1923_v24  ;;  %541 = vmatmul.f32.gmra.mxu3 %v2008_v3 }
  0x2b   : > { %497 = vmatmul.f32.gmra.mxu2 %v1993_v57  ;;  %756 = vmatpush.msra.mxu0 %v1955_v38 }
  0x2c   : > { %889 = vmatpush.msra.mxu3 %v1937_v29  ;;  %799 = vmatpush.msra.mxu1 %v1937_v29 }
  0x2d   : > { %852 = vmatpush.msra.mxu2 %v712_v58  ;;  %759 = vmatpush.msra.mxu0 %v1974_v48 }
  0x2e   : > { %339 = vperm.xlu1 %1709, %v321_v17   ;;  %891 = vmatpush.msra.mxu3 %v1962_v42 }
  0x2f   : > { %801 = vmatpush.msra.mxu1 %v1962_v42  ;;  %856 = vmatpush.msra.mxu2 %v718_v5 }
  0x30   : > { %404 = vmatmul.f32.gmra.mxu0 %v403_v18  ;;  %893 = vmatpush.msra.mxu3 %v1998_v61 }
  0x31   : > { %453 = vmatmul.f32.gmra.mxu1 %v1949_v34  ;;  %762 = vmatpush.msra.mxu0 %v717_v1 }
  0x32   : > { %547 = vmatmul.f32.gmra.mxu3 %v2029_v21  ;;  %803 = vmatpush.msra.mxu1 %v1998_v61 }
  0x33   : > { %502 = vmatmul.f32.gmra.mxu2 %v2019_v12 }
  0x38   : > { %580 = vmatmul.f32.vlgmr.msrb.gmra.mxu0 %v1882_v6 }
  0x39   : > { %457 = vmatmul.f32.gmra.mxu1 %v2010_v4 }
  0x3a   : > { %723 = vmatmul.f32.vlgmr.msrb.gmra.mxu3 %v1882_v6 }
  0x3b   : > { %658 = vmatmul.f32.vlgmr.msrb.gmra.mxu2 %v1957_v39 }
  0x40   : > { %584 = vmatmul.f32.gmra.mxu0 %v1884_v7 }
  0x41   : > { %617 = vmatmul.f32.vlgmr.msrb.gmra.mxu1 %v1882_v6 }
  0x42   : > { %727 = vmatmul.f32.gmra.mxu3 %v1884_v7 }
  0x43   : > { %666 = vmatmul.f32.gmra.mxu2 %v2005_v2 }
  0x48   : > { %588 = vmatmul.f32.gmra.mxu0 %v1949_v34 }
  0x49   : > { %621 = vmatmul.f32.gmra.mxu1 %v1884_v7 }
  0x4a   : > { %731 = vmatmul.f32.gmra.mxu3 %v1949_v34 }
  0x4b   : > { %674 = vmatmul.f32.gmra.mxu2 %v395_v20 }
  0x50   : > { %592 = vmatmul.f32.gmra.mxu0 %v2010_v4 }
  0x51   : > { %625 = vmatmul.f32.gmra.mxu1 %v1949_v34 }
  0x52   : > { %735 = vmatmul.f32.gmra.mxu3 %v2010_v4 }
  0x53   : > { %682 = vmatmul.f32.gmra.mxu2 %v403_v18 }
  0x58   : > { %765 = vmatmul.f32.vlgmr.msra.gmra.mxu0 %v1891_v9 }
  0x59   : > { %629 = vmatmul.f32.gmra.mxu1 %v2010_v4 }
  0x5a   : > { %895 = vmatmul.f32.vlgmr.msra.gmra.mxu3 %v1882_v6 }
  0x5b   : > { %858 = vmatmul.f32.vlgmr.msra.gmra.mxu2 %v1882_v6 }
  0x60   : > { %770 = vmatmul.f32.gmra.mxu0 %v1907_v14 }
  0x61   : > { %807 = vmatmul.f32.vlgmr.msra.gmra.mxu1 %v1904_v13 }
  0x62   : > { %899 = vmatmul.f32.gmra.mxu3 %v1884_v7 }
  0x63   : > { %862 = vmatmul.f32.gmra.mxu2 %v1884_v7 }
  0x68   : > { %775 = vmatmul.f32.gmra.mxu0 %v1993_v57 }
  0x69   : > { %813 = vmatmul.f32.gmra.mxu1 %v1947_v33 }
  0x6a   : > { %903 = vmatmul.f32.gmra.mxu3 %v1949_v34 }
  0x6b   : > { %866 = vmatmul.f32.gmra.mxu2 %v1949_v34 }
  0x70   : > { %780 = vmatmul.f32.gmra.mxu0 %v2019_v12 }
  0x71   : > { %819 = vmatmul.f32.gmra.mxu1 %v2008_v3 }
  0x72   : > { %907 = vmatmul.f32.gmra.mxu3 %v2010_v4 }
  0x73   : > { %870 = vmatmul.f32.gmra.mxu2 %v2010_v4 }
  0x79   : > { %825 = vmatmul.f32.gmra.mxu1 %v2029_v21 }
  0x7f   : > { %v325_v30 = vpop.permute.xlu0 %324 }
  0x86   : > { %v335_v44 = vpop.permute.xlu1 %334 }
  0x87   : > { %v330_v41 = vpop.permute.xlu0 %329 }
  0x95   : > { %v381_v6 = vpop.f32.mrf.mxu0 }
  0x96   : > { %v382_v35 = vadd.f32 %v381_v6, %v325_v30 }
  0x9d   : > { %v389_v7 = vpop.f32.mrf.mxu0  ;;  %v530_v14 = vpop.f32.mrf.mxu3 }
  0x9e   : > { %v446_v9 = vpop.f32.mrf.mxu1  ;;  %v488_v13 = vpop.f32.mrf.mxu2  ;;  %v390_v43 = vadd.f32 %v389_v7, %v330_v41 }
  0x9f   : > { %v447_v38 = vadd.f32 %v446_v9, %v382_v35 }
  0xa0   : > { %v2096_v63 = vpop.permute.xlu1 %339 }
  0xa1   : > { %v489_v42 = vadd.f32 %v488_v13, %v447_v38 }
  0xa3   : > { %v531_v47 = vadd.f32 %v530_v14, %v489_v42 }
  0xa5   : > { %v397_v22 = vpop.f32.mrf.mxu0  ;;  %v536_v25 = vpop.f32.mrf.mxu3 }
  0xa6   : > { %v450_v23 = vpop.f32.mrf.mxu1  ;;  %v493_v24 = vpop.f32.mrf.mxu2  ;;  %v398_v52 = vadd.f32 %v397_v22, %v335_v44 }
  0xa7   : > { %v451_v50 = vadd.f32 %v450_v23, %v390_v43 }
  0xa9   : > { %v494_v54 = vadd.f32 %v493_v24, %v451_v50 }
  0xab   : > { %v537_v61 = vadd.f32 %v536_v25, %v494_v54 }
  0xad   : > { %v405_v26 = vpop.f32.mrf.mxu0  ;;  %v542_v29 = vpop.f32.mrf.mxu3 }
  0xae   : > { %v454_v27 = vpop.f32.mrf.mxu1  ;;  %v498_v28 = vpop.f32.mrf.mxu2  ;;  %v406_v3 = vadd.f32 %v405_v26, %v2096_v63 }
  0xaf   : > { %v455_v55 = vadd.f32 %v454_v27, %v398_v52 }
  0xb1   : > { %v499_v62 = vadd.f32 %v498_v28, %v455_v55 }
  0xb3   : > { %v543_v4 = vadd.f32 %v542_v29, %v499_v62 }
  0xb5   : > { %v581_v32 = vpop.f32.mrf.mxu0  ;;  %v548_v34 = vpop.f32.mrf.mxu3 }
  0xb6   : > { %v458_v31 = vpop.f32.mrf.mxu1  ;;  %v503_v33 = vpop.f32.mrf.mxu2  ;;  %v582_v51 = vadd.f32 %v581_v32, %v531_v47 }
  0xb7   : > { %v459_v20 = vadd.f32 %v458_v31, %v406_v3 }
  0xb9   : > { %v504_v6 = vadd.f32 %v503_v33, %v459_v20 }
  0xbb   : > { %v549_v27 = vadd.f32 %v548_v34, %v504_v6 }
  0xbd   : > { %v585_v36 = vpop.f32.mrf.mxu0  ;;  %v724_v40 = vpop.f32.mrf.mxu3 }
  0xbe   : > { %v618_v37 = vpop.f32.mrf.mxu1  ;;  %v659_v39 = vpop.f32.mrf.mxu2  ;;  %v586_v0 = vadd.f32 %v585_v36, %v537_v61 }
  0xbf   : > { %v2093_v53 = vadd.f32 %v618_v37, %v582_v51  ;;  %v660_v12 = vadd.f32 %v659_v39, %v325_v30 }
  0xc1   : > { %v911_v58 = vsub.f32 0.0, %v2093_v53  ;;  %v725_v16 = vadd.f32 %v724_v40, %v660_v12 }
  0xc3   : > { %v919_v1 = vmul.f32 1.442695, %v911_v58 }
  0xc5   : > { %v589_v45 = vpop.f32.mrf.mxu0  ;;  %v728_v49 = vpop.f32.mrf.mxu3  ;;  %1711 = vpow2.f32 %v919_v1 }
  0xc6   : > { %v622_v46 = vpop.f32.mrf.mxu1  ;;  %v667_v48 = vpop.f32.mrf.mxu2  ;;  %v590_v15 = vadd.f32 %v589_v45, %v543_v4 }
  0xc7   : > { %v2098_v2 = vadd.f32 %v622_v46, %v586_v0  ;;  %v668_v25 = vadd.f32 %v667_v48, %v330_v41 }
  0xc9   : > { %v913_v19 = vsub.f32 0.0, %v2098_v2  ;;  %v729_v31 = vadd.f32 %v728_v49, %v668_v25 }
  0xcb   : > { %v923_v17 = vmul.f32 1.442695, %v913_v19  ;;  %v1712_v18 = vpop.eup %1711 }
  0xcc   : > { %v2107_v24 = vadd.f32 1.0, %v1712_v18 }
  0xcd   : > { %v593_v56 = vpop.f32.mrf.mxu0  ;;  %v732_v60 = vpop.f32.mrf.mxu3  ;;  %1713 = vpow2.f32 %v923_v17 }
  0xce   : > { %v626_v57 = vpop.f32.mrf.mxu1  ;;  %v675_v59 = vpop.f32.mrf.mxu2  ;;  %v594_v30 = vadd.f32 %v593_v56, %v549_v27  ;;  %1715 = vrcp.f32 %v2107_v24  ;;  %vm948_vm2 = vweird.f32 %v2107_v24 }
  0xcf   : > { %v2104_v21 = vadd.f32 %v626_v57, %v590_v15  ;;  %v676_v38 = vadd.f32 %v675_v59, %v335_v44 }
  0xd1   : > { %v915_v7 = vsub.f32 0.0, %v2104_v21  ;;  %v733_v49 = vadd.f32 %v732_v60, %v676_v38 }
  0xd3   : > { %v927_v28 = vmul.f32 1.442695, %v915_v7  ;;  %v1714_v35 = vpop.eup %1713 }
  0xd4   : > { %v2115_v43 = vadd.f32 1.0, %v1714_v35  ;;  %v2118_v47 = vpop.eup %1715 }
  0xd5   : > { %v766_v8 = vpop.f32.mrf.mxu0  ;;  %v2101_v11 = vpop.f32.mrf.mxu3  ;;  %1717 = vpow2.f32 %v927_v28  ;;  %v944_v44 = vmul.f32 %v2118_v47, %v2107_v24  ;;  %vm949_vm1 = vweird.f32 %v2118_v47 }
  0xd6   : > { %v630_v5 = vpop.f32.mrf.mxu1  ;;  %v683_v10 = vpop.f32.mrf.mxu2  ;;  %v767_v9 = vadd.f32 %v766_v8, %v725_v16  ;;  %vm2157_vm3 = vmor %vm948_vm2, %vm949_vm1  ;;  %vm978_vm10 = vweird.f32 %v2115_v43 }
  0xd7   : > { %v2112_v33 = vadd.f32 %v630_v5, %v594_v30  ;;  %v684_v58 = vadd.f32 %v683_v10, %v2096_v63  ;;  %v945_v1 = vsub.f32 1.0, %v944_v44 }
  0xd9   : > { %v917_v45 = vsub.f32 0.0, %v2112_v33  ;;  %v737_v12 = vadd.f32 %v2101_v11, %v684_v58  ;;  %v946_v63 = vmul.f32 %v2118_v47, %v945_v1  ;;  %v952_v11 = vand.u32 2147483647, %v2107_v24 }
  0xdb   : > { %v1718_v50 = vpop.eup %1717  ;;  %v931_v52 = vmul.f32 1.442695, %v917_v45  ;;  %vm2166_vm4 = vcmp.eq.f32.partialorder %v952_v11, 8.507059e+37 }
  0xdc   : > { %v2126_v57 = vadd.f32 1.0, %v1718_v50 }
  0xdd   : > { %v771_v13 = vpop.f32.mrf.mxu0  ;;  %v896_v23 = vpop.f32.mrf.mxu3 }
  0xde   : > { %v808_v14 = vpop.f32.mrf.mxu1  ;;  %v859_v22 = vpop.f32.mrf.mxu2  ;;  %v772_v36 = vadd.f32 %v771_v13, %v729_v31  ;;  %vm1008_vm14 = vweird.f32 %v2126_v57 }
  0xdf   : > { %v809_v26 = vadd.f32 %v808_v14, %v767_v9  ;;  %v947_v14 = vadd.f32 %v2118_v47, %v946_v63 }
  0xe1   : > { %v860_v29 = vadd.f32 %v859_v22, %v809_v26 }
  0xe3   : > { %v2110_v32 = vadd.f32 %v896_v23, %v860_v29  ;;  %v954_v29 = vand.u32 2147483648, %v2107_v24 }
  0xe5   : > { %v912_v39 = vsub.f32 0.0, %v2110_v32  ;;  %v900_v41 = vpop.f32.mrf.mxu3  ;;  %v776_v34 = vpop.f32.mrf.mxu0 }
  0xe6   : > { %v814_v37 = vpop.f32.mrf.mxu1  ;;  %v863_v40 = vpop.f32.mrf.mxu2  ;;  %v777_v54 = vadd.f32 %v776_v34, %v733_v49 }
  0xe7   : > { %v815_v42 = vadd.f32 %v814_v37, %v772_v36  ;;  %v921_v46 = vmul.f32 1.442695, %v912_v39  ;;  %v951_v36 = vsel %vm2157_vm3, %v2118_v47, %v947_v14  ;;  %v982_v47 = vand.u32 2147483647, %v2115_v43 }
  0xe9   : > { %v864_v48 = vadd.f32 %v863_v40, %v815_v42  ;;  %1719 = vpow2.f32 %v921_v46  ;;  %v955_v42 = vor.u32 1.1754944e-38, %v954_v29  ;;  %vm983_vm13 = vcmp.eq.f32.partialorder %v982_v47, 8.507059e+37 }
  0xea   : > { %1721 = vrcp.f32 %v2115_v43 }
  0xeb   : > { %v2120_v51 = vadd.f32 %v900_v41, %v864_v48  ;;  %1723 = vpow2.f32 %v931_v52  ;;  %v956_v44 = vsel %vm2166_vm4, %v955_v42, %v951_v36 }
  0xec   : > { %v2192_v1 = vmul.f32 %v956_v44, %v2093_v53 }
  0xed   : > { %v914_v55 = vsub.f32 0.0, %v2120_v51  ;;  %v904_v61 = vpop.f32.mrf.mxu3  ;;  %v781_v5 = vpop.f32.mrf.mxu0 }
  0xee   : > { %v820_v56 = vpop.f32.mrf.mxu1  ;;  %v867_v60 = vpop.f32.mrf.mxu2  ;;  %v782_v10 = vadd.f32 %v781_v5, %v737_v12 }
  0xef   : > { %v821_v59 = vadd.f32 %v820_v56, %v777_v54  ;;  %v925_v62 = vmul.f32 1.442695, %v914_v55  ;;  %v1720_v0 = vpop.eup %1719 }
  0xf0   : > { %v2129_v4 = vadd.f32 1.0, %v1720_v0  ;;  %v2131_v8 = vpop.eup %1721 }
  0xf1   : > { %v868_v3 = vadd.f32 %v867_v60, %v821_v59  ;;  %1725 = vpow2.f32 %v925_v62  ;;  %v974_v20 = vmul.f32 %v2131_v8, %v2115_v43  ;;  %v1724_v17 = vpop.eup %1723  ;;  %vm979_vm6 = vweird.f32 %v2131_v8 }
  0xf2   : > { %1727 = vrcp.f32 %v2126_v57  ;;  %v2149_v28 = vadd.f32 1.0, %v1724_v17  ;;  %v969_v40 = vand.u32 2147483648, %v2129_v4  ;;  %v967_v46 = vand.u32 2147483647, %v2129_v4  ;;  %vm2196_vm11 = vmor %vm978_vm10, %vm979_vm6 }
  0xf3   : > { %v2135_v15 = vadd.f32 %v904_v61, %v868_v3  ;;  %1729 = vrcp.f32 %v2129_v4  ;;  %v975_v27 = vsub.f32 1.0, %v974_v20  ;;  %vm963_vm7 = vweird.f32 %v2129_v4 }
  0xf4   : > { %v970_v56 = vor.u32 1.1754944e-38, %v969_v40  ;;  %v984_v59 = vand.u32 2147483648, %v2115_v43  ;;  %vm968_vm9 = vcmp.eq.f32.partialorder %v967_v46, 8.507059e+37  ;;  %v1044_v47 = vand.u32 2147483648, %v2149_v28 }
  0xf5   : > { %v916_v19 = vsub.f32 0.0, %v2135_v15  ;;  %v908_v25 = vpop.f32.mrf.mxu3  ;;  %v976_v39 = vmul.f32 %v2131_v8, %v975_v27  ;;  %vm1038_vm10 = vweird.f32 %v2149_v28 }
  0xf6   : > { %v826_v16 = vpop.f32.mrf.mxu1  ;;  %v871_v7 = vpop.f32.mrf.mxu2 }
  0xf7   : > { %v929_v18 = vmul.f32 1.442695, %v916_v19  ;;  %v827_v6 = vadd.f32 %v826_v16, %v782_v10  ;;  %v1726_v9 = vpop.eup %1725  ;;  %v977_v55 = vadd.f32 %v2131_v8, %v976_v39  ;;  %v985_v10 = vor.u32 1.1754944e-38, %v984_v59 }
  0xf8   : > { %v2144_v13 = vpop.eup %1727  ;;  %v2147_v22 = vadd.f32 1.0, %v1726_v9  ;;  %v1014_v9 = vand.u32 2147483648, %v2126_v57 }
  0xf9   : > { %1731 = vpow2.f32 %v929_v18  ;;  %v872_v23 = vadd.f32 %v871_v7, %v827_v6  ;;  %v1730_v26 = vpop.eup %1729  ;;  %v1004_v24 = vmul.f32 %v2144_v13, %v2126_v57  ;;  %v981_v43 = vsel %vm2196_vm11, %v2131_v8, %v977_v55 }
  0xfa   : > { %v959_v30 = vmul.f32 %v1730_v26, %v2129_v4  ;;  %1733 = vrcp.f32 %v2147_v22  ;;  %vm964_vm5 = vweird.f32 %v1730_v26  ;;  %v999_v12 = vand.u32 2147483648, %v2147_v22 }
  0xfb   : > { %v2161_v35 = vadd.f32 %v908_v25, %v872_v23  ;;  %1735 = vrcp.f32 %v2149_v28  ;;  %v1005_v52 = vsub.f32 1.0, %v1004_v24  ;;  %vm965_vm8 = vmor %vm963_vm7, %vm964_vm5  ;;  %v997_v53 = vand.u32 2147483647, %v2147_v22 }
  0xfc   : > { %v960_v38 = vsub.f32 1.0, %v959_v30  ;;  %vm1009_vm15 = vweird.f32 %v2144_v13  ;;  %vm993_vm0 = vweird.f32 %v2147_v22  ;;  %v986_v17 = vsel %vm983_vm13, %v985_v10, %v981_v43 }
  0xfd   : > { %v918_v41 = vsub.f32 0.0, %v2161_v35  ;;  %v1006_v4 = vmul.f32 %v2144_v13, %v1005_v52  ;;  %v1000_v6 = vor.u32 1.1754944e-38, %v999_v12  ;;  %vm998_vm2 = vcmp.eq.f32.partialorder %v997_v53, 8.507059e+37  ;;  %vm1010_vm3 = vmor %vm1008_vm14, %vm1009_vm15 }
  0xfe   : > { %v961_v45 = vmul.f32 %v1730_v26, %v960_v38  ;;  %v1012_v23 = vand.u32 2147483647, %v2126_v57  ;;  %v1015_v24 = vor.u32 1.1754944e-38, %v1014_v9 }
  0xff   : > { %v1732_v34 = vpop.eup %1731  ;;  %v933_v49 = vmul.f32 1.442695, %v918_v41  ;;  %v1007_v18 = vadd.f32 %v2144_v13, %v1006_v4 }
 0x100   : > { %v2179_v48 = vadd.f32 1.0, %v1732_v34  ;;  %v1734_v50 = vpop.eup %1733  ;;  %v962_v54 = vadd.f32 %v1730_v26, %v961_v45  ;;  %vm1013_vm5 = vcmp.eq.f32.partialorder %v1012_v23, 8.507059e+37 }
 0x101   : > { %v989_v58 = vmul.f32 %v1734_v50, %v2147_v22  ;;  %v2188_v61 = vpop.eup %1735  ;;  %vm994_vm12 = vweird.f32 %v1734_v50  ;;  %v2221_v22 = vmul.f32 %v986_v17, %v2098_v2  ;;  %v1011_v31 = vsel %vm1010_vm3, %v2144_v13, %v1007_v18 }
 0x102   : > { %1737 = vrcp.f32 %v2179_v48  ;;  %v966_v60 = vsel %vm965_vm8, %v1730_v26, %v962_v54  ;;  %v1034_v19 = vmul.f32 %v2188_v61, %v2149_v28  ;;  %vm995_vm1 = vmor %vm993_vm0, %vm994_vm12  ;;  %v1029_v30 = vand.u32 2147483648, %v2179_v48 }
 0x103   : > { %1739 = vpow2.f32 %v933_v49  ;;  %v971_v62 = vsel %vm968_vm9, %v970_v56, %v966_v60  ;;  %v990_v0 = vsub.f32 1.0, %v989_v58  ;;  %v1027_v37 = vand.u32 2147483647, %v2179_v48 }
 0x104   : > { %v2202_v5 = vmul.f32 %v971_v62, %v2110_v32  ;;  %v1035_v25 = vsub.f32 1.0, %v1034_v19  ;;  %vm1023_vm6 = vweird.f32 %v2179_v48  ;;  %v1030_v39 = vor.u32 1.1754944e-38, %v1029_v30 }
 0x105   : > { %v991_v63 = vmul.f32 %v1734_v50, %v990_v0  ;;  %vm1028_vm8 = vcmp.eq.f32.partialorder %v1027_v37, 8.507059e+37  ;;  %vm1039_vm9 = vweird.f32 %v2188_v61 }
 0x106   : > { %v1071_v20 = vadd.f32 %v2202_v5, %v2192_v1  ;;  %v1036_v57 = vmul.f32 %v2188_v61, %v1035_v25  ;;  %vm1040_vm11 = vmor %vm1038_vm10, %vm1039_vm9 }
 0x107   : > { %v992_v16 = vadd.f32 %v1734_v50, %v991_v63 }
 0x108   : > { %v1738_v32 = vpop.eup %1737  ;;  %1072 = vadd.xlane.f32.xlu2 %v1071_v20  ;;  %v1037_v42 = vadd.f32 %v2188_v61, %v1036_v57 }
 0x109   : > { %v1740_v8 = vpop.eup %1739  ;;  %v1019_v7 = vmul.f32 %v1738_v32, %v2179_v48  ;;  %v996_v11 = vsel %vm995_vm1, %v1734_v50, %v992_v16  ;;  %vm1024_vm4 = vweird.f32 %v1738_v32  ;;  %v1042_v48 = vand.u32 2147483647, %v2149_v28 }
 0x10a   : > { %v942_v14 = vadd.f32 1.0, %v1740_v8  ;;  %v1001_v26 = vsel %vm998_vm2, %v1000_v6, %v996_v11  ;;  %vm1025_vm7 = vmor %vm1023_vm6, %vm1024_vm4 }
 0x10b   : > { %v1020_v27 = vsub.f32 1.0, %v1019_v7  ;;  %v2228_v29 = vmul.f32 %v1001_v26, %v2120_v51  ;;  %v1016_v51 = vsel %vm1013_vm5, %v1015_v24, %v1011_v31  ;;  %vm1043_vm13 = vcmp.eq.f32.partialorder %v1042_v48, 8.507059e+37 }
 0x10c   : > { %1741 = vrcp.f32 %v942_v14  ;;  %v2239_v34 = vmul.f32 %v1016_v51, %v2104_v21  ;;  %v1059_v44 = vand.u32 2147483648, %v942_v14  ;;  %v1041_v21 = vsel %vm1040_vm11, %v2188_v61, %v1037_v42  ;;  %v1087_v42 = vld [vmem:[%s2557_s4] sm:$0xff] }
 0x10d   : > { %v1021_v36 = vmul.f32 %v1738_v32, %v1020_v27  ;;  %v1074_v2 = vadd.f32 %v2228_v29, %v2221_v22  ;;  %v1057_v54 = vand.u32 2147483647, %v942_v14  ;;  %vm1053_vm14 = vweird.f32 %v942_v14 }
 0x10e   : > { %v1060_v58 = vor.u32 1.1754944e-38, %v1059_v44 }
 0x10f   : > { %v1022_v38 = vadd.f32 %v1738_v32, %v1021_v36  ;;  %vm1058_vm0 = vcmp.eq.f32.partialorder %v1057_v54, 8.507059e+37  ;;  %v1088_v54 = vld [vmem:[%s2557_s4 + $0x8] sm:$0xff] }
 0x110   : > { %1075 = vadd.xlane.f32.xlu2 %v1074_v2 }
 0x111   : > { %v1026_v40 = vsel %vm1025_vm7, %v1738_v32, %v1022_v38 }
 0x112   : > { %v1742_v13 = vpop.eup %1741  ;;  %v1031_v41 = vsel %vm1028_vm8, %v1030_v39, %v1026_v40 }
 0x113   : > { %v2243_v45 = vmul.f32 %v1031_v41, %v2135_v15  ;;  %v1049_v46 = vmul.f32 %v1742_v13, %v942_v14  ;;  %vm1054_vm12 = vweird.f32 %v1742_v13  ;;  %v1045_v15 = vor.u32 1.1754944e-38, %v1044_v47 }
 0x114   : > { %vm1055_vm15 = vmor %vm1053_vm14, %vm1054_vm12 }
 0x115   : > { %v1050_v49 = vsub.f32 1.0, %v1049_v46  ;;  %v1077_v50 = vadd.f32 %v2243_v45, %v2239_v34  ;;  %v1046_v56 = vsel %vm1043_vm13, %v1045_v15, %v1041_v21 }
 0x116   : > { %v2252_v60 = vmul.f32 %v1046_v56, %v2112_v33 }
 0x117   : > { %v1051_v52 = vmul.f32 %v1742_v13, %v1050_v49  ;;  %1078 = vadd.xlane.f32.xlu0 %v1077_v50 }
 0x119   : > { %v1052_v55 = vadd.f32 %v1742_v13, %v1051_v52  ;;  %v1095_v52 = vld [vmem:[%s2558_s5] sm:$0xff] }
 0x11b   : > { %v1056_v28 = vsel %vm1055_vm15, %v1742_v13, %v1052_v55 }
 0x11c   : > { %v1061_v59 = vsel %vm1058_vm0, %v1060_v58, %v1056_v28 }
 0x11d   : > { %v2255_v62 = vmul.f32 %v1061_v59, %v2161_v35 }
 0x11f   : > { %v1080_v61 = vadd.f32 %v2255_v62, %v2252_v60 }
 0x121   : > { %1081 = vadd.xlane.f32.xlu1 %v1080_v61 }
 0x17b   : > { %v1073_v0 = vpop.xlane.xlu2 %1072 }
 0x17c   : > { %v2259_v3 = vmul.f32 0.00390625, %v1073_v0 }
 0x17e   : > { %v1179_v4 = vsub.f32 %v2192_v1, %v2259_v3  ;;  %v1180_v12 = vsub.f32 %v2202_v5, %v2259_v3  ;;  %v1091_v50 = vmul.f32 %v1087_v42, %v2259_v3 }
 0x180   : > { %v1187_v43 = vmul.f32 %v1179_v4, %v1179_v4  ;;  %v1188_v63 = vmul.f32 %v1180_v12, %v1180_v12  ;;  %v1099_v58 = vadd.f32 %v1095_v52, %v1091_v50  ;;  %v1319_v52 = vld [vmem:[%s2559_s6] sm:$0xff] }
 0x182   : > { %v1195_v33 = vadd.f32 %v1188_v63, %v1187_v43  ;;  %v1096_v43 = vld [vmem:[%s2558_s5 + $0x8] sm:$0xff] }
 0x183   : > { %v1076_v53 = vpop.xlane.xlu2 %1075 }
 0x184   : > { %v2265_v10 = vmul.f32 0.00390625, %v1076_v53  ;;  %1196 = vadd.xlane.f32.xlu2 %v1195_v33  ;;  %v1090_v33 = vld [vmem:[%s2557_s4 + $0x18] sm:$0xff] }
 0x186   : > { %v1181_v35 = vsub.f32 %v2221_v22, %v2265_v10  ;;  %v1182_v19 = vsub.f32 %v2228_v29, %v2265_v10  ;;  %v1092_v0 = vmul.f32 %v1088_v54, %v2265_v10 }
 0x188   : > { %v1189_v20 = vmul.f32 %v1181_v35, %v1181_v35  ;;  %v1190_v32 = vmul.f32 %v1182_v19, %v1182_v19  ;;  %v1103_v19 = vsub.f32 0.0, %v1099_v58 }
 0x18a   : > { %v1079_v16 = vpop.xlane.xlu0 %1078  ;;  %v1198_v17 = vadd.f32 %v1190_v32, %v1189_v20  ;;  %v1100_v32 = vadd.f32 %v1096_v43, %v1092_v0  ;;  %v1327_v43 = vld [vmem:[%s2560_s7] sm:$0xff] }
 0x18b   : > { %v2271_v8 = vmul.f32 0.00390625, %v1079_v16 }
 0x18c   : > { %1199 = vadd.xlane.f32.xlu2 %v1198_v17 }
 0x18d   : > { %v1183_v18 = vsub.f32 %v2239_v34, %v2271_v8  ;;  %v1184_v6 = vsub.f32 %v2243_v45, %v2271_v8 }
 0x18f   : > { %v1191_v7 = vmul.f32 %v1183_v18, %v1183_v18  ;;  %v1192_v9 = vmul.f32 %v1184_v6, %v1184_v6  ;;  %v1098_v6 = vld [vmem:[%s2558_s5 + $0x18] sm:$0xff] }
 0x191   : > { %v1201_v11 = vadd.f32 %v1192_v9, %v1191_v7 }
 0x194   : > { %v1082_v14 = vpop.xlane.xlu1 %1081  ;;  %1202 = vadd.xlane.f32.xlu2 %v1201_v11  ;;  %v1107_v11 = vmul.f32 1.442695, %v1103_v19 }
 0x195   : > { %v2277_v23 = vmul.f32 0.00390625, %v1082_v14 }
 0x197   : > { %v1185_v25 = vsub.f32 %v2252_v60, %v2277_v23  ;;  %v1186_v26 = vsub.f32 %v2255_v62, %v2277_v23  ;;  %v1094_v17 = vmul.f32 %v1090_v33, %v2277_v23 }
 0x199   : > { %v1193_v27 = vmul.f32 %v1185_v25, %v1185_v25  ;;  %v1194_v30 = vmul.f32 %v1186_v26, %v1186_v26  ;;  %v1104_v26 = vsub.f32 0.0, %v1100_v32 }
 0x19b   : > { %v1204_v31 = vadd.f32 %v1194_v30, %v1193_v27 }
 0x19d   : > { %1205 = vadd.xlane.f32.xlu2 %v1204_v31  ;;  %v1102_v31 = vadd.f32 %v1098_v6, %v1094_v17 }
 0x1f7   : > { %v1197_v36 = vpop.xlane.xlu2 %1196 }
 0x1f8   : > { %v1207_v37 = vmul.f32 0.00390625, %v1197_v36 }
 0x1fa   : > { %v1211_v24 = vadd.f32 1e-05, %v1207_v37 }
 0x1fc   : > { %1743 = vrsqrt.f32 %v1211_v24  ;;  %vm1222_vm1 = vcmp.eq.f32.partialorder %v1211_v24, inf  ;;  %v1225_v56 = vand.u32 2147483648, %v1211_v24  ;;  %vm1224_vm2 = vcmp.eq.f32.partialorder %v1211_v24, 0.0 }
 0x1ff   : > { %v1200_v2 = vpop.xlane.xlu2 %1199 }
 0x200   : > { %v1208_v57 = vmul.f32 0.00390625, %v1200_v2  ;;  %v1089_v2 = vld [vmem:[%s2557_s4 + $0x10] sm:$0xff] }
 0x201   : > { %v1093_v42 = vmul.f32 %v1089_v2, %v2271_v8  ;;  %v1320_v2 = vld [vmem:[%s2559_s6 + $0x8] sm:$0xff] }
 0x202   : > { %v1744_v38 = vpop.eup %1743  ;;  %v1212_v51 = vadd.f32 1e-05, %v1208_v57 }
 0x203   : > { %v1216_v39 = vmul.f32 %v1744_v38, %v1211_v24 }
 0x204   : > { %1745 = vrsqrt.f32 %v1212_v51  ;;  %vm1234_vm3 = vcmp.eq.f32.partialorder %v1212_v51, inf  ;;  %v1237_v14 = vand.u32 2147483648, %v1212_v51  ;;  %vm1236_vm4 = vcmp.eq.f32.partialorder %v1212_v51, 0.0 }
 0x205   : > { %v1217_v40 = vmul.f32 %v1744_v38, %v1216_v39 }
 0x207   : > { %v1203_v13 = vpop.xlane.xlu2 %1202  ;;  %v1218_v41 = vmul.f32 0.5, %v1217_v40 }
 0x208   : > { %v1209_v46 = vmul.f32 0.00390625, %v1203_v13  ;;  %v1109_v13 = vmul.f32 1.442695, %v1104_v26 }
 0x209   : > { %v1219_v47 = vsub.f32 1.5, %v1218_v41 }
 0x20a   : > { %v1746_v48 = vpop.eup %1745  ;;  %v2286_v49 = vadd.f32 1e-05, %v1209_v46  ;;  %v1106_v46 = vsub.f32 0.0, %v1102_v31 }
 0x20b   : > { %v1228_v44 = vmul.f32 %v1746_v48, %v1212_v51  ;;  %v1220_v21 = vmul.f32 %v1744_v38, %v1219_v47 }
 0x20c   : > { %1747 = vrsqrt.f32 %v2286_v49  ;;  %vm1246_vm7 = vcmp.eq.f32.partialorder %v2286_v49, inf  ;;  %vm1248_vm9 = vcmp.eq.f32.partialorder %v2286_v49, 0.0 }
 0x20d   : > { %v1221_v15 = vmul.f32 %v1220_v21, %v1211_v24  ;;  %v1229_v55 = vmul.f32 %v1746_v48, %v1228_v44  ;;  %v1249_v44 = vand.u32 2147483648, %v2286_v49 }
 0x20f   : > { %v1223_v59 = vsel %vm1222_vm1, %v1211_v24, %v1221_v15  ;;  %v1230_v61 = vmul.f32 0.5, %v1229_v55 }
 0x210   : > { %v1206_v28 = vpop.xlane.xlu2 %1205  ;;  %v1226_v12 = vsel %vm1224_vm2, %v1225_v56, %v1223_v59  ;;  %v1097_v56 = vld [vmem:[%s2558_s5 + $0x10] sm:$0xff] }
 0x211   : > { %v1210_v4 = vmul.f32 0.00390625, %v1206_v28  ;;  %1749 = vrcp.f32 %v1226_v12  ;;  %v1231_v35 = vsub.f32 1.5, %v1230_v61  ;;  %v1274_v39 = vand.u32 2147483648, %v1226_v12 }
 0x212   : > { %v1748_v63 = vpop.eup %1747  ;;  %vm1268_vm6 = vweird.f32 %v1226_v12 }
 0x213   : > { %v2303_v53 = vadd.f32 1e-05, %v1210_v4  ;;  %v1240_v20 = vmul.f32 %v1748_v63, %v2286_v49  ;;  %v1232_v16 = vmul.f32 %v1746_v48, %v1231_v35  ;;  %v1275_v21 = vor.u32 1.1754944e-38, %v1274_v39 }
 0x214   : > { %v1113_v4 = vmul.f32 1.442695, %v1106_v46  ;;  %v1321_v46 = vld [vmem:[%s2559_s6 + $0x10] sm:$0xff] }
 0x215   : > { %1751 = vrsqrt.f32 %v2303_v53  ;;  %v1241_v18 = vmul.f32 %v1748_v63, %v1240_v20  ;;  %v1233_v7 = vmul.f32 %v1232_v16, %v1212_v51  ;;  %vm1258_vm14 = vcmp.eq.f32.partialorder %v2303_v53, inf }
 0x216   : > { %vm1260_vm15 = vcmp.eq.f32.partialorder %v2303_v53, 0.0 }
 0x217   : > { %v1750_v9 = vpop.eup %1749  ;;  %v1242_v25 = vmul.f32 0.5, %v1241_v18  ;;  %v1235_v30 = vsel %vm1234_vm3, %v1212_v51, %v1233_v7  ;;  %v1272_v51 = vand.u32 2147483647, %v1226_v12 }
 0x218   : > { %v1264_v27 = vmul.f32 %v1750_v9, %v1226_v12  ;;  %v2311_v36 = vsel %vm1236_vm4, %v1237_v14, %v1235_v30  ;;  %vm1269_vm5 = vweird.f32 %v1750_v9  ;;  %v1261_v14 = vand.u32 2147483648, %v2303_v53 }
 0x219   : > { %v1243_v37 = vsub.f32 1.5, %v1242_v25  ;;  %1753 = vrcp.f32 %v2311_v36  ;;  %vm1270_vm8 = vmor %vm1268_vm6, %vm1269_vm5  ;;  %vm1273_vm10 = vcmp.eq.f32.partialorder %v1272_v51, 8.507059e+37  ;;  %v1288_v20 = vand.u32 2147483648, %v2311_v36 }
 0x21a   : > { %v1265_v57 = vsub.f32 1.0, %v1264_v27  ;;  %1755 = vpow2.f32 %v1107_v11  ;;  %v1286_v18 = vand.u32 2147483647, %v2311_v36  ;;  %vm1282_vm12 = vweird.f32 %v2311_v36 }
 0x21b   : > { %v1752_v24 = vpop.eup %1751  ;;  %v1244_v40 = vmul.f32 %v1748_v63, %v1243_v37  ;;  %v1289_v27 = vor.u32 1.1754944e-38, %v1288_v20 }
 0x21c   : > { %v1252_v38 = vmul.f32 %v1752_v24, %v2303_v53  ;;  %v1266_v41 = vmul.f32 %v1750_v9, %v1265_v57  ;;  %vm1287_vm0 = vcmp.eq.f32.partialorder %v1286_v18, 8.507059e+37 }
 0x21d   : > { %v1245_v47 = vmul.f32 %v1244_v40, %v2286_v49 }
 0x21e   : > { %v1253_v48 = vmul.f32 %v1752_v24, %v1252_v38  ;;  %v1267_v50 = vadd.f32 %v1750_v9, %v1266_v41 }
 0x21f   : > { %v1247_v54 = vsel %vm1246_vm7, %v2286_v49, %v1245_v47  ;;  %v1754_v55 = vpop.eup %1753  ;;  %v1101_v49 = vadd.f32 %v1097_v56, %v1093_v42 }
 0x220   : > { %v1254_v15 = vmul.f32 0.5, %v1253_v48  ;;  %v1271_v58 = vsel %vm1270_vm8, %v1750_v9, %v1267_v50  ;;  %v2330_v28 = vsel %vm1248_vm9, %v1249_v44, %v1247_v54  ;;  %v1756_v59 = vpop.eup %1755  ;;  %v1278_v0 = vmul.f32 %v1754_v55, %v2311_v36 }
 0x221   : > { %v1276_v61 = vsel %vm1273_vm10, %v1275_v21, %v1271_v58  ;;  %1757 = vrcp.f32 %v2330_v28  ;;  %vm1283_vm11 = vweird.f32 %v1754_v55  ;;  %v2339_v16 = vadd.f32 1.0, %v1756_v59 }
 0x222   : > { %v1323_v12 = vmul.f32 %v1319_v52, %v1276_v61  ;;  %1759 = vpow2.f32 %v1109_v13  ;;  %v1279_v63 = vsub.f32 1.0, %v1278_v0  ;;  %v1255_v33 = vsub.f32 1.5, %v1254_v15  ;;  %vm1284_vm13 = vmor %vm1282_vm12, %vm1283_vm11  ;;  %v1329_v0 = vld [vmem:[%s2560_s7 + $0x10] sm:$0xff] }
 0x223   : > { %1761 = vpow2.f32 %v1113_v4  ;;  %v1105_v7 = vsub.f32 0.0, %v1101_v49  ;;  %v1302_v57 = vand.u32 2147483648, %v2330_v28  ;;  %vm1296_vm2 = vweird.f32 %v2330_v28 }
 0x224   : > { %1341 = vperm.xlu2 %1710, %v1323_v12   ;;  %v1331_v35 = vmul.f32 %v1323_v12, %v2259_v3  ;;  %v1280_v19 = vmul.f32 %v1754_v55, %v1279_v63  ;;  %v1256_v32 = vmul.f32 %v1752_v24, %v1255_v33  ;;  %1763 = vrcp.f32 %v2339_v16 }
 0x225   : > { %v1111_v37 = vmul.f32 1.442695, %v1105_v7  ;;  %v1303_v42 = vor.u32 1.1754944e-38, %v1302_v57  ;;  %vm1124_vm10 = vweird.f32 %v2339_v16 }
 0x226   : > { %v1335_v17 = vsub.f32 %v1327_v43, %v1331_v35  ;;  %v1281_v9 = vadd.f32 %v1754_v55, %v1280_v19  ;;  %v1257_v11 = vmul.f32 %v1256_v32, %v2303_v53 }
 0x227   : > { %v1758_v6 = vpop.eup %1757 }
 0x228   : > { %1369 = vperm.xlu0 %1708, %v1335_v17   ;;  %v1292_v3 = vmul.f32 %v1758_v6, %v2330_v28  ;;  %v1760_v25 = vpop.eup %1759  ;;  %v1285_v26 = vsel %vm1284_vm13, %v1754_v55, %v1281_v9  ;;  %v1259_v30 = vsel %vm1258_vm14, %v2303_v53, %v1257_v11  ;;  %vm1297_vm1 = vweird.f32 %v1758_v6  ;;  %v1548_v11 = vld [vmem:[%s2556_s3 + $0x8] sm:$0xff] }
 0x229   : > { %v1262_v36 = vsel %vm1260_vm15, %v1261_v14, %v1259_v30  ;;  %v1290_v24 = vsel %vm1287_vm0, %v1289_v27, %v1285_v26  ;;  %v1762_v38 = vpop.eup %1761  ;;  %v2354_v39 = vadd.f32 1.0, %v1760_v25  ;;  %v1300_v53 = vand.u32 2147483647, %v2330_v28  ;;  %vm1298_vm3 = vmor %vm1296_vm2, %vm1297_vm1 }
 0x22a   : > { %v1293_v31 = vsub.f32 1.0, %v1292_v3  ;;  %1765 = vrcp.f32 %v1262_v36  ;;  %v1324_v13 = vmul.f32 %v1320_v2, %v1290_v24  ;;  %v2358_v51 = vadd.f32 1.0, %v1762_v38  ;;  %v2363_v47 = vpop.eup %1763  ;;  %v1549_v38 = vld [vmem:[%s2556_s3 + $0x10] sm:$0xff] }
 0x22b   : > { %1767 = vpow2.f32 %v1111_v37  ;;  %vm1301_vm4 = vcmp.eq.f32.partialorder %v1300_v53, 8.507059e+37  ;;  %v1120_v54 = vmul.f32 %v2363_v47, %v2339_v16  ;;  %v1316_v56 = vand.u32 2147483648, %v1262_v36 }
 0x22c   : > { %v1294_v40 = vmul.f32 %v1758_v6, %v1293_v31  ;;  %1769 = vrcp.f32 %v2354_v39  ;;  %v1314_v61 = vand.u32 2147483647, %v1262_v36  ;;  %vm1310_vm6 = vweird.f32 %v1262_v36  ;;  %v1328_v31 = vld [vmem:[%s2560_s7 + $0x8] sm:$0xff] }
 0x22d   : > { %1771 = vrcp.f32 %v2358_v51  ;;  %v1121_v4 = vsub.f32 1.0, %v1120_v54  ;;  %v1317_v63 = vor.u32 1.1754944e-38, %v1316_v56  ;;  %vm1125_vm9 = vweird.f32 %v2363_v47 }
 0x22e   : > { %v1295_v41 = vadd.f32 %v1758_v6, %v1294_v40  ;;  %vm1315_vm8 = vcmp.eq.f32.partialorder %v1314_v61, 8.507059e+37  ;;  %v1130_v14 = vand.u32 2147483648, %v2339_v16  ;;  %v1556_v26 = vsub.f32 1.0, %v1548_v11  ;;  %vm1126_vm11 = vmor %vm1124_vm10, %vm1125_vm9  ;;  %v1550_v61 = vld [vmem:[%s2556_s3 + $0x18] sm:$0xff] }
 0x22f   : > { %v1122_v32 = vmul.f32 %v2363_v47, %v1121_v4  ;;  %v1332_v27 = vmul.f32 %v1324_v13, %v2265_v10  ;;  %vm1139_vm14 = vweird.f32 %v2354_v39  ;;  %vm1169_vm1 = vweird.f32 %v2358_v51 }
 0x230   : > { %1346 = vperm.xlu0 %1708, %v1324_v13   ;;  %v1299_v48 = vsel %vm1298_vm3, %v1758_v6, %v1295_v41  ;;  %v1766_v50 = vpop.eup %1765  ;;  %v1330_v6 = vld [vmem:[%s2560_s7 + $0x18] sm:$0xff]  ;;  %v1131_v57 = vor.u32 1.1754944e-38, %v1130_v14  ;;  %v1547_v13 = vld [vmem:[%s2556_s3] sm:$0xff]  ;;  %v1173_v54 = vand.u32 2147483647, %v2358_v51  ;;  %v1558_v4 = vsub.f32 1.0, %v1550_v61 }
 0x231   : > { %v1304_v44 = vsel %vm1301_vm4, %v1303_v42, %v1299_v48  ;;  %v1306_v52 = vmul.f32 %v1766_v50, %v1262_v36  ;;  %v1768_v55 = vpop.eup %1767  ;;  %vm1311_vm5 = vweird.f32 %v1766_v50  ;;  %v1123_v3 = vadd.f32 %v2363_v47, %v1122_v32 }
 0x232   : > { %v1325_v21 = vmul.f32 %v1321_v46, %v1304_v44  ;;  %v2369_v58 = vpop.eup %1769  ;;  %v2377_v43 = vadd.f32 1.0, %v1768_v55  ;;  %vm1312_vm7 = vmor %vm1310_vm6, %vm1311_vm5  ;;  %v1336_v2 = vsub.f32 %v1328_v31, %v1332_v27  ;;  %v1145_v42 = vand.u32 2147483648, %v2354_v39 }
 0x233   : > { %v1307_v15 = vsub.f32 1.0, %v1306_v52  ;;  %v2375_v49 = vpop.eup %1771  ;;  %v1135_v33 = vmul.f32 %v2369_v58, %v2354_v39  ;;  %v1127_v24 = vsel %vm1126_vm11, %v2363_v47, %v1123_v3  ;;  %vm1140_vm13 = vweird.f32 %v2369_v58 }
 0x234   : > { %1351 = vperm.xlu1 %1709, %v1325_v21   ;;  %v1333_v28 = vmul.f32 %v1325_v21, %v2271_v8  ;;  %v1322_v8 = vld [vmem:[%s2559_s6 + $0x18] sm:$0xff]  ;;  %v1165_v18 = vmul.f32 %v2375_v49, %v2358_v51  ;;  %1773 = vrcp.f32 %v2377_v43  ;;  %vm2418_vm15 = vmor %vm1139_vm14, %vm1140_vm13  ;;  %v1143_v47 = vand.u32 2147483647, %v2354_v39 }
 0x235   : > { %v1308_v59 = vmul.f32 %v1766_v50, %v1307_v15  ;;  %v1136_v7 = vsub.f32 1.0, %v1135_v33  ;;  %vm1170_vm0 = vweird.f32 %v2375_v49  ;;  %v1175_v21 = vand.u32 2147483648, %v2358_v51 }
 0x236   : > { %v1337_v35 = vsub.f32 %v1329_v0, %v1333_v28  ;;  %v1166_v30 = vsub.f32 1.0, %v1165_v18  ;;  %v1555_v52 = vsub.f32 1.0, %v1547_v13  ;;  %v1146_v55 = vor.u32 1.1754944e-38, %v1145_v42  ;;  %vm1171_vm2 = vmor %vm1169_vm1, %vm1170_vm0 }
 0x237   : > { %v1309_v12 = vadd.f32 %v1766_v50, %v1308_v59  ;;  %v1137_v36 = vmul.f32 %v2369_v58, %v1136_v7  ;;  %vm1144_vm3 = vcmp.eq.f32.partialorder %v1143_v47, 8.507059e+37  ;;  %v1176_v28 = vor.u32 1.1754944e-38, %v1175_v21 }
 0x238   : > { %v1167_v10 = vmul.f32 %v2375_v49, %v1166_v30  ;;  %vm1174_vm4 = vcmp.eq.f32.partialorder %v1173_v54, 8.507059e+37  ;;  %vm1154_vm6 = vweird.f32 %v2377_v43 }
 0x239   : > { %v1313_v19 = vsel %vm1312_vm7, %v1766_v50, %v1309_v12  ;;  %v1138_v40 = vadd.f32 %v2369_v58, %v1137_v36 }
 0x23a   : > { %v1318_v20 = vsel %vm1315_vm8, %v1317_v63, %v1313_v19  ;;  %v1774_v37 = vpop.eup %1773  ;;  %v1168_v48 = vadd.f32 %v2375_v49, %v1167_v10  ;;  %v1160_v63 = vand.u32 2147483648, %v2377_v43 }
 0x23b   : > { %v1326_v17 = vmul.f32 %v1322_v8, %v1318_v20  ;;  %v1150_v41 = vmul.f32 %v1774_v37, %v2377_v43  ;;  %v1142_v44 = vsel %vm2418_vm15, %v2369_v58, %v1138_v40  ;;  %vm1155_vm5 = vweird.f32 %v1774_v37 }
 0x23c   : > { %1379 = vperm.xlu1 %1709, %v1337_v35   ;;  %v1172_v39 = vsel %vm1171_vm2, %v2375_v49, %v1168_v48  ;;  %v1147_v56 = vsel %vm1144_vm3, %v1146_v55, %v1142_v44  ;;  %v1158_v49 = vand.u32 2147483647, %v2377_v43  ;;  %vm1156_vm7 = vmor %vm1154_vm6, %vm1155_vm5  ;;  %v1161_v33 = vor.u32 1.1754944e-38, %v1160_v63 }
 0x23d   : > { %1356 = vperm.xlu2 %1710, %v1326_v17   ;;  %v1334_v9 = vmul.f32 %v1326_v17, %v2277_v23  ;;  %v1128_v23 = vand.u32 2147483647, %v2339_v16  ;;  %v1557_v16 = vsub.f32 1.0, %v1549_v38  ;;  %v1151_v15 = vsub.f32 1.0, %v1150_v41 }
 0x23e   : > { %v1177_v59 = vsel %vm1174_vm4, %v1176_v28, %v1172_v39  ;;  %v1552_v0 = vmul.f32 %v1548_v11, %v1147_v56  ;;  %vm1159_vm8 = vcmp.eq.f32.partialorder %v1158_v49, 8.507059e+37 }
 0x23f   : > { %v1338_v25 = vsub.f32 %v1330_v6, %v1334_v9  ;;  %vm1129_vm12 = vcmp.eq.f32.partialorder %v1128_v23, 8.507059e+37  ;;  %v1152_v58 = vmul.f32 %v1774_v37, %v1151_v15  ;;  %v1554_v51 = vmul.f32 %v1550_v61, %v1177_v59 }
 0x240   : > { %v1132_v53 = vsel %vm1129_vm12, %v1131_v57, %v1127_v24 }
 0x241   : > { %1384 = vperm.xlu0 %1708, %v1338_v25   ;;  %v1551_v50 = vmul.f32 %v1547_v13, %v1132_v53  ;;  %v1153_v12 = vadd.f32 %v1774_v37, %v1152_v58 }
 0x243   : > { %v1157_v8 = vsel %vm1156_vm7, %v1774_v37, %v1153_v12 }
 0x244   : > { %1566 = vperm.xlu1 %1709, %v1556_v26   ;;  %v1162_v35 = vsel %vm1159_vm8, %v1161_v33, %v1157_v8 }
 0x245   : > { %1374 = vperm.xlu2 %1710, %v1336_v2   ;;  %v1553_v19 = vmul.f32 %v1549_v38, %v1162_v35 }
 0x249   : > { %1571 = vperm.xlu0 %1708, %v1557_v16  }
 0x24c   : > { %1589 = vperm.xlu1 %1709, %v1551_v50  }
 0x24d   : > { %1561 = vperm.xlu2 %1710, %v1555_v52  }
 0x251   : > { %1594 = vperm.xlu0 %1708, %v1552_v0  }
 0x254   : > { %1604 = vperm.xlu1 %1709, %v1554_v51  }
 0x255   : > { %1576 = vperm.xlu2 %1710, %v1558_v4  }
 0x25d   : > { %1599 = vperm.xlu2 %1710, %v1553_v19  }
 0x27e   : > { %v1342_v20 = vpop.permute.xlu2 %1341 }
 0x27f   : > { %v1359_v32 = vmul.f32 %v1342_v20, %v2192_v1  ;;  %v1360_v17 = vmul.f32 %v1342_v20, %v2202_v5 }
 0x297   : > { %v1357_v18 = vpop.permute.xlu2 %1356 }
 0x298   : > { %v1365_v48 = vmul.f32 %v1357_v18, %v2252_v60  ;;  %v1366_v44 = vmul.f32 %v1357_v18, %v2255_v62 }
 0x29a   : > { %v1370_v6 = vpop.permute.xlu0 %1369 }
 0x29b   : > { %v1387_v7 = vadd.f32 %v1370_v6, %v1359_v32  ;;  %v1388_v9 = vadd.f32 %v1370_v6, %v1360_v17 }
 0x29d   : > { %v1395_v11 = vsub.f32 0.0, %v1387_v7  ;;  %v1396_v3 = vsub.f32 0.0, %v1388_v9 }
 0x29f   : > { %v1403_v43 = vmul.f32 1.442695, %v1395_v11  ;;  %v1405_v14 = vmul.f32 1.442695, %v1396_v3  ;;  %v1375_v30 = vpop.permute.xlu2 %1374 }
 0x2a1   : > { %1775 = vpow2.f32 %v1403_v43 }
 0x2a2   : > { %1777 = vpow2.f32 %v1405_v14  ;;  %v1347_v25 = vpop.permute.xlu0 %1346 }
 0x2a3   : > { %v1361_v26 = vmul.f32 %v1347_v25, %v2221_v22  ;;  %v1362_v27 = vmul.f32 %v1347_v25, %v2228_v29 }
 0x2a5   : > { %v1389_v31 = vadd.f32 %v1375_v30, %v1361_v26  ;;  %v1390_v23 = vadd.f32 %v1375_v30, %v1362_v27 }
 0x2a6   : > { %v1352_v36 = vpop.permute.xlu1 %1351 }
 0x2a7   : > { %v1776_v37 = vpop.eup %1775  ;;  %v1397_v24 = vsub.f32 0.0, %v1389_v31  ;;  %v1398_v2 = vsub.f32 0.0, %v1390_v23  ;;  %v1363_v53 = vmul.f32 %v1352_v36, %v2239_v34  ;;  %v1364_v13 = vmul.f32 %v1352_v36, %v2243_v45  ;;  %v1562_v36 = vpop.permute.xlu2 %1561 }
 0x2a8   : > { %v1778_v57 = vpop.eup %1777  ;;  %v1419_v10 = vadd.f32 1.0, %v1776_v37 }
 0x2a9   : > { %v1420_v38 = vadd.f32 1.0, %v1778_v57  ;;  %v1407_v40 = vmul.f32 1.442695, %v1397_v24  ;;  %v1409_v16 = vmul.f32 1.442695, %v1398_v2 }
 0x2aa   : > { %1779 = vrcp.f32 %v1419_v10  ;;  %vm1432_vm9 = vweird.f32 %v1419_v10  ;;  %v1436_v55 = vand.u32 2147483647, %v1419_v10  ;;  %v1438_v39 = vand.u32 2147483648, %v1419_v10 }
 0x2ab   : > { %1781 = vrcp.f32 %v1420_v38  ;;  %v1451_v61 = vand.u32 2147483647, %v1420_v38  ;;  %v1453_v19 = vand.u32 2147483648, %v1420_v38  ;;  %vm1447_vm13 = vweird.f32 %v1420_v38 }
 0x2ac   : > { %1783 = vpow2.f32 %v1407_v40  ;;  %v1439_v9 = vor.u32 1.1754944e-38, %v1438_v39  ;;  %vm1437_vm15 = vcmp.eq.f32.partialorder %v1436_v55, 8.507059e+37 }
 0x2ad   : > { %1785 = vpow2.f32 %v1409_v16  ;;  %v1454_v14 = vor.u32 1.1754944e-38, %v1453_v19  ;;  %vm1452_vm0 = vcmp.eq.f32.partialorder %v1451_v61, 8.507059e+37 }
 0x2ae   : > { %v1380_v41 = vpop.permute.xlu1 %1379 }
 0x2af   : > { %v1391_v42 = vadd.f32 %v1380_v41, %v1363_v53  ;;  %v1392_v46 = vadd.f32 %v1380_v41, %v1364_v13 }
 0x2b0   : > { %v1780_v47 = vpop.eup %1779 }
 0x2b1   : > { %v1782_v50 = vpop.eup %1781  ;;  %v1428_v21 = vmul.f32 %v1780_v47, %v1419_v10  ;;  %v1399_v52 = vsub.f32 0.0, %v1391_v42  ;;  %v1400_v54 = vsub.f32 0.0, %v1392_v46  ;;  %vm1433_vm10 = vweird.f32 %v1780_v47 }
 0x2b2   : > { %v1784_v15 = vpop.eup %1783  ;;  %v1443_v56 = vmul.f32 %v1782_v50, %v1420_v38  ;;  %vm1448_vm11 = vweird.f32 %v1782_v50  ;;  %vm1434_vm12 = vmor %vm1432_vm9, %vm1433_vm10 }
 0x2b3   : > { %v1786_v28 = vpop.eup %1785  ;;  %v2446_v58 = vadd.f32 1.0, %v1784_v15  ;;  %v1429_v59 = vsub.f32 1.0, %v1428_v21  ;;  %v1411_v0 = vmul.f32 1.442695, %v1399_v52  ;;  %v1413_v12 = vmul.f32 1.442695, %v1400_v54  ;;  %v1385_v63 = vpop.permute.xlu0 %1384  ;;  %vm1449_vm14 = vmor %vm1447_vm13, %vm1448_vm11 }
 0x2b4   : > { %v2448_v51 = vadd.f32 1.0, %v1786_v28  ;;  %v1444_v4 = vsub.f32 1.0, %v1443_v56  ;;  %v1393_v8 = vadd.f32 %v1385_v63, %v1365_v48  ;;  %v1394_v33 = vadd.f32 %v1385_v63, %v1366_v44 }
 0x2b5   : > { %1787 = vrcp.f32 %v2446_v58  ;;  %v1430_v49 = vmul.f32 %v1780_v47, %v1429_v59  ;;  %vm1462_vm1 = vweird.f32 %v2446_v58  ;;  %v1466_v37 = vand.u32 2147483647, %v2446_v58 }
 0x2b6   : > { %1789 = vrcp.f32 %v2448_v51  ;;  %v1445_v35 = vmul.f32 %v1782_v50, %v1444_v4  ;;  %v2452_v20 = vpop.permute.xlu1 %1566  ;;  %v1401_v17 = vsub.f32 0.0, %v1393_v8  ;;  %v1402_v18 = vsub.f32 0.0, %v1394_v33 }
 0x2b7   : > { %v1431_v32 = vadd.f32 %v1780_v47, %v1430_v49  ;;  %1791 = vpow2.f32 %v1411_v0  ;;  %v1468_v24 = vand.u32 2147483648, %v2446_v58  ;;  %v1481_v53 = vand.u32 2147483647, %v2448_v51 }
 0x2b8   : > { %v1446_v6 = vadd.f32 %v1782_v50, %v1445_v35  ;;  %1793 = vpow2.f32 %v1413_v12  ;;  %v1415_v11 = vmul.f32 1.442695, %v1401_v17  ;;  %v1417_v3 = vmul.f32 1.442695, %v1402_v18  ;;  %v2501_v18 = vpop.permute.xlu2 %1576 }
 0x2b9   : > { %v1435_v7 = vsel %vm1434_vm12, %v1780_v47, %v1431_v32  ;;  %v1483_v47 = vand.u32 2147483648, %v2448_v51  ;;  %vm2471_vm3 = vcmp.eq.f32.partialorder %v1466_v37, 8.507059e+37  ;;  %vm1477_vm5 = vweird.f32 %v2448_v51 }
 0x2ba   : > { %v1450_v43 = vsel %vm1449_vm14, %v1782_v50, %v1446_v6  ;;  %v1440_v26 = vsel %vm1437_vm15, %v1439_v9, %v1435_v7  ;;  %1795 = vpow2.f32 %v1415_v11  ;;  %v1469_v28 = vor.u32 1.1754944e-38, %v1468_v24 }
 0x2bb   : > { %v1788_v25 = vpop.eup %1787  ;;  %v1455_v30 = vsel %vm1452_vm0, %v1454_v14, %v1450_v43  ;;  %1797 = vpow2.f32 %v1417_v3  ;;  %v2461_v57 = vpop.permute.xlu0 %1571  ;;  %v1579_v38 = vmul.f32 %v1562_v36, %v1440_v26  ;;  %vm1482_vm7 = vcmp.eq.f32.partialorder %v1481_v53, 8.507059e+37 }
 0x2bc   : > { %v1790_v27 = vpop.eup %1789  ;;  %v1458_v31 = vmul.f32 %v1788_v25, %v2446_v58  ;;  %v1580_v41 = vmul.f32 %v1562_v36, %v1455_v30  ;;  %vm1463_vm2 = vweird.f32 %v1788_v25  ;;  %v1484_v0 = vor.u32 1.1754944e-38, %v1483_v47 }
 0x2bd   : > { %v1792_v23 = vpop.eup %1791  ;;  %v1473_v2 = vmul.f32 %v1790_v27, %v2448_v51  ;;  %vm1478_vm4 = vweird.f32 %v1790_v27  ;;  %vm1464_vm6 = vmor %vm1462_vm1, %vm1463_vm2 }
 0x2be   : > { %v1794_v10 = vpop.eup %1793  ;;  %v2463_v40 = vadd.f32 1.0, %v1792_v23  ;;  %v1459_v16 = vsub.f32 1.0, %v1458_v31  ;;  %v1590_v13 = vpop.permute.xlu1 %1589  ;;  %vm1479_vm8 = vmor %vm1477_vm5, %vm1478_vm4 }
 0x2bf   : > { %v2466_v42 = vadd.f32 1.0, %v1794_v10  ;;  %v1474_v46 = vsub.f32 1.0, %v1473_v2  ;;  %v1607_v50 = vadd.f32 %v1590_v13, %v1579_v38  ;;  %v1608_v39 = vadd.f32 %v1590_v13, %v1580_v41 }
 0x2c0   : > { %1799 = vrcp.f32 %v2463_v40  ;;  %v1460_v48 = vmul.f32 %v1788_v25, %v1459_v16  ;;  %v1796_v44 = vpop.eup %1795  ;;  %v1496_v12 = vand.u32 2147483647, %v2463_v40  ;;  %v1498_v33 = vand.u32 2147483648, %v2463_v40 }
 0x2c1   : > { %1801 = vrcp.f32 %v2466_v42  ;;  %v1475_v52 = vmul.f32 %v1790_v27, %v1474_v46  ;;  %v1798_v54 = vpop.eup %1797  ;;  %v2475_v15 = vadd.f32 1.0, %v1796_v44  ;;  %v1615_v51 = vmul.f32 %v1607_v50, %v2192_v1 }
 0x2c2   : > { %v1461_v55 = vadd.f32 %v1788_v25, %v1460_v48  ;;  %v2478_v56 = vadd.f32 1.0, %v1798_v54  ;;  %v1616_v35 = vmul.f32 %v1608_v39, %v2202_v5  ;;  %vm1492_vm9 = vweird.f32 %v2463_v40 }
 0x2c3   : > { %v1476_v59 = vadd.f32 %v1790_v27, %v1475_v52  ;;  %1803 = vrcp.f32 %v2475_v15  ;;  %1623 = vst [vmem:[%s2487_s11] sm:$0xff] %v1615_v51  ;;  %v1595_v17 = vpop.permute.xlu0 %1594  ;;  %v1511_v7 = vand.u32 2147483647, %v2466_v42  ;;  %vm1507_vm10 = vweird.f32 %v2466_v42 }
 0x2c4   : > { %v1465_v61 = vsel %vm1464_vm6, %v1788_v25, %v1461_v55  ;;  %1805 = vrcp.f32 %v2478_v56  ;;  %1624 = vst [vmem:[%s2487_s11 + $0x8] sm:$0xff] %v1616_v35  ;;  %v1513_v5 = vand.u32 2147483648, %v2466_v42  ;;  %vm2509_vm11 = vcmp.eq.f32.partialorder %v1496_v12, 8.507059e+37 }
 0x2c5   : > { %v1470_v58 = vsel %vm2471_vm3, %v1469_v28, %v1465_v61  ;;  %v1480_v4 = vsel %vm1479_vm8, %v1790_v27, %v1476_v59  ;;  %v1499_v14 = vor.u32 1.1754944e-38, %v1498_v33  ;;  %vm2516_vm14 = vcmp.eq.f32.partialorder %v1511_v7, 8.507059e+37 }
 0x2c6   : > { %v1800_v63 = vpop.eup %1799  ;;  %v1485_v49 = vsel %vm1482_vm7, %v1484_v0, %v1480_v4  ;;  %v1581_v8 = vmul.f32 %v2452_v20, %v1470_v58  ;;  %v1514_v10 = vor.u32 1.1754944e-38, %v1513_v5  ;;  %v1526_v38 = vand.u32 2147483647, %v2475_v15  ;;  %v1605_v12 = vpop.permute.xlu1 %1604 }
 0x2c7   : > { %v1802_v19 = vpop.eup %1801  ;;  %v1582_v1 = vmul.f32 %v2452_v20, %v1485_v49  ;;  %v1488_v32 = vmul.f32 %v1800_v63, %v2463_v40  ;;  %vm1493_vm12 = vweird.f32 %v1800_v63  ;;  %v1528_v16 = vand.u32 2147483648, %v2475_v15 }
 0x2c8   : > { %v1503_v6 = vmul.f32 %v1802_v19, %v2466_v42  ;;  %v1609_v9 = vadd.f32 %v1595_v17, %v1581_v8  ;;  %vm1508_vm13 = vweird.f32 %v1802_v19  ;;  %vm1494_vm15 = vmor %vm1492_vm9, %vm1493_vm12  ;;  %v1541_v13 = vand.u32 2147483647, %v2478_v56  ;;  %v1600_v42 = vpop.permute.xlu2 %1599 }
 0x2c9   : > { %v1489_v11 = vsub.f32 1.0, %v1488_v32  ;;  %v1610_v20 = vadd.f32 %v1595_v17, %v1582_v1  ;;  %v1804_v3 = vpop.eup %1803  ;;  %vm1509_vm0 = vmor %vm1507_vm10, %vm1508_vm13  ;;  %v1543_v47 = vand.u32 2147483648, %v2478_v56  ;;  %vm1522_vm3 = vweird.f32 %v2475_v15 }
 0x2ca   : > { %v1504_v25 = vsub.f32 1.0, %v1503_v6  ;;  %v1617_v26 = vmul.f32 %v1609_v9, %v2221_v22  ;;  %v1806_v27 = vpop.eup %1805  ;;  %v1518_v23 = vmul.f32 %v1804_v3, %v2475_v15  ;;  %vm1523_vm1 = vweird.f32 %v1804_v3 }
 0x2cb   : > { %v1490_v30 = vmul.f32 %v1800_v63, %v1489_v11  ;;  %v1618_v31 = vmul.f32 %v1610_v20, %v2228_v29  ;;  %v1533_v24 = vmul.f32 %v1806_v27, %v2478_v56  ;;  %vm1538_vm2 = vweird.f32 %v1806_v27  ;;  %vm1524_vm4 = vmor %vm1522_vm3, %vm1523_vm1 }
 0x2cc   : > { %v1505_v36 = vmul.f32 %v1802_v19, %v1504_v25  ;;  %1625 = vst [vmem:[%s2487_s11 + $0x10] sm:$0xff] %v1617_v26  ;;  %v1519_v22 = vsub.f32 1.0, %v1518_v23  ;;  %v1529_v55 = vor.u32 1.1754944e-38, %v1528_v16  ;;  %vm1537_vm5 = vweird.f32 %v2478_v56 }
 0x2cd   : > { %v1491_v2 = vadd.f32 %v1800_v63, %v1490_v30  ;;  %1626 = vst [vmem:[%s2487_s11 + $0x18] sm:$0xff] %v1618_v31  ;;  %v1534_v53 = vsub.f32 1.0, %v1533_v24  ;;  %vm1527_vm6 = vcmp.eq.f32.partialorder %v1526_v38, 8.507059e+37  ;;  %vm1539_vm7 = vmor %vm1537_vm5, %vm1538_vm2  ;;  %v1544_v61 = vor.u32 1.1754944e-38, %v1543_v47 }
 0x2ce   : > { %v1506_v29 = vadd.f32 %v1802_v19, %v1505_v36  ;;  %v1520_v46 = vmul.f32 %v1804_v3, %v1519_v22  ;;  %vm1542_vm8 = vcmp.eq.f32.partialorder %v1541_v13, 8.507059e+37 }
 0x2cf   : > { %v1495_v41 = vsel %vm1494_vm15, %v1800_v63, %v1491_v2  ;;  %v1535_v50 = vmul.f32 %v1806_v27, %v1534_v53 }
 0x2d0   : > { %v1500_v48 = vsel %vm2509_vm11, %v1499_v14, %v1495_v41  ;;  %v1510_v40 = vsel %vm1509_vm0, %v1802_v19, %v1506_v29  ;;  %v1521_v52 = vadd.f32 %v1804_v3, %v1520_v46 }
 0x2d1   : > { %v1515_v44 = vsel %vm2516_vm14, %v1514_v10, %v1510_v40  ;;  %v1583_v21 = vmul.f32 %v2461_v57, %v1500_v48  ;;  %v1536_v39 = vadd.f32 %v1806_v27, %v1535_v50 }
 0x2d2   : > { %v1584_v54 = vmul.f32 %v2461_v57, %v1515_v44  ;;  %v1525_v59 = vsel %vm1524_vm4, %v1804_v3, %v1521_v52 }
 0x2d3   : > { %v1611_v28 = vadd.f32 %v1600_v42, %v1583_v21  ;;  %v1530_v51 = vsel %vm1527_vm6, %v1529_v55, %v1525_v59  ;;  %v1540_v15 = vsel %vm1539_vm7, %v1806_v27, %v1536_v39 }
 0x2d4   : > { %v1612_v0 = vadd.f32 %v1600_v42, %v1584_v54  ;;  %v1545_v58 = vsel %vm1542_vm8, %v1544_v61, %v1540_v15  ;;  %v1585_v4 = vmul.f32 %v2501_v18, %v1530_v51 }
 0x2d5   : > { %v1619_v57 = vmul.f32 %v1611_v28, %v2239_v34  ;;  %v1586_v63 = vmul.f32 %v2501_v18, %v1545_v58 }
 0x2d6   : > { %v1620_v56 = vmul.f32 %v1612_v0, %v2243_v45  ;;  %v1613_v49 = vadd.f32 %v1605_v12, %v1585_v4 }
 0x2d7   : > { %1627 = vst [vmem:[%s2487_s11 + $0x20] sm:$0xff] %v1619_v57  ;;  %v1614_v8 = vadd.f32 %v1605_v12, %v1586_v63 }
 0x2d8   : > { %1628 = vst [vmem:[%s2487_s11 + $0x28] sm:$0xff] %v1620_v56  ;;  %v1621_v33 = vmul.f32 %v1613_v49, %v2252_v60 }
 0x2d9   : > { %v1622_v35 = vmul.f32 %v1614_v8, %v2255_v62 }
 0x2da   : > { %1629 = vst [vmem:[%s2487_s11 + $0x30] sm:$0xff] %v1621_v33 }
 0x2db   : > { %1630 = vst [vmem:[%s2487_s11 + $0x38] sm:$0xff] %v1622_v35 }
 0x2dc PF: > { %s18_s27 = sadd.s32 1, %s1813_s27  }
 0x2dd   : > { %p15_p4 = scmp.ge.s32.totalorder %s18_s27, 4  }
 0x2df   :  { %17 = sbr.rel (!%p15_p4) target bundleno = 1 (0x1), region = 82 }

// kernel: c2f_attention_forward.5
= control target key start
LH: loop header
LB: loop body
LE: loop exit
PB: predicated region body
PF: predicated region fallthrough
CT: control target
= control target key end

     0   :  { %s1560_s12 = smov 0   ;;  %s2275_s0 = inlined_call_operand.vmem [shape: f32[2,144,256], index: 0, kind: input, shape index: {}]   ;;  %s2276_s1 = inlined_call_operand.vmem [shape: f32[16,144], index: 1, kind: input, shape index: {}]   ;;  %s2277_s2 = inlined_call_operand.vmem [shape: f32[16,1], index: 2, kind: input, shape index: {}]   ;;  %s2278_s3 = inlined_call_operand.vmem [shape: f32[2,16,256], index: 3, kind: output, shape index: {}]  }
   0x1 LB: > { %s1493_s13 = sadd.s32 4294967295, %s1537_s12   ;;  %p1497_p0 = scmp.ge.s32.totalorder %s1537_s12, 1  ;;  %s1537_s12 = sphi %s1560_s12, %s13_s12  }
   0x2   : > { %p137_p1 = scmp.lt.s32.totalorder %s1537_s12, 3 }
   0x4   : > { %p138_p2 = pnand %p1497_p0, %p137_p1 }
   0x6   : > { %141 = sbr.rel (%p138_p2) target bundleno = 343 (0x157), region = 32 }
   0xb   : > { %p161_p3 = scmp.lt.s32.totalorder %s1493_s13, 1  ;;  %v207_v61 = vld [vmem:[%s2276_s1] sm:$0xff]  ;;  %vm223_vm0 = vcmask 130048  }
   0xd   : > { %s2321_s13 = smov (!%p161_p3, %s1493_s13), 1 }
   0xe   : > { %s1504_s14 = smul.u32 288, %s2321_s13  ;;  %s1503_s30 = sshll.u32 %s2321_s13, 5 }
   0xf   : > { %s2264_s6 = scalar_lea.vmem %s2278_s3, %s1503_s30 }
  0x10   : > { %s1574_s17 = scalar_lea.vmem %s2275_s0, %s1504_s14 }
  0x11   : > { %v201_v0 = vld [vmem:[%s1574_s17 + $0xf0] sm:$0xff]  ;;  %v199_v1 = vld [vmem:[%s1574_s17 + $0xe0] sm:$0xff] }
  0x12   : > { %v197_v2 = vld [vmem:[%s1574_s17 + $0xd0] sm:$0xff]  ;;  %v1579_v3 = vand.u32 4294901760, %v201_v0  ;;  %v1581_v4 = vand.u32 4294901760, %v199_v1  ;;  %v195_v6 = vld [vmem:[%s1574_s17 + $0xc0] sm:$0xff] }
  0x13   : > { %v1583_v5 = vand.u32 4294901760, %v197_v2  ;;  %v193_v7 = vld [vmem:[%s1574_s17 + $0xb0] sm:$0xff]  ;;  %v191_v8 = vld [vmem:[%s1574_s17 + $0xa0] sm:$0xff]  ;;  %v1588_v9 = vand.u32 4294901760, %v195_v6 }
  0x14   : > { %v1590_v10 = vand.u32 4294901760, %v193_v7  ;;  %v1592_v11 = vand.u32 4294901760, %v191_v8  ;;  %v189_v12 = vld [vmem:[%s1574_s17 + $0x90] sm:$0xff]  ;;  %v187_v13 = vld [vmem:[%s1574_s17 + $0x80] sm:$0xff]  ;;  %231 = vmatpush.msra.mxu0 %v1579_v3  ;;  %v1598_v14 = vsub.f32 %v201_v0, %v1579_v3  ;;  %v1601_v15 = vsub.f32 %v199_v1, %v1581_v4  ;;  %444 = vmatpush.msra.mxu3 %v1579_v3 }
  0x15   : > { %v1605_v16 = vsub.f32 %v197_v2, %v1583_v5  ;;  %v1607_v17 = vand.u32 4294901760, %v189_v12  ;;  %v185_v18 = vld [vmem:[%s1574_s17 + $0x70] sm:$0xff]  ;;  %v1611_v19 = vsub.f32 %v195_v6, %v1588_v9  ;;  %v1616_v21 = vand.u32 4294901760, %v187_v13  ;;  %v183_v26 = vld [vmem:[%s1574_s17 + $0x60] sm:$0xff] }
  0x16   : > { %v1614_v20 = vsub.f32 %v193_v7, %v1590_v10  ;;  %233 = vmatpush.msra.mxu0 %v1581_v4  ;;  %386 = vmatpush.msra.mxu2 %v1598_v14  ;;  %v281_v22 = vand.u32 4294901760, %v1598_v14  ;;  %v287_v23 = vand.u32 4294901760, %v1601_v15  ;;  %v1624_v25 = vsub.f32 %v191_v8, %v1592_v11  ;;  %v181_v36 = vld [vmem:[%s1574_s17 + $0x50] sm:$0xff]  ;;  %v179_v42 = vld [vmem:[%s1574_s17 + $0x40] sm:$0xff] }
  0x17   : > { %v293_v24 = vand.u32 4294901760, %v1605_v16  ;;  %446 = vmatpush.msra.mxu3 %v1581_v4  ;;  %v299_v27 = vand.u32 4294901760, %v1611_v19  ;;  %v1630_v28 = vsub.f32 %v189_v12, %v1607_v17  ;;  %v1632_v29 = vand.u32 4294901760, %v185_v18  ;;  %v177_v48 = vld [vmem:[%s1574_s17 + $0x30] sm:$0xff]  ;;  %v175_v54 = vld [vmem:[%s1574_s17 + $0x20] sm:$0xff] }
  0x18   : > { %235 = vmatpush.msra.mxu0 %v1583_v5  ;;  %389 = vmatpush.msra.mxu2 %v1601_v15  ;;  %v282_v30 = vsub.f32 %v1598_v14, %v281_v22  ;;  %v288_v31 = vsub.f32 %v1601_v15, %v287_v23  ;;  %v305_v33 = vand.u32 4294901760, %v1614_v20  ;;  %v1648_v34 = vsub.f32 %v187_v13, %v1616_v21  ;;  %v173_v59 = vld [vmem:[%s1574_s17 + $0x10] sm:$0xff]  ;;  %v171_v2 = vld [vmem:[%s1574_s17] sm:$0xff]  ;;  %v198_v15 = vld [vmem:[%s1574_s17 + $0xd8] sm:$0xff] }
  0x19   : > { %v294_v32 = vsub.f32 %v1605_v16, %v293_v24  ;;  %448 = vmatpush.msra.mxu3 %v1583_v5  ;;  %v1650_v35 = vand.u32 4294901760, %v183_v26  ;;  %v300_v39 = vsub.f32 %v1611_v19, %v299_v27  ;;  %v311_v40 = vand.u32 4294901760, %v1624_v25  ;;  %v205_v8 = vld [vmem:[%s1574_s17 + $0x110] sm:$0xff] }
  0x1a   : > { %237 = vmatpush.msra.mxu0 %v1588_v9  ;;  %392 = vmatpush.msra.mxu2 %v1605_v16  ;;  %v283_v37 = vand.u32 4294901760, %v282_v30  ;;  %v289_v38 = vand.u32 4294901760, %v288_v31  ;;  %v317_v41 = vand.u32 4294901760, %v1630_v28  ;;  %v306_v44 = vsub.f32 %v1614_v20, %v305_v33 }
  0x1b   : > { %450 = vmatpush.msra.mxu3 %v1588_v9  ;;  %v295_v43 = vand.u32 4294901760, %v294_v32  ;;  %v1667_v45 = vsub.f32 %v185_v18, %v1632_v29  ;;  %v1669_v46 = vand.u32 4294901760, %v181_v36  ;;  %v1674_v47 = vsub.f32 %v183_v26, %v1650_v35 }
  0x1c   : > { %239 = vmatpush.msra.mxu0 %v1590_v10  ;;  %284 = vmatpush.msra.mxu1 %v283_v37  ;;  %v301_v49 = vand.u32 4294901760, %v300_v39  ;;  %v312_v50 = vsub.f32 %v1624_v25, %v311_v40  ;;  %v1681_v51 = vand.u32 4294901760, %v179_v42  ;;  %v323_v52 = vand.u32 4294901760, %v1648_v34 }
  0x1d   : > { %395 = vmatpush.msra.mxu2 %v1611_v19  ;;  %452 = vmatpush.msra.mxu3 %v1590_v10  ;;  %v318_v53 = vsub.f32 %v1630_v28, %v317_v41  ;;  %v307_v55 = vand.u32 4294901760, %v306_v44  ;;  %v1692_v56 = vsub.f32 %v181_v36, %v1669_v46  ;;  %v1694_v57 = vand.u32 4294901760, %v177_v48 }
  0x1e   : > { %241 = vmatpush.msra.mxu0 %v1592_v11  ;;  %290 = vmatpush.msra.mxu1 %v289_v38  ;;  %v2287_v58 = vand.u32 4294901760, %v1667_v45  ;;  %v2284_v60 = vand.u32 4294901760, %v1674_v47  ;;  %v313_v62 = vand.u32 4294901760, %v312_v50  ;;  %v324_v63 = vsub.f32 %v1648_v34, %v323_v52 }
  0x1f   : > { %398 = vmatpush.msra.mxu2 %v1614_v20  ;;  %454 = vmatpush.msra.mxu3 %v1592_v11  ;;  %v1709_v0 = vsub.f32 %v179_v42, %v1681_v51  ;;  %v1711_v1 = vand.u32 4294901760, %v175_v54  ;;  %v319_v6 = vand.u32 4294901760, %v318_v53  ;;  %v1716_v7 = vand.u32 4294901760, %v173_v59  ;;  %v203_v42 = vld [vmem:[%s1574_s17 + $0x100] sm:$0xff] }
  0x20   : > { %243 = vmatpush.msra.mxu0 %v1607_v17  ;;  %296 = vmatpush.msra.mxu1 %v295_v43  ;;  %v330_v12 = vsub.f32 %v1667_v45, %v2287_v58  ;;  %v1724_v13 = vsub.f32 %v177_v48, %v1694_v57  ;;  %v2281_v18 = vand.u32 4294901760, %v1692_v56  ;;  %v1727_v26 = vand.u32 4294901760, %v207_v61  ;;  %v200_v58 = vld [vmem:[%s1574_s17 + $0xe8] sm:$0xff] }
  0x21   : > { %401 = vmatpush.msra.mxu2 %v1624_v25  ;;  %456 = vmatpush.msra.mxu3 %v1607_v17  ;;  %v336_v30 = vsub.f32 %v1674_v47, %v2284_v60  ;;  %v1734_v31 = vand.u32 4294901760, %v171_v2  ;;  %v325_v32 = vand.u32 4294901760, %v324_v63  ;;  %v1738_v36 = vsub.f32 %v175_v54, %v1711_v1 }
  0x22   : > { %245 = vmatpush.msra.mxu0 %v1616_v21  ;;  %302 = vmatpush.msra.mxu1 %v301_v49  ;;  %v2280_v37 = vand.u32 4294901760, %v1709_v0  ;;  %v1741_v38 = vand.u32 4294901760, %v205_v8  ;;  %v1746_v39 = vsub.f32 %v173_v59, %v1716_v7  ;;  %v331_v43 = vand.u32 4294901760, %v330_v12  ;;  %v209_v59 = vld [vmem:[%s2276_s1 + $0x10] sm:$0xff] }
  0x23   : > { %404 = vmatpush.msra.mxu2 %v1630_v28  ;;  %458 = vmatpush.msra.mxu3 %v1616_v21  ;;  %v342_v44 = vsub.f32 %v1692_v56, %v2281_v18  ;;  %v2279_v48 = vand.u32 4294901760, %v1724_v13  ;;  %v1755_v49 = vsub.f32 %v207_v61, %v1727_v26  ;;  %v337_v50 = vand.u32 4294901760, %v336_v30 }
  0x24   : > { %247 = vmatpush.msra.mxu0 %v1632_v29  ;;  %308 = vmatpush.msra.mxu1 %v307_v55  ;;  %v1760_v53 = vsub.f32 %v171_v2, %v1734_v31  ;;  %v348_v54 = vsub.f32 %v1709_v0, %v2280_v37  ;;  %v2282_v55 = vand.u32 4294901760, %v1738_v36  ;;  %v1770_v61 = vand.u32 4294901760, %v203_v42 }
  0x25   : > { %407 = vmatpush.msra.mxu2 %v1648_v34  ;;  %460 = vmatpush.msra.mxu3 %v1632_v29  ;;  %v2283_v63 = vand.u32 4294901760, %v1746_v39  ;;  %v343_v2 = vand.u32 4294901760, %v342_v44  ;;  %v1783_v12 = vand.u32 4294901760, %v1755_v49  ;;  %v188_v34 = vld [vmem:[%s1574_s17 + $0x88] sm:$0xff] }
  0x26   : > { %249 = vmatpush.msra.mxu0 %v1650_v35  ;;  %314 = vmatpush.msra.mxu1 %v313_v62  ;;  %v1773_v62 = vsub.f32 %v205_v8, %v1741_v38  ;;  %v208_v8 = vld [vmem:[%s2276_s1 + $0x8] sm:$0xff]  ;;  %v2286_v30 = vand.u32 4294901760, %v1760_v53  ;;  %v360_v44 = vsub.f32 %v1738_v36, %v2282_v55  ;;  %v1799_v37 = vsub.f32 %v203_v42, %v1770_v61 }
  0x27   : > { %410 = vmatpush.msra.mxu2 %v1667_v45  ;;  %462 = vmatpush.msra.mxu3 %v1650_v35  ;;  %v225_v18 = vsel %vm223_vm0, %v208_v8, 0  ;;  %v265_v55 = vsub.f32 %v1755_v49, %v1783_v12 }
  0x28   : > { %251 = vmatpush.msra.mxu0 %v1669_v46  ;;  %320 = vmatpush.msra.mxu1 %v319_v6  ;;  %v354_v6 = vsub.f32 %v1724_v13, %v2279_v48  ;;  %v2285_v48 = vand.u32 4294901760, %v1773_v62  ;;  %v372_v42 = vsub.f32 %v1760_v53, %v2286_v30  ;;  %v1823_v60 = vand.u32 4294901760, %v225_v18 }
  0x29   : > { %413 = vmatpush.msra.mxu2 %v1674_v47  ;;  %464 = vmatpush.msra.mxu3 %v1669_v46 }
  0x2a   : > { %253 = vmatpush.msra.mxu0 %v1681_v51  ;;  %326 = vmatpush.msra.mxu1 %v325_v32  ;;  %v1791_v32 = vand.u32 4294901760, %v209_v59 }
  0x2b   : > { %416 = vmatpush.msra.mxu2 %v1692_v56  ;;  %466 = vmatpush.msra.mxu3 %v1681_v51 }
  0x2c   : > { %255 = vmatpush.msra.mxu0 %v1694_v57  ;;  %332 = vmatpush.msra.mxu1 %v331_v43  ;;  %v349_v43 = vand.u32 4294901760, %v348_v54  ;;  %v366_v54 = vsub.f32 %v1746_v39, %v2283_v63  ;;  %v1816_v8 = vsub.f32 %v209_v59, %v1791_v32  ;;  %v2292_v63 = vand.u32 4294901760, %v1799_v37  ;;  %v202_v59 = vld [vmem:[%s1574_s17 + $0xf8] sm:$0xff] }
  0x2d   : > { %419 = vmatpush.msra.mxu2 %v1709_v0  ;;  %468 = vmatpush.msra.mxu3 %v1694_v57 }
  0x2e   : > { %257 = vmatpush.msra.mxu0 %v1711_v1  ;;  %338 = vmatpush.msra.mxu1 %v337_v50  ;;  %v355_v50 = vand.u32 4294901760, %v354_v6  ;;  %v654_v6 = vsub.f32 %v1773_v62, %v2285_v48  ;;  %v373_v48 = vand.u32 4294901760, %v372_v42  ;;  %v1836_v30 = vand.u32 4294901760, %v1816_v8 }
  0x2f   : > { %422 = vmatpush.msra.mxu2 %v1724_v13  ;;  %470 = vmatpush.msra.mxu3 %v1711_v1 }
  0x30   : > { %259 = vmatpush.msra.mxu0 %v1716_v7  ;;  %344 = vmatpush.msra.mxu1 %v343_v2  ;;  %v361_v2 = vand.u32 4294901760, %v360_v44  ;;  %v1830_v44 = vand.u32 4294901760, %v265_v55  ;;  %v655_v14 = vand.u32 4294901760, %v654_v6  ;;  %v1844_v55 = vsub.f32 %v225_v18, %v1823_v60  ;;  %v210_v6 = vld [vmem:[%s2276_s1 + $0x18] sm:$0xff] }
  0x31   : > { %425 = vmatpush.msra.mxu2 %v1738_v36  ;;  %472 = vmatpush.msra.mxu3 %v1716_v7  ;;  %v273_v18 = vsub.f32 %v1816_v8, %v1836_v30  ;;  %v228_v25 = vsel %vm223_vm0, %v210_v6, 0 }
  0x32   : > { %261 = vmatpush.msra.mxu0 %v1734_v31  ;;  %350 = vmatpush.msra.mxu1 %v349_v43  ;;  %v367_v43 = vand.u32 4294901760, %v366_v54  ;;  %v196_v54 = vld [vmem:[%s1574_s17 + $0xc8] sm:$0xff] }
  0x33   : > { %428 = vmatpush.msra.mxu2 %v1746_v39  ;;  %474 = vmatpush.msra.mxu3 %v1734_v31 }
  0x34   : > { %491 = vmatpush.msrb.mxu0 %v281_v22  ;;  %356 = vmatpush.msra.mxu1 %v355_v50  ;;  %v660_v22 = vsub.f32 %v1799_v37, %v2292_v63  ;;  %v1846_v50 = vand.u32 4294901760, %v202_v59 }
  0x35   : > { %431 = vmatpush.msra.mxu2 %v1760_v53  ;;  %478 = vmatmul.f32.vlgmr.msra.gmra.mxu3 %v1783_v12 }
  0x36   : > { %495 = vmatpush.msrb.mxu0 %v287_v23  ;;  %434 = vmatmul.f32.vlgmr.msra.gmra.mxu2 %v1755_v49  ;;  %v1853_v23 = vand.u32 4294901760, %v200_v58  ;;  %v661_v16 = vand.u32 4294901760, %v660_v22  ;;  %v1865_v42 = vsub.f32 %v202_v59, %v1846_v50  ;;  %v192_v59 = vld [vmem:[%s1574_s17 + $0xa8] sm:$0xff] }
  0x37   : > { %362 = vmatpush.msra.mxu1 %v361_v2  ;;  %267 = vmatmul.f32.vlgmr.msra.gmra.mxu0 %v1830_v44  ;;  %v1867_v2 = vand.u32 4294901760, %v198_v15  ;;  %v1911_v28 = vand.u32 4294901760, %v192_v59 }
  0x38   : > { %499 = vmatpush.msrb.mxu0 %v293_v24  ;;  %617 = vmatpush.msrb.mxu2 %v1741_v38  ;;  %v1862_v24 = vand.u32 4294901760, %v1844_v55  ;;  %v1875_v19 = vsub.f32 %v200_v58, %v1853_v23 }
  0x39   : > { %368 = vmatpush.msra.mxu1 %v367_v43  ;;  %656 = vmatpush.msrb.mxu3 %v655_v14  ;;  %v1893_v58 = vsub.f32 %v198_v15, %v1867_v2  ;;  %v1922_v15 = vand.u32 4294901760, %v228_v25 }
  0x3a   : > { %503 = vmatpush.msrb.mxu0 %v299_v27  ;;  %619 = vmatpush.msrb.mxu2 %v1770_v61  ;;  %v1877_v27 = vand.u32 4294901760, %v196_v54  ;;  %v623_v20 = vsub.f32 %v1844_v55, %v1862_v24 }
  0x3b   : > { %374 = vmatpush.msra.mxu1 %v373_v48  ;;  %v194_v48 = vld [vmem:[%s1574_s17 + $0xb8] sm:$0xff]  ;;  %662 = vmatpush.msrb.mxu3 %v661_v16  ;;  %v2290_v22 = vand.u32 4294901760, %v1893_v58 }
  0x3c   : > { %507 = vmatpush.msrb.mxu0 %v305_v33  ;;  %376 = vmatmul.f32.vlgmr.msra.gmra.mxu1 %v1727_v26  ;;  %v2289_v33 = vand.u32 4294901760, %v1865_v42  ;;  %v1906_v43 = vsub.f32 %v196_v54, %v1877_v27 }
  0x3d   : > { %562 = vmatpush.msrb.mxu1 %v1579_v3  ;;  %v1887_v3 = vand.u32 4294901760, %v273_v18  ;;  %484 = vmatmul.f32.gmra.mxu3 %v1836_v30  ;;  %v1539_v18 = vmov 0  }
  0x3e   : > { %511 = vmatpush.msrb.mxu0 %v311_v40  ;;  %439 = vmatmul.f32.gmra.mxu2 %v1816_v8  ;;  %v2288_v40 = vand.u32 4294901760, %v1875_v19  ;;  %v844_v14 = vsub.f32 %v1865_v42, %v2289_v33  ;;  %v2291_v16 = vand.u32 4294901760, %v1906_v43 }
  0x3f   : > { %564 = vmatpush.msrb.mxu1 %v1581_v4  ;;  %v1899_v4 = vand.u32 4294901760, %v194_v48  ;;  %688 = vmatpush.msra.mxu2 %v1773_v62 }
  0x40   : > { %515 = vmatpush.msrb.mxu0 %v317_v41  ;;  %718 = vmatpush.msra.mxu3 %v1741_v38  ;;  %v190_v41 = vld [vmem:[%s1574_s17 + $0x98] sm:$0xff]  ;;  %v850_v54 = vsub.f32 %v1875_v19, %v2288_v40  ;;  %v184_v40 = vld [vmem:[%s1574_s17 + $0x68] sm:$0xff] }
  0x41   : > { %566 = vmatpush.msrb.mxu1 %v1583_v5  ;;  %275 = vmatmul.f32.gmra.mxu0 %v1887_v3  ;;  %v1916_v5 = vand.u32 4294901760, %v623_v20  ;;  %v1936_v6 = vand.u32 4294901760, %v190_v41  ;;  %v1947_v20 = vand.u32 4294901760, %v188_v34 }
  0x42   : > { %519 = vmatpush.msrb.mxu0 %v323_v52  ;;  %v2299_v52 = vand.u32 4294901760, %v1667_v45  ;;  %691 = vmatpush.msra.mxu2 %v1799_v37  ;;  %v2300_v45 = vand.u32 4294901760, %v1674_v47  ;;  %v856_v47 = vsub.f32 %v1893_v58, %v2290_v22  ;;  %v851_v33 = vand.u32 4294901760, %v850_v54 }
  0x43   : > { %568 = vmatpush.msrb.mxu1 %v1588_v9  ;;  %2298 = vst [vmem:[#allocation2_spill] sm:$0xff] %v1916_v5  ;;  %v1929_v9 = vsub.f32 %v194_v48, %v1899_v4  ;;  %1514 = vset.pattern.permute.xlu0 %v1539_v18  ;;  %v1945_v48 = vsub.f32 %v192_v59, %v1911_v28  ;;  %v845_v18 = vand.u32 4294901760, %v844_v14 }
  0x44   : > { %523 = vmatpush.msrb.mxu0 %v2299_v52  ;;  %380 = vmatmul.f32.gmra.mxu1 %v1791_v32  ;;  %v186_v52 = vld [vmem:[%s1574_s17 + $0x78] sm:$0xff]  ;;  %v862_v14 = vsub.f32 %v1906_v43, %v2291_v16  ;;  %v857_v54 = vand.u32 4294901760, %v856_v47  ;;  %v2302_v16 = vand.u32 4294901760, %v1709_v0  ;;  %v2303_v0 = vand.u32 4294901760, %v1724_v13 }
  0x45   : > { %570 = vmatpush.msrb.mxu1 %v1590_v10  ;;  %v211_v10 = vld [vmem:[%s2277_s2] sm:$0xff]  ;;  %720 = vmatpush.msra.mxu3 %v1770_v61  ;;  %v2293_v59 = vand.u32 4294901760, %v1929_v9  ;;  %v1970_v22 = vand.u32 4294901760, %v186_v52 }
  0x46   : > { %527 = vmatpush.msrb.mxu0 %v2300_v45  ;;  %625 = vmatmul.f32.vlgmr.msrb.gmra.mxu2 %v1916_v5  ;;  %v1956_v45 = vsub.f32 %v228_v25, %v1922_v15  ;;  %v1968_v25 = vsub.f32 %v190_v41, %v1936_v6  ;;  %v1982_v41 = vand.u32 4294901760, %v184_v40 }
  0x47   : > { %572 = vmatpush.msrb.mxu1 %v1592_v11  ;;  %793 = vmatpush.msrb.mxu2 %v1846_v50  ;;  %v2301_v11 = vand.u32 4294901760, %v1692_v56  ;;  %v1976_v56 = vsub.f32 %v188_v34, %v1947_v20  ;;  %v182_v34 = vld [vmem:[%s1574_s17 + $0x58] sm:$0xff]  ;;  %v1994_v63 = vsub.f32 %v186_v52, %v1970_v22 }
  0x48   : > { %215 = vperm.xlu0 %1514, %v211_v10   ;;  %664 = vmatmul.f32.vlgmr.msrb.gmra.mxu3 %v1823_v60  ;;  %v2294_v10 = vand.u32 4294901760, %v1945_v48  ;;  %v2296_v47 = vand.u32 4294901760, %v1968_v25  ;;  %v2010_v52 = vand.u32 4294901760, %v182_v34 }
  0x49   : > { %531 = vmatpush.msrb.mxu0 %v2301_v11  ;;  %574 = vmatpush.msrb.mxu1 %v1607_v17  ;;  %v1980_v11 = vand.u32 4294901760, %v1956_v45  ;;  %v868_v17 = vsub.f32 %v1929_v9, %v2293_v59  ;;  %v180_v59 = vld [vmem:[%s1574_s17 + $0x48] sm:$0xff] }
  0x4a   : > { %795 = vmatpush.msrb.mxu2 %v1853_v23  ;;  %846 = vmatpush.msrb.mxu3 %v845_v18  ;;  %v863_v18 = vand.u32 4294901760, %v862_v14  ;;  %v2304_v14 = vand.u32 4294901760, %v1738_v36  ;;  %v2024_v5 = vand.u32 4294901760, %v180_v59 }
  0x4b   : > { %535 = vmatpush.msrb.mxu0 %v2302_v16  ;;  %576 = vmatpush.msrb.mxu1 %v1616_v21  ;;  %v874_v21 = vsub.f32 %v1945_v48, %v2294_v10  ;;  %v631_v13 = vsub.f32 %v1956_v45, %v1980_v11  ;;  %v880_v10 = vsub.f32 %v1968_v25, %v2296_v47  ;;  %v891_v16 = vand.u32 4294901760, %v1994_v63 }
  0x4c   : > { %797 = vmatpush.msrb.mxu2 %v1867_v2  ;;  %852 = vmatpush.msrb.mxu3 %v851_v33  ;;  %v212_v33 = vld [vmem:[%s2277_s2 + $0x8] sm:$0xff] }
  0x4d   : > { %539 = vmatpush.msrb.mxu0 %v2303_v0  ;;  %578 = vmatpush.msrb.mxu1 %v1632_v29  ;;  %v2013_v29 = vsub.f32 %v184_v40, %v1982_v41  ;;  %v869_v0 = vand.u32 4294901760, %v868_v17  ;;  %v2305_v40 = vand.u32 4294901760, %v1746_v39  ;;  %v875_v36 = vand.u32 4294901760, %v874_v21 }
  0x4e   : > { %799 = vmatpush.msrb.mxu2 %v1877_v27  ;;  %858 = vmatpush.msrb.mxu3 %v857_v54  ;;  %v178_v54 = vld [vmem:[%s1574_s17 + $0x38] sm:$0xff]  ;;  %v2307_v21 = vand.u32 4294901760, %v1760_v53 }
  0x4f   : > { %543 = vmatpush.msrb.mxu0 %v2304_v14  ;;  %580 = vmatpush.msrb.mxu1 %v1650_v35  ;;  %v2306_v35 = vand.u32 4294901760, %v1976_v56  ;;  %v176_v14 = vld [vmem:[%s1574_s17 + $0x28] sm:$0xff]  ;;  %v2297_v47 = vand.u32 4294901760, %v2013_v29  ;;  %v2040_v39 = vand.u32 4294901760, %v178_v54 }
  0x50   : > { %801 = vmatpush.msrb.mxu2 %v1899_v4  ;;  %864 = vmatpush.msrb.mxu3 %v863_v18  ;;  %v2034_v18 = vand.u32 4294901760, %v631_v13  ;;  %v892_v13 = vsub.f32 %v1994_v63, %v891_v16 }
  0x51   : > { %220 = vperm.xlu0 %1514, %v212_v33   ;;  %547 = vmatpush.msrb.mxu0 %v2305_v40  ;;  %v886_v17 = vsub.f32 %v1976_v56, %v2306_v35  ;;  %v2038_v33 = vsub.f32 %v182_v34, %v2010_v52  ;;  %v2050_v40 = vsub.f32 %v180_v59, %v2024_v5  ;;  %v2052_v34 = vand.u32 4294901760, %v176_v14  ;;  %v174_v35 = vld [vmem:[%s1574_s17 + $0x18] sm:$0xff] }
  0x52   : > { %582 = vmatpush.msrb.mxu1 %v1669_v46  ;;  %803 = vmatpush.msrb.mxu2 %v1911_v28  ;;  %v881_v46 = vand.u32 4294901760, %v880_v10  ;;  %v898_v10 = vsub.f32 %v2013_v29, %v2297_v47  ;;  %v2064_v59 = vsub.f32 %v178_v54, %v2040_v39 }
  0x53   : > { %870 = vmatpush.msrb.mxu3 %v869_v0  ;;  %551 = vmatpush.msrb.mxu0 %v2307_v21  ;;  %v887_v53 = vand.u32 4294901760, %v886_v17  ;;  %v903_v0 = vand.u32 4294901760, %v2038_v33  ;;  %v172_v21 = vld [vmem:[%s1574_s17 + $0x8] sm:$0xff]  ;;  %v893_v17 = vand.u32 4294901760, %v892_v13  ;;  %v2075_v47 = vsub.f32 %v176_v14, %v2052_v34 }
  0x54   : > { %584 = vmatpush.msrb.mxu1 %v1681_v51  ;;  %805 = vmatpush.msrb.mxu2 %v1936_v6  ;;  %v2308_v51 = vand.u32 4294901760, %v1773_v62  ;;  %v2309_v62 = vand.u32 4294901760, %v1799_v37  ;;  %v915_v37 = vand.u32 4294901760, %v2064_v59 }
  0x55   : > { %876 = vmatpush.msrb.mxu3 %v875_v36  ;;  %553 = vmatmul.f32.vlgmr.msrb.gmra.mxu0 %v1727_v26  ;;  %v2068_v36 = vand.u32 4294901760, %v174_v35  ;;  %v904_v54 = vsub.f32 %v2038_v33, %v903_v0  ;;  %v921_v13 = vand.u32 4294901760, %v2075_v47 }
  0x56   : > { %633 = vmatmul.f32.gmra.mxu2 %v2034_v18  ;;  %751 = vmatpush.msra.mxu0 %v2308_v51  ;;  %v909_v51 = vand.u32 4294901760, %v2050_v40 }
  0x57   : > { %586 = vmatpush.msrb.mxu1 %v1694_v57  ;;  %807 = vmatpush.msrb.mxu2 %v1947_v20  ;;  %v899_v57 = vand.u32 4294901760, %v898_v10  ;;  %v2089_v14 = vsub.f32 %v174_v35, %v2068_v36  ;;  %v916_v35 = vsub.f32 %v2064_v59, %v915_v37 }
  0x58   : > { %882 = vmatpush.msrb.mxu3 %v881_v46  ;;  %755 = vmatpush.msra.mxu0 %v2309_v62  ;;  %v2084_v46 = vand.u32 4294901760, %v172_v21  ;;  %v922_v62 = vsub.f32 %v2075_v47, %v921_v13 }
  0x59   : > { %668 = vmatmul.f32.gmra.mxu3 %v1922_v15  ;;  %588 = vmatpush.msrb.mxu1 %v1711_v1  ;;  %v910_v1 = vsub.f32 %v2050_v40, %v909_v51  ;;  %v927_v10 = vand.u32 4294901760, %v2089_v14 }
  0x5a   : > { %809 = vmatpush.msrb.mxu2 %v1970_v22  ;;  %888 = vmatpush.msrb.mxu3 %v887_v53  ;;  %v2103_v53 = vsub.f32 %v172_v21, %v2084_v46  ;;  %v917_v21 = vand.u32 4294901760, %v916_v35  ;;  %v2311_v35 = vand.u32 4294901760, %v1875_v19 }
  0x5b   : > { %948 = vmatpush.msrb.mxu0 %v1865_v42  ;;  %590 = vmatpush.msrb.mxu1 %v1716_v7  ;;  %v905_v7 = vand.u32 4294901760, %v904_v54 }
  0x5c   : > { %811 = vmatpush.msrb.mxu2 %v1982_v41  ;;  %894 = vmatpush.msrb.mxu3 %v893_v17  ;;  %v933_v17 = vand.u32 4294901760, %v2103_v53 }
  0x5d   : > { %951 = vmatpush.msrb.mxu0 %v1875_v19  ;;  %592 = vmatpush.msrb.mxu1 %v1734_v31  ;;  %v911_v31 = vand.u32 4294901760, %v910_v1  ;;  %v2313_v19 = vand.u32 4294901760, %v1906_v43 }
  0x5e   : > { %813 = vmatpush.msrb.mxu2 %v2010_v52  ;;  %900 = vmatpush.msrb.mxu3 %v899_v57  ;;  %v928_v57 = vsub.f32 %v2089_v14, %v927_v10  ;;  %v934_v54 = vsub.f32 %v2103_v53, %v933_v17 }
  0x5f   : > { %954 = vmatpush.msrb.mxu0 %v1893_v58  ;;  %594 = vmatmul.f32.vlgmr.msrb.gmra.mxu1 %v1727_v26 }
  0x60   : > { %557 = vmatmul.f32.gmra.mxu0 %v1791_v32  ;;  %694 = vmatmul.f32.vlgmr.msra.gmra.mxu2 %v1844_v55  ;;  %v935_v1 = vand.u32 4294901760, %v934_v54 }
  0x61   : > { %780 = vmatpush.msra.mxu1 %v1741_v38  ;;  %815 = vmatpush.msrb.mxu2 %v2024_v5  ;;  %v923_v38 = vand.u32 4294901760, %v922_v62 }
  0x62   : > { %906 = vmatpush.msrb.mxu3 %v905_v7  ;;  %957 = vmatpush.msrb.mxu0 %v1906_v43  ;;  %v2310_v7 = vand.u32 4294901760, %v1865_v42  ;;  %v206_v42 = vld [vmem:[%s1574_s17 + $0x118] sm:$0xff] }
  0x63   : > { %724 = vmatmul.f32.vlgmr.msra.gmra.mxu3 %v1862_v24  ;;  %782 = vmatpush.msra.mxu1 %v1770_v61  ;;  %v929_v61 = vand.u32 4294901760, %v928_v57 }
  0x64   : > { %817 = vmatpush.msrb.mxu2 %v2040_v39  ;;  %912 = vmatpush.msrb.mxu3 %v911_v31  ;;  %v2312_v31 = vand.u32 4294901760, %v1893_v58  ;;  %v2314_v58 = vand.u32 4294901760, %v1929_v9 }
  0x65   : > { %960 = vmatpush.msrb.mxu0 %v1929_v9  ;;  %1006 = vmatpush.msrb.mxu1 %v1846_v50 }
  0x66   : > { %819 = vmatpush.msrb.mxu2 %v2052_v34  ;;  %918 = vmatpush.msrb.mxu3 %v917_v21 }
  0x67   : > { %963 = vmatpush.msrb.mxu0 %v1945_v48  ;;  %1008 = vmatpush.msrb.mxu1 %v1853_v23 }
  0x68   : > { %821 = vmatpush.msrb.mxu2 %v2068_v36  ;;  %924 = vmatpush.msrb.mxu3 %v923_v38 }
  0x69   : > { %966 = vmatpush.msrb.mxu0 %v1968_v25  ;;  %1010 = vmatpush.msrb.mxu1 %v1867_v2 }
  0x6a   : > { %598 = vmatmul.f32.gmra.mxu1 %v1791_v32  ;;  %699 = vmatmul.f32.gmra.mxu2 %v1956_v45 }
  0x6b   : > { %823 = vmatpush.msrb.mxu2 %v2084_v46  ;;  %930 = vmatpush.msrb.mxu3 %v929_v61 }
  0x6c   : > { %969 = vmatpush.msrb.mxu0 %v1976_v56  ;;  %1012 = vmatpush.msrb.mxu1 %v1877_v27 }
  0x6d   : > { %730 = vmatmul.f32.gmra.mxu3 %v1980_v11  ;;  %757 = vmatmul.f32.vlgmr.msra.gmra.mxu0 %v1823_v60 }
  0x6e   : > { %1053 = vmatpush.msra.mxu2 %v2310_v7  ;;  %936 = vmatpush.msrb.mxu3 %v935_v1 }
  0x6f   : > { %972 = vmatpush.msrb.mxu0 %v1994_v63  ;;  %1014 = vmatpush.msrb.mxu1 %v1899_v4 }
  0x70   : > { %1057 = vmatpush.msra.mxu2 %v2311_v35  ;;  %1124 = vmatpush.msra.mxu3 %v1846_v50  ;;  %v204_v50 = vld [vmem:[%s1574_s17 + $0x108] sm:$0xff] }
  0x71   : > { %975 = vmatpush.msrb.mxu0 %v2013_v29  ;;  %1016 = vmatpush.msrb.mxu1 %v1911_v28  ;;  %v2171_v43 = vand.u32 4294901760, %v204_v50 }
  0x72   : > { %1061 = vmatpush.msra.mxu2 %v2312_v31  ;;  %1126 = vmatpush.msra.mxu3 %v1853_v23  ;;  %v2164_v23 = vand.u32 4294901760, %v206_v42 }
  0x73   : > { %978 = vmatpush.msrb.mxu0 %v2038_v33  ;;  %1018 = vmatpush.msrb.mxu1 %v1936_v6 }
  0x74   : > { %784 = vmatmul.f32.vlgmr.msra.gmra.mxu1 %v1823_v60  ;;  %1065 = vmatpush.msra.mxu2 %v2313_v19  ;;  %v1214_v9 = vsub.f32 %v206_v42, %v2164_v23 }
  0x75   : > { %1128 = vmatpush.msra.mxu3 %v1867_v2  ;;  %981 = vmatpush.msrb.mxu0 %v2050_v40  ;;  %v2315_v2 = vand.u32 4294901760, %v1945_v48  ;;  %v1220_v48 = vsub.f32 %v204_v50, %v2171_v43 }
  0x76   : > { %1020 = vmatpush.msrb.mxu1 %v1947_v20  ;;  %761 = vmatmul.f32.gmra.mxu0 %v1922_v15  ;;  %v1215_v62 = vand.u32 4294901760, %v1214_v9 }
  0x77   : > { %1069 = vmatpush.msra.mxu2 %v2314_v58  ;;  %1130 = vmatpush.msra.mxu3 %v1877_v27  ;;  %v2316_v27 = vand.u32 4294901760, %v1968_v25  ;;  %v2318_v25 = vand.u32 4294901760, %v2013_v29 }
  0x78   : > { %984 = vmatpush.msrb.mxu0 %v2064_v59  ;;  %1022 = vmatpush.msrb.mxu1 %v1970_v22 }
  0x79   : > { %1073 = vmatpush.msra.mxu2 %v2315_v2  ;;  %1132 = vmatpush.msra.mxu3 %v1899_v4  ;;  %v2317_v4 = vand.u32 4294901760, %v1976_v56 }
  0x7a   : > { %987 = vmatpush.msrb.mxu0 %v2075_v47  ;;  %1024 = vmatpush.msrb.mxu1 %v1982_v41 }
  0x7b   : > { %829 = vmatmul.f32.vlgmr.msrb.gmra.mxu2 %v1830_v44  ;;  %1134 = vmatpush.msra.mxu3 %v1911_v28  ;;  %v1221_v44 = vand.u32 4294901760, %v1220_v48  ;;  %v1216_v28 = vsub.f32 %v1214_v9, %v1215_v62 }
  0x7c   : > { %1077 = vmatpush.msra.mxu2 %v2316_v27  ;;  %990 = vmatpush.msrb.mxu0 %v2089_v14 }
  0x7d   : > { %1026 = vmatpush.msrb.mxu1 %v2010_v52  ;;  %938 = vmatmul.f32.vlgmr.msrb.gmra.mxu3 %v1727_v26  ;;  %v1217_v63 = vand.u32 4294901760, %v1216_v28 }
  0x7e   : > { %788 = vmatmul.f32.gmra.mxu1 %v1922_v15  ;;  %1081 = vmatpush.msra.mxu2 %v2317_v4 }
  0x7f   : > { %1136 = vmatpush.msra.mxu3 %v1936_v6  ;;  %993 = vmatpush.msrb.mxu0 %v2103_v53 }
  0x80   : > { %1028 = vmatpush.msrb.mxu1 %v2024_v5  ;;  %996 = vmatmul.f32.vlgmr.msrb.gmra.mxu0 %v1755_v49  ;;  %v1222_v49 = vsub.f32 %v1220_v48, %v1221_v44 }
  0x81   : > { %1085 = vmatpush.msra.mxu2 %v891_v16  ;;  %1138 = vmatpush.msra.mxu3 %v1947_v20 }
  0x82   : > { %1030 = vmatpush.msrb.mxu1 %v2040_v39  ;;  %1179 = vmatpush.msra.mxu0 %v2164_v23 }
  0x83   : > { %1089 = vmatpush.msra.mxu2 %v2318_v25  ;;  %1140 = vmatpush.msra.mxu3 %v1970_v22 }
  0x84   : > { %1032 = vmatpush.msrb.mxu1 %v2052_v34  ;;  %837 = vmatmul.f32.gmra.mxu2 %v1887_v3  ;;  %v1223_v3 = vand.u32 4294901760, %v1222_v49 }
  0x85   : > { %1093 = vmatpush.msra.mxu2 %v903_v0  ;;  %1142 = vmatpush.msra.mxu3 %v1982_v41 }
  0x86   : > { %1034 = vmatpush.msrb.mxu1 %v2068_v36  ;;  %942 = vmatmul.f32.gmra.mxu3 %v1791_v32 }
  0x87   : > { %1097 = vmatpush.msra.mxu2 %v909_v51  ;;  %1144 = vmatpush.msra.mxu3 %v2010_v52 }
  0x88   : > { %1036 = vmatpush.msrb.mxu1 %v2084_v46  ;;  %1001 = vmatmul.f32.gmra.mxu0 %v1816_v8 }
  0x89   : > { %1040 = vmatmul.f32.vlgmr.msrb.gmra.mxu1 %v1783_v12  ;;  %1101 = vmatpush.msra.mxu2 %v915_v37  ;;  %v2319_v12 = vld [vmem:[#allocation2_spill] sm:$0xff] }
  0x8a   : > { %1146 = vmatpush.msra.mxu3 %v2024_v5  ;;  %1218 = vmatpush.msra.mxu1 %v1217_v63 }
  0x8b   : > { %1105 = vmatpush.msra.mxu2 %v921_v13  ;;  %1181 = vmatpush.msra.mxu0 %v2171_v43 }
  0x8c   : > { %1148 = vmatpush.msra.mxu3 %v2040_v39  ;;  %1224 = vmatpush.msra.mxu1 %v1223_v3 }
  0x8d   : > { %1109 = vmatpush.msra.mxu2 %v927_v10  ;;  %1250 = vmatpush.msrb.mxu0 %v1214_v9 }
  0x8e   : > { %1150 = vmatpush.msra.mxu3 %v2052_v34  ;;  %1280 = vmatpush.msrb.mxu1 %v2164_v23 }
  0x8f   : > { %1113 = vmatpush.msra.mxu2 %v933_v17  ;;  %1253 = vmatpush.msrb.mxu0 %v1220_v48 }
  0x90   : > { %1152 = vmatpush.msra.mxu3 %v2068_v36  ;;  %1115 = vmatmul.f32.vlgmr.msra.gmra.mxu2 %v1727_v26 }
  0x91   : > { %1046 = vmatmul.f32.gmra.mxu1 %v1836_v30  ;;  %1187 = vmatmul.f32.vlgmr.msra.gmra.mxu0 %v2319_v12 }
  0x92   : > { %1154 = vmatpush.msra.mxu3 %v2084_v46  ;;  %1313 = vmatpush.msrb.mxu2 %v1215_v62 }
  0x93   : > { %1156 = vmatmul.f32.vlgmr.msra.gmra.mxu3 %v1727_v26  ;;  %1282 = vmatpush.msrb.mxu1 %v2171_v43 }
  0x94   : > { %1342 = vmatpush.msrb.mxu3 %v2164_v23  ;;  %1317 = vmatpush.msrb.mxu2 %v1221_v44 }
  0x96   : > { %1344 = vmatpush.msrb.mxu3 %v2171_v43 }
  0x98   : > { %1119 = vmatmul.f32.gmra.mxu2 %v1791_v32 }
  0x99   : > { %1195 = vmatmul.f32.gmra.mxu0 %v2034_v18  ;;  %1226 = vmatmul.f32.vlgmr.msra.gmra.mxu1 %v1823_v60 }
  0x9b   : > { %1160 = vmatmul.f32.gmra.mxu3 %v1791_v32 }
  0xa0   : > { %1319 = vmatmul.f32.vlgmr.msrb.gmra.mxu2 %v1823_v60 }
  0xa1   : > { %1230 = vmatmul.f32.gmra.mxu1 %v1922_v15  ;;  %1256 = vmatmul.f32.vlgmr.msrb.gmra.mxu0 %v1844_v55 }
  0xa3   : > { %1346 = vmatmul.f32.vlgmr.msrb.gmra.mxu3 %v1823_v60 }
  0xa8   : > { %1323 = vmatmul.f32.gmra.mxu2 %v1922_v15 }
  0xa9   : > { %1261 = vmatmul.f32.gmra.mxu0 %v1956_v45  ;;  %1286 = vmatmul.f32.vlgmr.msrb.gmra.mxu1 %v1862_v24 }
  0xab   : > { %1350 = vmatmul.f32.gmra.mxu3 %v1922_v15 }
  0xb1   : > { %1292 = vmatmul.f32.gmra.mxu1 %v1980_v11 }
  0xb4   : > { %v268_v32 = vpop.f32.mrf.mxu0 }
  0xb8   : > { %v479_v30 = vpop.f32.mrf.mxu3 }
  0xb9   : > { %v435_v26 = vpop.f32.mrf.mxu2  ;;  %v377_v22 = vpop.f32.mrf.mxu1 }
  0xba   : > { %v2250_v5 = vpop.permute.xlu0 %215 }
  0xbb   : > { %v269_v60 = vadd.f32 %v268_v32, %v2250_v5 }
  0xbd   : > { %v378_v20 = vadd.f32 %v377_v22, %v269_v60 }
  0xbe   : > { %v276_v6 = vpop.f32.mrf.mxu0 }
  0xbf   : > { %v436_v41 = vadd.f32 %v435_v26, %v378_v20 }
  0xc0   : > { %v485_v55 = vpop.f32.mrf.mxu3 }
  0xc1   : > { %v440_v8 = vpop.f32.mrf.mxu2  ;;  %v381_v45 = vpop.f32.mrf.mxu1  ;;  %v480_v16 = vadd.f32 %v479_v30, %v436_v41 }
  0xc3   : > { %v2253_v24 = vpop.permute.xlu0 %220 }
  0xc4   : > { %v277_v11 = vadd.f32 %v276_v6, %v2253_v24 }
  0xc6   : > { %v382_v18 = vadd.f32 %v381_v45, %v277_v11 }
  0xc8   : > { %v441_v34 = vadd.f32 %v440_v8, %v382_v18 }
  0xc9   : > { %v626_v56 = vpop.f32.mrf.mxu2 }
  0xca   : > { %v486_v36 = vadd.f32 %v485_v55, %v441_v34 }
  0xcb   : > { %v665_v15 = vpop.f32.mrf.mxu3 }
  0xd2   : > { %v554_v47 = vpop.f32.mrf.mxu0 }
  0xd3   : > { %v555_v52 = vadd.f32 %v554_v47, %v480_v16 }
  0xd9   : > { %v634_v29 = vpop.f32.mrf.mxu2 }
  0xdc   : > { %v595_v33 = vpop.f32.mrf.mxu1  ;;  %v669_v40 = vpop.f32.mrf.mxu3 }
  0xdd   : > { %v596_v39 = vadd.f32 %v595_v33, %v555_v52  ;;  %v558_v59 = vpop.f32.mrf.mxu0 }
  0xde   : > { %v559_v46 = vadd.f32 %v558_v59, %v486_v36 }
  0xdf   : > { %v627_v0 = vadd.f32 %v626_v56, %v596_v39 }
  0xe1   : > { %v666_v51 = vadd.f32 %v665_v15, %v627_v0 }
  0xe3   : > { %v695_v37 = vpop.f32.mrf.mxu2 }
  0xe4   : > { %v696_v13 = vadd.f32 %v695_v37, %v666_v51 }
  0xe6   : > { %v725_v10 = vpop.f32.mrf.mxu3 }
  0xe7   : > { %v599_v14 = vpop.f32.mrf.mxu1  ;;  %v726_v57 = vadd.f32 %v725_v10, %v696_v13 }
  0xe8   : > { %v600_v53 = vadd.f32 %v599_v14, %v559_v46 }
  0xea   : > { %v635_v21 = vadd.f32 %v634_v29, %v600_v53  ;;  %v758_v17 = vpop.f32.mrf.mxu0 }
  0xeb   : > { %v759_v61 = vadd.f32 %v758_v17, %v726_v57 }
  0xec   : > { %v670_v38 = vadd.f32 %v669_v40, %v635_v21 }
  0xed   : > { %v700_v54 = vpop.f32.mrf.mxu2 }
  0xee   : > { %v701_v7 = vadd.f32 %v700_v54, %v670_v38 }
  0xf0   : > { %v731_v31 = vpop.f32.mrf.mxu3 }
  0xf1   : > { %v785_v1 = vpop.f32.mrf.mxu1  ;;  %v732_v50 = vadd.f32 %v731_v31, %v701_v7 }
  0xf2   : > { %v786_v35 = vadd.f32 %v785_v1, %v759_v61 }
  0xf3   : > { %v762_v42 = vpop.f32.mrf.mxu0 }
  0xf4   : > { %v1354_v19 = vsub.f32 0.0, %v786_v35  ;;  %v763_v58 = vadd.f32 %v762_v42, %v732_v50 }
  0xf6   : > { %v1358_v23 = vmul.f32 1.442695, %v1354_v19 }
  0xf8   : > { %1515 = vpow2.f32 %v1358_v23 }
  0xfb   : > { %v789_v43 = vpop.f32.mrf.mxu1 }
  0xfc   : > { %v2256_v2 = vadd.f32 %v789_v43, %v763_v58 }
  0xfd   : > { %v997_v9 = vpop.f32.mrf.mxu0 }
  0xfe   : > { %v1516_v27 = vpop.eup %1515  ;;  %v1356_v48 = vsub.f32 0.0, %v2256_v2  ;;  %v830_v44 = vpop.f32.mrf.mxu2 }
  0xff   : > { %v1366_v4 = vadd.f32 1.0, %v1516_v27  ;;  %v831_v30 = vadd.f32 %v830_v44, %v2250_v5 }
 0x100   : > { %v1362_v62 = vmul.f32 1.442695, %v1356_v48  ;;  %v939_v28 = vpop.f32.mrf.mxu3 }
 0x101   : > { %1517 = vrcp.f32 %v1366_v4  ;;  %v1381_v8 = vand.u32 2147483648, %v1366_v4  ;;  %v1379_v60 = vand.u32 2147483647, %v1366_v4  ;;  %v940_v6 = vadd.f32 %v939_v28, %v831_v30 }
 0x102   : > { %1519 = vpow2.f32 %v1362_v62  ;;  %vm1375_vm2 = vweird.f32 %v1366_v4 }
 0x103   : > { %v1382_v15 = vor.u32 1.1754944e-38, %v1381_v8  ;;  %vm1380_vm4 = vcmp.eq.f32.partialorder %v1379_v60, 8.507059e+37  ;;  %v998_v16 = vadd.f32 %v997_v9, %v940_v6 }
 0x105   : > { %v1002_v25 = vpop.f32.mrf.mxu0 }
 0x106   : > { %v1041_v49 = vpop.f32.mrf.mxu1 }
 0x107   : > { %v1518_v63 = vpop.eup %1517  ;;  %v838_v22 = vpop.f32.mrf.mxu2  ;;  %v1042_v34 = vadd.f32 %v1041_v49, %v998_v16 }
 0x108   : > { %v1520_v3 = vpop.eup %1519  ;;  %v1371_v12 = vmul.f32 %v1518_v63, %v1366_v4  ;;  %vm1376_vm1 = vweird.f32 %v1518_v63  ;;  %v839_v18 = vadd.f32 %v838_v22, %v2253_v24 }
 0x109   : > { %v1368_v26 = vadd.f32 1.0, %v1520_v3  ;;  %v943_v20 = vpop.f32.mrf.mxu3  ;;  %vm1377_vm3 = vmor %vm1375_vm2, %vm1376_vm1 }
 0x10a   : > { %v1372_v32 = vsub.f32 1.0, %v1371_v12  ;;  %v944_v36 = vadd.f32 %v943_v20, %v839_v18 }
 0x10b   : > { %1521 = vrcp.f32 %v1368_v26  ;;  %v1411_v40 = vand.u32 2147483648, %v1368_v26  ;;  %v1409_v59 = vand.u32 2147483647, %v1368_v26  ;;  %vm1405_vm6 = vweird.f32 %v1368_v26 }
 0x10c   : > { %v1373_v55 = vmul.f32 %v1518_v63, %v1372_v32  ;;  %v1003_v24 = vadd.f32 %v1002_v25, %v944_v36 }
 0x10d   : > { %v1412_v53 = vor.u32 1.1754944e-38, %v1411_v40  ;;  %vm1410_vm8 = vcmp.eq.f32.partialorder %v1409_v59, 8.507059e+37 }
 0x10e   : > { %v1374_v56 = vadd.f32 %v1518_v63, %v1373_v55  ;;  %v1047_v45 = vpop.f32.mrf.mxu1  ;;  %v1188_v41 = vpop.f32.mrf.mxu0 }
 0x10f   : > { %v1048_v54 = vadd.f32 %v1047_v45, %v1003_v24 }
 0x110   : > { %v1378_v11 = vsel %vm1377_vm3, %v1518_v63, %v1374_v56 }
 0x111   : > { %v1522_v47 = vpop.eup %1521  ;;  %v1383_v5 = vsel %vm1380_vm4, %v1382_v15, %v1378_v11 }
 0x112   : > { %v1430_v52 = vmul.f32 %v1383_v5, %v786_v35  ;;  %v1401_v29 = vmul.f32 %v1522_v47, %v1368_v26  ;;  %vm1406_vm5 = vweird.f32 %v1522_v47 }
 0x113   : > { %v1116_v33 = vpop.f32.mrf.mxu2  ;;  %vm1407_vm7 = vmor %vm1405_vm6, %vm1406_vm5 }
 0x114   : > { %1434 = vst [vmem:[%s2264_s6] sm:$0xff] %v1430_v52  ;;  %v1402_v39 = vsub.f32 1.0, %v1401_v29  ;;  %v1117_v13 = vadd.f32 %v1116_v33, %v1042_v34 }
 0x116   : > { %v1403_v0 = vmul.f32 %v1522_v47, %v1402_v39  ;;  %v1157_v51 = vpop.f32.mrf.mxu3  ;;  %v1196_v37 = vpop.f32.mrf.mxu0 }
 0x117   : > { %v1227_v46 = vpop.f32.mrf.mxu1  ;;  %v1158_v57 = vadd.f32 %v1157_v51, %v1117_v13 }
 0x118   : > { %v1404_v14 = vadd.f32 %v1522_v47, %v1403_v0 }
 0x119   : > { %v1189_v7 = vadd.f32 %v1188_v41, %v1158_v57 }
 0x11a   : > { %v1408_v10 = vsel %vm1407_vm7, %v1522_v47, %v1404_v14 }
 0x11b   : > { %v1413_v21 = vsel %vm1410_vm8, %v1412_v53, %v1408_v10  ;;  %v1120_v38 = vpop.f32.mrf.mxu2  ;;  %v1228_v42 = vadd.f32 %v1227_v46, %v1189_v7 }
 0x11c   : > { %v1432_v17 = vmul.f32 %v1413_v21, %v2256_v2  ;;  %v1121_v35 = vadd.f32 %v1120_v38, %v1048_v54 }
 0x11e   : > { %1436 = vst [vmem:[%s2264_s6 + $0x10] sm:$0xff] %v1432_v17  ;;  %v1161_v61 = vpop.f32.mrf.mxu3  ;;  %v1257_v31 = vpop.f32.mrf.mxu0 }
 0x11f   : > { %v1231_v1 = vpop.f32.mrf.mxu1  ;;  %v1162_v19 = vadd.f32 %v1161_v61, %v1121_v35  ;;  %v1258_v23 = vadd.f32 %v1257_v31, %v1228_v42 }
 0x121   : > { %v1197_v9 = vadd.f32 %v1196_v37, %v1162_v19 }
 0x123   : > { %v1320_v50 = vpop.f32.mrf.mxu2  ;;  %v1232_v2 = vadd.f32 %v1231_v1, %v1197_v9 }
 0x126   : > { %v1347_v43 = vpop.f32.mrf.mxu3  ;;  %v1262_v4 = vpop.f32.mrf.mxu0 }
 0x127   : > { %v1287_v58 = vpop.f32.mrf.mxu1  ;;  %v1263_v44 = vadd.f32 %v1262_v4, %v1232_v2 }
 0x128   : > { %v1288_v27 = vadd.f32 %v1287_v58, %v1258_v23 }
 0x12a   : > { %v1321_v48 = vadd.f32 %v1320_v50, %v1288_v27 }
 0x12b   : > { %v1324_v49 = vpop.f32.mrf.mxu2 }
 0x12c   : > { %v1348_v62 = vadd.f32 %v1347_v43, %v1321_v48 }
 0x12e   : > { %v1355_v28 = vsub.f32 0.0, %v1348_v62  ;;  %v1351_v12 = vpop.f32.mrf.mxu3 }
 0x12f   : > { %v1293_v25 = vpop.f32.mrf.mxu1 }
 0x130   : > { %v1360_v63 = vmul.f32 1.442695, %v1355_v28  ;;  %v1294_v3 = vadd.f32 %v1293_v25, %v1263_v44 }
 0x132   : > { %1523 = vpow2.f32 %v1360_v63  ;;  %v1325_v26 = vadd.f32 %v1324_v49, %v1294_v3 }
 0x134   : > { %v1352_v30 = vadd.f32 %v1351_v12, %v1325_v26 }
 0x136   : > { %v1357_v32 = vsub.f32 0.0, %v1352_v30 }
 0x138   : > { %v1524_v8 = vpop.eup %1523  ;;  %v1364_v22 = vmul.f32 1.442695, %v1357_v32 }
 0x139   : > { %v1367_v55 = vadd.f32 1.0, %v1524_v8 }
 0x13a   : > { %1525 = vpow2.f32 %v1364_v22 }
 0x13b   : > { %1527 = vrcp.f32 %v1367_v55  ;;  %v1396_v41 = vand.u32 2147483648, %v1367_v55  ;;  %v1394_v11 = vand.u32 2147483647, %v1367_v55  ;;  %vm1390_vm10 = vweird.f32 %v1367_v55 }
 0x13d   : > { %v1397_v16 = vor.u32 1.1754944e-38, %v1396_v41  ;;  %vm1395_vm12 = vcmp.eq.f32.partialorder %v1394_v11, 8.507059e+37 }
 0x140   : > { %v1526_v60 = vpop.eup %1525 }
 0x141   : > { %v1528_v6 = vpop.eup %1527  ;;  %v1369_v20 = vadd.f32 1.0, %v1526_v60 }
 0x142   : > { %v1386_v56 = vmul.f32 %v1528_v6, %v1367_v55  ;;  %vm1391_vm9 = vweird.f32 %v1528_v6 }
 0x143   : > { %1529 = vrcp.f32 %v1369_v20  ;;  %vm1392_vm11 = vmor %vm1390_vm10, %vm1391_vm9  ;;  %v1426_v40 = vand.u32 2147483648, %v1369_v20  ;;  %v1424_v0 = vand.u32 2147483647, %v1369_v20  ;;  %vm1420_vm14 = vweird.f32 %v1369_v20 }
 0x144   : > { %v1387_v45 = vsub.f32 1.0, %v1386_v56 }
 0x145   : > { %v1427_v36 = vor.u32 1.1754944e-38, %v1426_v40  ;;  %vm1425_vm0 = vcmp.eq.f32.partialorder %v1424_v0, 8.507059e+37 }
 0x146   : > { %v1388_v15 = vmul.f32 %v1528_v6, %v1387_v45 }
 0x148   : > { %v1389_v47 = vadd.f32 %v1528_v6, %v1388_v15 }
 0x149   : > { %v1530_v5 = vpop.eup %1529 }
 0x14a   : > { %v1393_v52 = vsel %vm1392_vm11, %v1528_v6, %v1389_v47  ;;  %v1416_v29 = vmul.f32 %v1530_v5, %v1369_v20  ;;  %vm1421_vm13 = vweird.f32 %v1530_v5 }
 0x14b   : > { %v1398_v18 = vsel %vm1395_vm12, %v1397_v16, %v1393_v52  ;;  %vm1422_vm15 = vmor %vm1420_vm14, %vm1421_vm13 }
 0x14c   : > { %v1431_v33 = vmul.f32 %v1398_v18, %v1348_v62  ;;  %v1417_v39 = vsub.f32 1.0, %v1416_v29 }
 0x14e   : > { %1435 = vst [vmem:[%s2264_s6 + $0x8] sm:$0xff] %v1431_v33  ;;  %v1418_v34 = vmul.f32 %v1530_v5, %v1417_v39 }
 0x150   : > { %v1419_v59 = vadd.f32 %v1530_v5, %v1418_v34 }
 0x152   : > { %v1423_v51 = vsel %vm1422_vm15, %v1530_v5, %v1419_v59 }
 0x153   : > { %v1428_v37 = vsel %vm1425_vm0, %v1427_v36, %v1423_v51 }
 0x154   : > { %v1433_v46 = vmul.f32 %v1428_v37, %v1352_v30 }
 0x156   : > { %1437 = vst [vmem:[%s2264_s6 + $0x18] sm:$0xff] %v1433_v46 }
 0x157 PF: > { %s13_s12 = sadd.s32 1, %s1537_s12  }
 0x158   : > { %p10_p4 = scmp.ge.s32.totalorder %s13_s12, 4  }
 0x15a   :  { %12 = sbr.rel (!%p10_p4) target bundleno = 1 (0x1), region = 62 }

// kernel: c2f_attention_forward.6
= control target key start
LH: loop header
LB: loop body
LE: loop exit
PB: predicated region body
PF: predicated region fallthrough
CT: control target
= control target key end

     0   :  { %s1724_s12 = smov 0   ;;  %s2476_s0 = inlined_call_operand.vmem [shape: f32[2,144,256], index: 0, kind: input, shape index: {}]   ;;  %s2477_s1 = inlined_call_operand.vmem [shape: f32[16,144], index: 1, kind: input, shape index: {}]   ;;  %s2478_s2 = inlined_call_operand.vmem [shape: f32[16,1], index: 2, kind: input, shape index: {}]   ;;  %s2479_s3 = inlined_call_operand.vmem [shape: f32[2,16,256], index: 3, kind: output, shape index: {}]  }
   0x1 LB: > { %s1637_s13 = sadd.s32 4294967295, %s1701_s12   ;;  %p1641_p0 = scmp.ge.s32.totalorder %s1701_s12, 1  ;;  %s1701_s12 = sphi %s1724_s12, %s13_s12  }
   0x2   : > { %p137_p1 = scmp.lt.s32.totalorder %s1701_s12, 3 }
   0x4   : > { %p138_p2 = pnand %p1641_p0, %p137_p1 }
   0x6   : > { %141 = sbr.rel (%p138_p2) target bundleno = 647 (0x287), region = 32 }
   0xb   : > { %p161_p3 = scmp.lt.s32.totalorder %s1637_s13, 1  ;;  %v207_v61 = vld [vmem:[%s2477_s1] sm:$0xff]  ;;  %vm223_vm0 = vcmask 130048  }
   0xd   : > { %s2524_s13 = smov (!%p161_p3, %s1637_s13), 1 }
   0xe   : > { %s1648_s14 = smul.u32 288, %s2524_s13  ;;  %s1647_s30 = sshll.u32 %s2524_s13, 5 }
   0xf   : > { %s2463_s6 = scalar_lea.vmem %s2479_s3, %s1647_s30 }
  0x10   : > { %s1738_s17 = scalar_lea.vmem %s2476_s0, %s1648_s14 }
  0x11   : > { %v201_v0 = vld [vmem:[%s1738_s17 + $0xf0] sm:$0xff]  ;;  %v199_v1 = vld [vmem:[%s1738_s17 + $0xe0] sm:$0xff] }
  0x12   : > { %v197_v2 = vld [vmem:[%s1738_s17 + $0xd0] sm:$0xff]  ;;  %v1743_v3 = vand.u32 4294901760, %v201_v0  ;;  %v1745_v4 = vand.u32 4294901760, %v199_v1  ;;  %v195_v6 = vld [vmem:[%s1738_s17 + $0xc0] sm:$0xff] }
  0x13   : > { %v1747_v5 = vand.u32 4294901760, %v197_v2  ;;  %v193_v7 = vld [vmem:[%s1738_s17 + $0xb0] sm:$0xff]  ;;  %v191_v8 = vld [vmem:[%s1738_s17 + $0xa0] sm:$0xff]  ;;  %v1752_v9 = vand.u32 4294901760, %v195_v6 }
  0x14   : > { %v1754_v10 = vand.u32 4294901760, %v193_v7  ;;  %v1756_v11 = vand.u32 4294901760, %v191_v8  ;;  %v189_v12 = vld [vmem:[%s1738_s17 + $0x90] sm:$0xff]  ;;  %v187_v13 = vld [vmem:[%s1738_s17 + $0x80] sm:$0xff]  ;;  %231 = vmatpush.msra.mxu0 %v1743_v3  ;;  %v1762_v14 = vsub.f32 %v201_v0, %v1743_v3  ;;  %v1765_v15 = vsub.f32 %v199_v1, %v1745_v4  ;;  %444 = vmatpush.msra.mxu3 %v1743_v3 }
  0x15   : > { %v1769_v16 = vsub.f32 %v197_v2, %v1747_v5  ;;  %v1771_v17 = vand.u32 4294901760, %v189_v12  ;;  %v185_v18 = vld [vmem:[%s1738_s17 + $0x70] sm:$0xff]  ;;  %v1775_v19 = vsub.f32 %v195_v6, %v1752_v9  ;;  %v1780_v21 = vand.u32 4294901760, %v187_v13  ;;  %v183_v26 = vld [vmem:[%s1738_s17 + $0x60] sm:$0xff] }
  0x16   : > { %v1778_v20 = vsub.f32 %v193_v7, %v1754_v10  ;;  %233 = vmatpush.msra.mxu0 %v1745_v4  ;;  %386 = vmatpush.msra.mxu2 %v1762_v14  ;;  %v281_v22 = vand.u32 4294901760, %v1762_v14  ;;  %v287_v23 = vand.u32 4294901760, %v1765_v15  ;;  %v1788_v25 = vsub.f32 %v191_v8, %v1756_v11  ;;  %v181_v36 = vld [vmem:[%s1738_s17 + $0x50] sm:$0xff]  ;;  %v179_v42 = vld [vmem:[%s1738_s17 + $0x40] sm:$0xff] }
  0x17   : > { %v293_v24 = vand.u32 4294901760, %v1769_v16  ;;  %446 = vmatpush.msra.mxu3 %v1745_v4  ;;  %v299_v27 = vand.u32 4294901760, %v1775_v19  ;;  %v1794_v28 = vsub.f32 %v189_v12, %v1771_v17  ;;  %v1796_v29 = vand.u32 4294901760, %v185_v18  ;;  %v177_v48 = vld [vmem:[%s1738_s17 + $0x30] sm:$0xff]  ;;  %v175_v54 = vld [vmem:[%s1738_s17 + $0x20] sm:$0xff] }
  0x18   : > { %235 = vmatpush.msra.mxu0 %v1747_v5  ;;  %389 = vmatpush.msra.mxu2 %v1765_v15  ;;  %v282_v30 = vsub.f32 %v1762_v14, %v281_v22  ;;  %v288_v31 = vsub.f32 %v1765_v15, %v287_v23  ;;  %v305_v33 = vand.u32 4294901760, %v1778_v20  ;;  %v1812_v34 = vsub.f32 %v187_v13, %v1780_v21  ;;  %v173_v59 = vld [vmem:[%s1738_s17 + $0x10] sm:$0xff]  ;;  %v171_v2 = vld [vmem:[%s1738_s17] sm:$0xff]  ;;  %v198_v15 = vld [vmem:[%s1738_s17 + $0xd8] sm:$0xff] }
  0x19   : > { %v294_v32 = vsub.f32 %v1769_v16, %v293_v24  ;;  %448 = vmatpush.msra.mxu3 %v1747_v5  ;;  %v1814_v35 = vand.u32 4294901760, %v183_v26  ;;  %v300_v39 = vsub.f32 %v1775_v19, %v299_v27  ;;  %v311_v40 = vand.u32 4294901760, %v1788_v25  ;;  %v205_v8 = vld [vmem:[%s1738_s17 + $0x110] sm:$0xff] }
  0x1a   : > { %237 = vmatpush.msra.mxu0 %v1752_v9  ;;  %392 = vmatpush.msra.mxu2 %v1769_v16  ;;  %v283_v37 = vand.u32 4294901760, %v282_v30  ;;  %v289_v38 = vand.u32 4294901760, %v288_v31  ;;  %v317_v41 = vand.u32 4294901760, %v1794_v28  ;;  %v306_v44 = vsub.f32 %v1778_v20, %v305_v33 }
  0x1b   : > { %450 = vmatpush.msra.mxu3 %v1752_v9  ;;  %v295_v43 = vand.u32 4294901760, %v294_v32  ;;  %v1831_v45 = vsub.f32 %v185_v18, %v1796_v29  ;;  %v1833_v46 = vand.u32 4294901760, %v181_v36  ;;  %v1838_v47 = vsub.f32 %v183_v26, %v1814_v35 }
  0x1c   : > { %239 = vmatpush.msra.mxu0 %v1754_v10  ;;  %284 = vmatpush.msra.mxu1 %v283_v37  ;;  %v301_v49 = vand.u32 4294901760, %v300_v39  ;;  %v312_v50 = vsub.f32 %v1788_v25, %v311_v40  ;;  %v1845_v51 = vand.u32 4294901760, %v179_v42  ;;  %v323_v52 = vand.u32 4294901760, %v1812_v34 }
  0x1d   : > { %395 = vmatpush.msra.mxu2 %v1775_v19  ;;  %452 = vmatpush.msra.mxu3 %v1754_v10  ;;  %v318_v53 = vsub.f32 %v1794_v28, %v317_v41  ;;  %v307_v55 = vand.u32 4294901760, %v306_v44  ;;  %v1856_v56 = vsub.f32 %v181_v36, %v1833_v46  ;;  %v1858_v57 = vand.u32 4294901760, %v177_v48 }
  0x1e   : > { %241 = vmatpush.msra.mxu0 %v1756_v11  ;;  %290 = vmatpush.msra.mxu1 %v289_v38  ;;  %v2488_v58 = vand.u32 4294901760, %v1831_v45  ;;  %v2485_v60 = vand.u32 4294901760, %v1838_v47  ;;  %v313_v62 = vand.u32 4294901760, %v312_v50  ;;  %v324_v63 = vsub.f32 %v1812_v34, %v323_v52 }
  0x1f   : > { %398 = vmatpush.msra.mxu2 %v1778_v20  ;;  %454 = vmatpush.msra.mxu3 %v1756_v11  ;;  %v1873_v0 = vsub.f32 %v179_v42, %v1845_v51  ;;  %v1875_v1 = vand.u32 4294901760, %v175_v54  ;;  %v319_v6 = vand.u32 4294901760, %v318_v53  ;;  %v1880_v7 = vand.u32 4294901760, %v173_v59  ;;  %v203_v42 = vld [vmem:[%s1738_s17 + $0x100] sm:$0xff] }
  0x20   : > { %243 = vmatpush.msra.mxu0 %v1771_v17  ;;  %296 = vmatpush.msra.mxu1 %v295_v43  ;;  %v330_v12 = vsub.f32 %v1831_v45, %v2488_v58  ;;  %v1888_v13 = vsub.f32 %v177_v48, %v1858_v57  ;;  %v2482_v18 = vand.u32 4294901760, %v1856_v56  ;;  %v1891_v26 = vand.u32 4294901760, %v207_v61  ;;  %v200_v58 = vld [vmem:[%s1738_s17 + $0xe8] sm:$0xff] }
  0x21   : > { %401 = vmatpush.msra.mxu2 %v1788_v25  ;;  %456 = vmatpush.msra.mxu3 %v1771_v17  ;;  %v336_v30 = vsub.f32 %v1838_v47, %v2485_v60  ;;  %v1898_v31 = vand.u32 4294901760, %v171_v2  ;;  %v325_v32 = vand.u32 4294901760, %v324_v63  ;;  %v1902_v36 = vsub.f32 %v175_v54, %v1875_v1 }
  0x22   : > { %245 = vmatpush.msra.mxu0 %v1780_v21  ;;  %302 = vmatpush.msra.mxu1 %v301_v49  ;;  %v2481_v37 = vand.u32 4294901760, %v1873_v0  ;;  %v1905_v38 = vand.u32 4294901760, %v205_v8  ;;  %v1910_v39 = vsub.f32 %v173_v59, %v1880_v7  ;;  %v331_v43 = vand.u32 4294901760, %v330_v12  ;;  %v209_v59 = vld [vmem:[%s2477_s1 + $0x10] sm:$0xff] }
  0x23   : > { %404 = vmatpush.msra.mxu2 %v1794_v28  ;;  %458 = vmatpush.msra.mxu3 %v1780_v21  ;;  %v342_v44 = vsub.f32 %v1856_v56, %v2482_v18  ;;  %v2480_v48 = vand.u32 4294901760, %v1888_v13  ;;  %v1919_v49 = vsub.f32 %v207_v61, %v1891_v26  ;;  %v337_v50 = vand.u32 4294901760, %v336_v30 }
  0x24   : > { %247 = vmatpush.msra.mxu0 %v1796_v29  ;;  %308 = vmatpush.msra.mxu1 %v307_v55  ;;  %v1924_v53 = vsub.f32 %v171_v2, %v1898_v31  ;;  %v348_v54 = vsub.f32 %v1873_v0, %v2481_v37  ;;  %v2483_v55 = vand.u32 4294901760, %v1902_v36  ;;  %v1934_v61 = vand.u32 4294901760, %v203_v42 }
  0x25   : > { %407 = vmatpush.msra.mxu2 %v1812_v34  ;;  %460 = vmatpush.msra.mxu3 %v1796_v29  ;;  %v2484_v63 = vand.u32 4294901760, %v1910_v39  ;;  %v343_v2 = vand.u32 4294901760, %v342_v44  ;;  %v1947_v12 = vand.u32 4294901760, %v1919_v49  ;;  %v188_v34 = vld [vmem:[%s1738_s17 + $0x88] sm:$0xff] }
  0x26   : > { %249 = vmatpush.msra.mxu0 %v1814_v35  ;;  %314 = vmatpush.msra.mxu1 %v313_v62  ;;  %v1937_v62 = vsub.f32 %v205_v8, %v1905_v38  ;;  %v208_v8 = vld [vmem:[%s2477_s1 + $0x8] sm:$0xff]  ;;  %v2487_v30 = vand.u32 4294901760, %v1924_v53  ;;  %v360_v44 = vsub.f32 %v1902_v36, %v2483_v55  ;;  %v1963_v37 = vsub.f32 %v203_v42, %v1934_v61 }
  0x27   : > { %410 = vmatpush.msra.mxu2 %v1831_v45  ;;  %462 = vmatpush.msra.mxu3 %v1814_v35  ;;  %v225_v18 = vsel %vm223_vm0, %v208_v8, 0  ;;  %v265_v55 = vsub.f32 %v1919_v49, %v1947_v12 }
  0x28   : > { %251 = vmatpush.msra.mxu0 %v1833_v46  ;;  %320 = vmatpush.msra.mxu1 %v319_v6  ;;  %v354_v6 = vsub.f32 %v1888_v13, %v2480_v48  ;;  %v2486_v48 = vand.u32 4294901760, %v1937_v62  ;;  %v372_v42 = vsub.f32 %v1924_v53, %v2487_v30  ;;  %v1987_v60 = vand.u32 4294901760, %v225_v18 }
  0x29   : > { %413 = vmatpush.msra.mxu2 %v1838_v47  ;;  %464 = vmatpush.msra.mxu3 %v1833_v46 }
  0x2a   : > { %253 = vmatpush.msra.mxu0 %v1845_v51  ;;  %326 = vmatpush.msra.mxu1 %v325_v32  ;;  %v1955_v32 = vand.u32 4294901760, %v209_v59 }
  0x2b   : > { %416 = vmatpush.msra.mxu2 %v1856_v56  ;;  %466 = vmatpush.msra.mxu3 %v1845_v51 }
  0x2c   : > { %255 = vmatpush.msra.mxu0 %v1858_v57  ;;  %332 = vmatpush.msra.mxu1 %v331_v43  ;;  %v349_v43 = vand.u32 4294901760, %v348_v54  ;;  %v366_v54 = vsub.f32 %v1910_v39, %v2484_v63  ;;  %v1980_v8 = vsub.f32 %v209_v59, %v1955_v32  ;;  %v2493_v63 = vand.u32 4294901760, %v1963_v37  ;;  %v202_v59 = vld [vmem:[%s1738_s17 + $0xf8] sm:$0xff] }
  0x2d   : > { %419 = vmatpush.msra.mxu2 %v1873_v0  ;;  %468 = vmatpush.msra.mxu3 %v1858_v57 }
  0x2e   : > { %257 = vmatpush.msra.mxu0 %v1875_v1  ;;  %338 = vmatpush.msra.mxu1 %v337_v50  ;;  %v355_v50 = vand.u32 4294901760, %v354_v6  ;;  %v654_v6 = vsub.f32 %v1937_v62, %v2486_v48  ;;  %v373_v48 = vand.u32 4294901760, %v372_v42  ;;  %v2000_v30 = vand.u32 4294901760, %v1980_v8 }
  0x2f   : > { %422 = vmatpush.msra.mxu2 %v1888_v13  ;;  %470 = vmatpush.msra.mxu3 %v1875_v1 }
  0x30   : > { %259 = vmatpush.msra.mxu0 %v1880_v7  ;;  %344 = vmatpush.msra.mxu1 %v343_v2  ;;  %v361_v2 = vand.u32 4294901760, %v360_v44  ;;  %v1994_v44 = vand.u32 4294901760, %v265_v55  ;;  %v655_v14 = vand.u32 4294901760, %v654_v6  ;;  %v2008_v55 = vsub.f32 %v225_v18, %v1987_v60  ;;  %v210_v6 = vld [vmem:[%s2477_s1 + $0x18] sm:$0xff] }
  0x31   : > { %425 = vmatpush.msra.mxu2 %v1902_v36  ;;  %472 = vmatpush.msra.mxu3 %v1880_v7  ;;  %v273_v18 = vsub.f32 %v1980_v8, %v2000_v30  ;;  %v228_v25 = vsel %vm223_vm0, %v210_v6, 0 }
  0x32   : > { %261 = vmatpush.msra.mxu0 %v1898_v31  ;;  %350 = vmatpush.msra.mxu1 %v349_v43  ;;  %v367_v43 = vand.u32 4294901760, %v366_v54  ;;  %v196_v54 = vld [vmem:[%s1738_s17 + $0xc8] sm:$0xff] }
  0x33   : > { %428 = vmatpush.msra.mxu2 %v1910_v39  ;;  %474 = vmatpush.msra.mxu3 %v1898_v31 }
  0x34   : > { %491 = vmatpush.msrb.mxu0 %v281_v22  ;;  %356 = vmatpush.msra.mxu1 %v355_v50  ;;  %v660_v22 = vsub.f32 %v1963_v37, %v2493_v63  ;;  %v2010_v50 = vand.u32 4294901760, %v202_v59 }
  0x35   : > { %431 = vmatpush.msra.mxu2 %v1924_v53  ;;  %478 = vmatmul.f32.vlgmr.msra.gmra.mxu3 %v1947_v12 }
  0x36   : > { %495 = vmatpush.msrb.mxu0 %v287_v23  ;;  %434 = vmatmul.f32.vlgmr.msra.gmra.mxu2 %v1919_v49  ;;  %v2017_v23 = vand.u32 4294901760, %v200_v58  ;;  %v661_v16 = vand.u32 4294901760, %v660_v22  ;;  %v2029_v42 = vsub.f32 %v202_v59, %v2010_v50  ;;  %v192_v59 = vld [vmem:[%s1738_s17 + $0xa8] sm:$0xff] }
  0x37   : > { %362 = vmatpush.msra.mxu1 %v361_v2  ;;  %267 = vmatmul.f32.vlgmr.msra.gmra.mxu0 %v1994_v44  ;;  %v2031_v2 = vand.u32 4294901760, %v198_v15  ;;  %v2075_v28 = vand.u32 4294901760, %v192_v59 }
  0x38   : > { %499 = vmatpush.msrb.mxu0 %v293_v24  ;;  %617 = vmatpush.msrb.mxu2 %v1905_v38  ;;  %v2026_v24 = vand.u32 4294901760, %v2008_v55  ;;  %v2039_v19 = vsub.f32 %v200_v58, %v2017_v23 }
  0x39   : > { %368 = vmatpush.msra.mxu1 %v367_v43  ;;  %656 = vmatpush.msrb.mxu3 %v655_v14  ;;  %v2057_v58 = vsub.f32 %v198_v15, %v2031_v2  ;;  %v2086_v15 = vand.u32 4294901760, %v228_v25 }
  0x3a   : > { %503 = vmatpush.msrb.mxu0 %v299_v27  ;;  %619 = vmatpush.msrb.mxu2 %v1934_v61  ;;  %v2041_v27 = vand.u32 4294901760, %v196_v54  ;;  %v623_v20 = vsub.f32 %v2008_v55, %v2026_v24 }
  0x3b   : > { %374 = vmatpush.msra.mxu1 %v373_v48  ;;  %v194_v48 = vld [vmem:[%s1738_s17 + $0xb8] sm:$0xff]  ;;  %662 = vmatpush.msrb.mxu3 %v661_v16  ;;  %v2491_v22 = vand.u32 4294901760, %v2057_v58 }
  0x3c   : > { %507 = vmatpush.msrb.mxu0 %v305_v33  ;;  %376 = vmatmul.f32.vlgmr.msra.gmra.mxu1 %v1891_v26  ;;  %v2490_v33 = vand.u32 4294901760, %v2029_v42  ;;  %v2070_v43 = vsub.f32 %v196_v54, %v2041_v27 }
  0x3d   : > { %562 = vmatpush.msrb.mxu1 %v1743_v3  ;;  %v2051_v3 = vand.u32 4294901760, %v273_v18  ;;  %484 = vmatmul.f32.gmra.mxu3 %v2000_v30  ;;  %v1703_v18 = vmov 0  }
  0x3e   : > { %511 = vmatpush.msrb.mxu0 %v311_v40  ;;  %439 = vmatmul.f32.gmra.mxu2 %v1980_v8  ;;  %v2489_v40 = vand.u32 4294901760, %v2039_v19  ;;  %v844_v14 = vsub.f32 %v2029_v42, %v2490_v33  ;;  %v2492_v16 = vand.u32 4294901760, %v2070_v43 }
  0x3f   : > { %564 = vmatpush.msrb.mxu1 %v1745_v4  ;;  %v2063_v4 = vand.u32 4294901760, %v194_v48  ;;  %688 = vmatpush.msra.mxu2 %v1937_v62 }
  0x40   : > { %515 = vmatpush.msrb.mxu0 %v317_v41  ;;  %718 = vmatpush.msra.mxu3 %v1905_v38  ;;  %v190_v41 = vld [vmem:[%s1738_s17 + $0x98] sm:$0xff]  ;;  %v850_v54 = vsub.f32 %v2039_v19, %v2489_v40  ;;  %v184_v40 = vld [vmem:[%s1738_s17 + $0x68] sm:$0xff] }
  0x41   : > { %566 = vmatpush.msrb.mxu1 %v1747_v5  ;;  %275 = vmatmul.f32.gmra.mxu0 %v2051_v3  ;;  %v2080_v5 = vand.u32 4294901760, %v623_v20  ;;  %v2100_v6 = vand.u32 4294901760, %v190_v41  ;;  %v2111_v20 = vand.u32 4294901760, %v188_v34 }
  0x42   : > { %519 = vmatpush.msrb.mxu0 %v323_v52  ;;  %v2500_v52 = vand.u32 4294901760, %v1831_v45  ;;  %691 = vmatpush.msra.mxu2 %v1963_v37  ;;  %v2501_v45 = vand.u32 4294901760, %v1838_v47  ;;  %v856_v47 = vsub.f32 %v2057_v58, %v2491_v22  ;;  %v851_v33 = vand.u32 4294901760, %v850_v54 }
  0x43   : > { %568 = vmatpush.msrb.mxu1 %v1752_v9  ;;  %2499 = vst [vmem:[#allocation2_spill] sm:$0xff] %v2080_v5  ;;  %v2093_v9 = vsub.f32 %v194_v48, %v2063_v4  ;;  %1658 = vset.pattern.permute.xlu0 %v1703_v18  ;;  %v2109_v48 = vsub.f32 %v192_v59, %v2075_v28  ;;  %v845_v18 = vand.u32 4294901760, %v844_v14 }
  0x44   : > { %523 = vmatpush.msrb.mxu0 %v2500_v52  ;;  %380 = vmatmul.f32.gmra.mxu1 %v1955_v32  ;;  %v186_v52 = vld [vmem:[%s1738_s17 + $0x78] sm:$0xff]  ;;  %v862_v14 = vsub.f32 %v2070_v43, %v2492_v16  ;;  %v857_v54 = vand.u32 4294901760, %v856_v47  ;;  %v2503_v16 = vand.u32 4294901760, %v1873_v0  ;;  %v2504_v0 = vand.u32 4294901760, %v1888_v13 }
  0x45   : > { %570 = vmatpush.msrb.mxu1 %v1754_v10  ;;  %v211_v10 = vld [vmem:[%s2478_s2] sm:$0xff]  ;;  %720 = vmatpush.msra.mxu3 %v1934_v61  ;;  %v2494_v59 = vand.u32 4294901760, %v2093_v9  ;;  %v2134_v22 = vand.u32 4294901760, %v186_v52 }
  0x46   : > { %527 = vmatpush.msrb.mxu0 %v2501_v45  ;;  %625 = vmatmul.f32.vlgmr.msrb.gmra.mxu2 %v2080_v5  ;;  %v2120_v45 = vsub.f32 %v228_v25, %v2086_v15  ;;  %v2132_v25 = vsub.f32 %v190_v41, %v2100_v6  ;;  %v2146_v41 = vand.u32 4294901760, %v184_v40 }
  0x47   : > { %572 = vmatpush.msrb.mxu1 %v1756_v11  ;;  %793 = vmatpush.msrb.mxu2 %v2010_v50  ;;  %v2502_v11 = vand.u32 4294901760, %v1856_v56  ;;  %v2140_v56 = vsub.f32 %v188_v34, %v2111_v20  ;;  %v182_v34 = vld [vmem:[%s1738_s17 + $0x58] sm:$0xff]  ;;  %v2158_v63 = vsub.f32 %v186_v52, %v2134_v22 }
  0x48   : > { %215 = vperm.xlu0 %1658, %v211_v10   ;;  %664 = vmatmul.f32.vlgmr.msrb.gmra.mxu3 %v1987_v60  ;;  %v2495_v10 = vand.u32 4294901760, %v2109_v48  ;;  %v2497_v47 = vand.u32 4294901760, %v2132_v25  ;;  %v2174_v52 = vand.u32 4294901760, %v182_v34 }
  0x49   : > { %531 = vmatpush.msrb.mxu0 %v2502_v11  ;;  %574 = vmatpush.msrb.mxu1 %v1771_v17  ;;  %v2144_v11 = vand.u32 4294901760, %v2120_v45  ;;  %v868_v17 = vsub.f32 %v2093_v9, %v2494_v59  ;;  %v180_v59 = vld [vmem:[%s1738_s17 + $0x48] sm:$0xff] }
  0x4a   : > { %795 = vmatpush.msrb.mxu2 %v2017_v23  ;;  %846 = vmatpush.msrb.mxu3 %v845_v18  ;;  %v863_v18 = vand.u32 4294901760, %v862_v14  ;;  %v2505_v14 = vand.u32 4294901760, %v1902_v36  ;;  %v2188_v5 = vand.u32 4294901760, %v180_v59 }
  0x4b   : > { %535 = vmatpush.msrb.mxu0 %v2503_v16  ;;  %576 = vmatpush.msrb.mxu1 %v1780_v21  ;;  %v874_v21 = vsub.f32 %v2109_v48, %v2495_v10  ;;  %v631_v13 = vsub.f32 %v2120_v45, %v2144_v11  ;;  %v880_v10 = vsub.f32 %v2132_v25, %v2497_v47  ;;  %v891_v16 = vand.u32 4294901760, %v2158_v63 }
  0x4c   : > { %797 = vmatpush.msrb.mxu2 %v2031_v2  ;;  %852 = vmatpush.msrb.mxu3 %v851_v33  ;;  %v212_v33 = vld [vmem:[%s2478_s2 + $0x8] sm:$0xff] }
  0x4d   : > { %539 = vmatpush.msrb.mxu0 %v2504_v0  ;;  %578 = vmatpush.msrb.mxu1 %v1796_v29  ;;  %v2177_v29 = vsub.f32 %v184_v40, %v2146_v41  ;;  %v869_v0 = vand.u32 4294901760, %v868_v17  ;;  %v2506_v40 = vand.u32 4294901760, %v1910_v39  ;;  %v875_v36 = vand.u32 4294901760, %v874_v21 }
  0x4e   : > { %799 = vmatpush.msrb.mxu2 %v2041_v27  ;;  %858 = vmatpush.msrb.mxu3 %v857_v54  ;;  %v178_v54 = vld [vmem:[%s1738_s17 + $0x38] sm:$0xff]  ;;  %v2508_v21 = vand.u32 4294901760, %v1924_v53 }
  0x4f   : > { %543 = vmatpush.msrb.mxu0 %v2505_v14  ;;  %580 = vmatpush.msrb.mxu1 %v1814_v35  ;;  %v2507_v35 = vand.u32 4294901760, %v2140_v56  ;;  %v176_v14 = vld [vmem:[%s1738_s17 + $0x28] sm:$0xff]  ;;  %v2498_v47 = vand.u32 4294901760, %v2177_v29  ;;  %v2204_v39 = vand.u32 4294901760, %v178_v54 }
  0x50   : > { %801 = vmatpush.msrb.mxu2 %v2063_v4  ;;  %864 = vmatpush.msrb.mxu3 %v863_v18  ;;  %v2198_v18 = vand.u32 4294901760, %v631_v13  ;;  %v892_v13 = vsub.f32 %v2158_v63, %v891_v16 }
  0x51   : > { %220 = vperm.xlu0 %1658, %v212_v33   ;;  %547 = vmatpush.msrb.mxu0 %v2506_v40  ;;  %v886_v17 = vsub.f32 %v2140_v56, %v2507_v35  ;;  %v2202_v33 = vsub.f32 %v182_v34, %v2174_v52  ;;  %v2214_v40 = vsub.f32 %v180_v59, %v2188_v5  ;;  %v2216_v34 = vand.u32 4294901760, %v176_v14  ;;  %v174_v35 = vld [vmem:[%s1738_s17 + $0x18] sm:$0xff] }
  0x52   : > { %582 = vmatpush.msrb.mxu1 %v1833_v46  ;;  %803 = vmatpush.msrb.mxu2 %v2075_v28  ;;  %v881_v46 = vand.u32 4294901760, %v880_v10  ;;  %v898_v10 = vsub.f32 %v2177_v29, %v2498_v47  ;;  %v2228_v59 = vsub.f32 %v178_v54, %v2204_v39 }
  0x53   : > { %870 = vmatpush.msrb.mxu3 %v869_v0  ;;  %551 = vmatpush.msrb.mxu0 %v2508_v21  ;;  %v887_v53 = vand.u32 4294901760, %v886_v17  ;;  %v903_v0 = vand.u32 4294901760, %v2202_v33  ;;  %v172_v21 = vld [vmem:[%s1738_s17 + $0x8] sm:$0xff]  ;;  %v893_v17 = vand.u32 4294901760, %v892_v13  ;;  %v2239_v47 = vsub.f32 %v176_v14, %v2216_v34 }
  0x54   : > { %584 = vmatpush.msrb.mxu1 %v1845_v51  ;;  %805 = vmatpush.msrb.mxu2 %v2100_v6  ;;  %v2509_v51 = vand.u32 4294901760, %v1937_v62  ;;  %v2510_v62 = vand.u32 4294901760, %v1963_v37  ;;  %v915_v37 = vand.u32 4294901760, %v2228_v59 }
  0x55   : > { %876 = vmatpush.msrb.mxu3 %v875_v36  ;;  %553 = vmatmul.f32.vlgmr.msrb.gmra.mxu0 %v1891_v26  ;;  %v2232_v36 = vand.u32 4294901760, %v174_v35  ;;  %v904_v54 = vsub.f32 %v2202_v33, %v903_v0  ;;  %v921_v13 = vand.u32 4294901760, %v2239_v47 }
  0x56   : > { %633 = vmatmul.f32.gmra.mxu2 %v2198_v18  ;;  %751 = vmatpush.msra.mxu0 %v2509_v51  ;;  %v909_v51 = vand.u32 4294901760, %v2214_v40 }
  0x57   : > { %586 = vmatpush.msrb.mxu1 %v1858_v57  ;;  %807 = vmatpush.msrb.mxu2 %v2111_v20  ;;  %v899_v57 = vand.u32 4294901760, %v898_v10  ;;  %v2253_v14 = vsub.f32 %v174_v35, %v2232_v36  ;;  %v916_v35 = vsub.f32 %v2228_v59, %v915_v37 }
  0x58   : > { %882 = vmatpush.msrb.mxu3 %v881_v46  ;;  %755 = vmatpush.msra.mxu0 %v2510_v62  ;;  %v2248_v46 = vand.u32 4294901760, %v172_v21  ;;  %v922_v62 = vsub.f32 %v2239_v47, %v921_v13 }
  0x59   : > { %668 = vmatmul.f32.gmra.mxu3 %v2086_v15  ;;  %588 = vmatpush.msrb.mxu1 %v1875_v1  ;;  %v910_v1 = vsub.f32 %v2214_v40, %v909_v51  ;;  %v927_v10 = vand.u32 4294901760, %v2253_v14 }
  0x5a   : > { %809 = vmatpush.msrb.mxu2 %v2134_v22  ;;  %888 = vmatpush.msrb.mxu3 %v887_v53  ;;  %v2267_v53 = vsub.f32 %v172_v21, %v2248_v46  ;;  %v917_v21 = vand.u32 4294901760, %v916_v35  ;;  %v2512_v35 = vand.u32 4294901760, %v2039_v19 }
  0x5b   : > { %948 = vmatpush.msrb.mxu0 %v2029_v42  ;;  %590 = vmatpush.msrb.mxu1 %v1880_v7  ;;  %v905_v7 = vand.u32 4294901760, %v904_v54 }
  0x5c   : > { %811 = vmatpush.msrb.mxu2 %v2146_v41  ;;  %894 = vmatpush.msrb.mxu3 %v893_v17  ;;  %v933_v17 = vand.u32 4294901760, %v2267_v53 }
  0x5d   : > { %951 = vmatpush.msrb.mxu0 %v2039_v19  ;;  %592 = vmatpush.msrb.mxu1 %v1898_v31  ;;  %v911_v31 = vand.u32 4294901760, %v910_v1  ;;  %v2514_v19 = vand.u32 4294901760, %v2070_v43 }
  0x5e   : > { %813 = vmatpush.msrb.mxu2 %v2174_v52  ;;  %900 = vmatpush.msrb.mxu3 %v899_v57  ;;  %v928_v57 = vsub.f32 %v2253_v14, %v927_v10  ;;  %v934_v54 = vsub.f32 %v2267_v53, %v933_v17 }
  0x5f   : > { %954 = vmatpush.msrb.mxu0 %v2057_v58  ;;  %594 = vmatmul.f32.vlgmr.msrb.gmra.mxu1 %v1891_v26 }
  0x60   : > { %557 = vmatmul.f32.gmra.mxu0 %v1955_v32  ;;  %694 = vmatmul.f32.vlgmr.msra.gmra.mxu2 %v2008_v55  ;;  %v935_v1 = vand.u32 4294901760, %v934_v54 }
  0x61   : > { %780 = vmatpush.msra.mxu1 %v1905_v38  ;;  %815 = vmatpush.msrb.mxu2 %v2188_v5  ;;  %v923_v38 = vand.u32 4294901760, %v922_v62 }
  0x62   : > { %906 = vmatpush.msrb.mxu3 %v905_v7  ;;  %957 = vmatpush.msrb.mxu0 %v2070_v43  ;;  %v2511_v7 = vand.u32 4294901760, %v2029_v42  ;;  %v206_v42 = vld [vmem:[%s1738_s17 + $0x118] sm:$0xff] }
  0x63   : > { %724 = vmatmul.f32.vlgmr.msra.gmra.mxu3 %v2026_v24  ;;  %782 = vmatpush.msra.mxu1 %v1934_v61  ;;  %v929_v61 = vand.u32 4294901760, %v928_v57 }
  0x64   : > { %817 = vmatpush.msrb.mxu2 %v2204_v39  ;;  %912 = vmatpush.msrb.mxu3 %v911_v31  ;;  %v2513_v31 = vand.u32 4294901760, %v2057_v58  ;;  %v2515_v58 = vand.u32 4294901760, %v2093_v9 }
  0x65   : > { %960 = vmatpush.msrb.mxu0 %v2093_v9  ;;  %1006 = vmatpush.msrb.mxu1 %v2010_v50 }
  0x66   : > { %819 = vmatpush.msrb.mxu2 %v2216_v34  ;;  %918 = vmatpush.msrb.mxu3 %v917_v21 }
  0x67   : > { %963 = vmatpush.msrb.mxu0 %v2109_v48  ;;  %1008 = vmatpush.msrb.mxu1 %v2017_v23 }
  0x68   : > { %821 = vmatpush.msrb.mxu2 %v2232_v36  ;;  %924 = vmatpush.msrb.mxu3 %v923_v38 }
  0x69   : > { %966 = vmatpush.msrb.mxu0 %v2132_v25  ;;  %1010 = vmatpush.msrb.mxu1 %v2031_v2 }
  0x6a   : > { %598 = vmatmul.f32.gmra.mxu1 %v1955_v32  ;;  %699 = vmatmul.f32.gmra.mxu2 %v2120_v45 }
  0x6b   : > { %823 = vmatpush.msrb.mxu2 %v2248_v46  ;;  %930 = vmatpush.msrb.mxu3 %v929_v61 }
  0x6c   : > { %969 = vmatpush.msrb.mxu0 %v2140_v56  ;;  %1012 = vmatpush.msrb.mxu1 %v2041_v27 }
  0x6d   : > { %730 = vmatmul.f32.gmra.mxu3 %v2144_v11  ;;  %757 = vmatmul.f32.vlgmr.msra.gmra.mxu0 %v1987_v60 }
  0x6e   : > { %1053 = vmatpush.msra.mxu2 %v2511_v7  ;;  %936 = vmatpush.msrb.mxu3 %v935_v1 }
  0x6f   : > { %972 = vmatpush.msrb.mxu0 %v2158_v63  ;;  %1014 = vmatpush.msrb.mxu1 %v2063_v4 }
  0x70   : > { %1057 = vmatpush.msra.mxu2 %v2512_v35  ;;  %1124 = vmatpush.msra.mxu3 %v2010_v50  ;;  %v204_v50 = vld [vmem:[%s1738_s17 + $0x108] sm:$0xff] }
  0x71   : > { %975 = vmatpush.msrb.mxu0 %v2177_v29  ;;  %1016 = vmatpush.msrb.mxu1 %v2075_v28  ;;  %v2335_v43 = vand.u32 4294901760, %v204_v50 }
  0x72   : > { %1061 = vmatpush.msra.mxu2 %v2513_v31  ;;  %1126 = vmatpush.msra.mxu3 %v2017_v23  ;;  %v2328_v23 = vand.u32 4294901760, %v206_v42 }
  0x73   : > { %978 = vmatpush.msrb.mxu0 %v2202_v33  ;;  %1018 = vmatpush.msrb.mxu1 %v2100_v6 }
  0x74   : > { %784 = vmatmul.f32.vlgmr.msra.gmra.mxu1 %v1987_v60  ;;  %1065 = vmatpush.msra.mxu2 %v2514_v19  ;;  %v1214_v9 = vsub.f32 %v206_v42, %v2328_v23 }
  0x75   : > { %1128 = vmatpush.msra.mxu3 %v2031_v2  ;;  %981 = vmatpush.msrb.mxu0 %v2214_v40  ;;  %v2516_v2 = vand.u32 4294901760, %v2109_v48  ;;  %v1220_v48 = vsub.f32 %v204_v50, %v2335_v43 }
  0x76   : > { %1020 = vmatpush.msrb.mxu1 %v2111_v20  ;;  %761 = vmatmul.f32.gmra.mxu0 %v2086_v15  ;;  %v1215_v62 = vand.u32 4294901760, %v1214_v9 }
  0x77   : > { %1069 = vmatpush.msra.mxu2 %v2515_v58  ;;  %1130 = vmatpush.msra.mxu3 %v2041_v27  ;;  %v2517_v27 = vand.u32 4294901760, %v2132_v25  ;;  %v2519_v25 = vand.u32 4294901760, %v2177_v29 }
  0x78   : > { %984 = vmatpush.msrb.mxu0 %v2228_v59  ;;  %1022 = vmatpush.msrb.mxu1 %v2134_v22 }
  0x79   : > { %1073 = vmatpush.msra.mxu2 %v2516_v2  ;;  %1132 = vmatpush.msra.mxu3 %v2063_v4  ;;  %v2518_v4 = vand.u32 4294901760, %v2140_v56 }
  0x7a   : > { %987 = vmatpush.msrb.mxu0 %v2239_v47  ;;  %1024 = vmatpush.msrb.mxu1 %v2146_v41 }
  0x7b   : > { %829 = vmatmul.f32.vlgmr.msrb.gmra.mxu2 %v1994_v44  ;;  %1134 = vmatpush.msra.mxu3 %v2075_v28  ;;  %v1221_v44 = vand.u32 4294901760, %v1220_v48  ;;  %v1216_v28 = vsub.f32 %v1214_v9, %v1215_v62 }
  0x7c   : > { %1077 = vmatpush.msra.mxu2 %v2517_v27  ;;  %990 = vmatpush.msrb.mxu0 %v2253_v14 }
  0x7d   : > { %1026 = vmatpush.msrb.mxu1 %v2174_v52  ;;  %938 = vmatmul.f32.vlgmr.msrb.gmra.mxu3 %v1891_v26  ;;  %v1217_v63 = vand.u32 4294901760, %v1216_v28 }
  0x7e   : > { %788 = vmatmul.f32.gmra.mxu1 %v2086_v15  ;;  %1081 = vmatpush.msra.mxu2 %v2518_v4 }
  0x7f   : > { %1136 = vmatpush.msra.mxu3 %v2100_v6  ;;  %993 = vmatpush.msrb.mxu0 %v2267_v53 }
  0x80   : > { %1028 = vmatpush.msrb.mxu1 %v2188_v5  ;;  %996 = vmatmul.f32.vlgmr.msrb.gmra.mxu0 %v1919_v49  ;;  %v1222_v49 = vsub.f32 %v1220_v48, %v1221_v44 }
  0x81   : > { %1085 = vmatpush.msra.mxu2 %v891_v16  ;;  %1138 = vmatpush.msra.mxu3 %v2111_v20 }
  0x82   : > { %1030 = vmatpush.msrb.mxu1 %v2204_v39  ;;  %1179 = vmatpush.msra.mxu0 %v2328_v23 }
  0x83   : > { %1089 = vmatpush.msra.mxu2 %v2519_v25  ;;  %1140 = vmatpush.msra.mxu3 %v2134_v22 }
  0x84   : > { %1032 = vmatpush.msrb.mxu1 %v2216_v34  ;;  %837 = vmatmul.f32.gmra.mxu2 %v2051_v3  ;;  %v1223_v3 = vand.u32 4294901760, %v1222_v49 }
  0x85   : > { %1093 = vmatpush.msra.mxu2 %v903_v0  ;;  %1142 = vmatpush.msra.mxu3 %v2146_v41 }
  0x86   : > { %1034 = vmatpush.msrb.mxu1 %v2232_v36  ;;  %942 = vmatmul.f32.gmra.mxu3 %v1955_v32 }
  0x87   : > { %1097 = vmatpush.msra.mxu2 %v909_v51  ;;  %1144 = vmatpush.msra.mxu3 %v2174_v52 }
  0x88   : > { %1036 = vmatpush.msrb.mxu1 %v2248_v46  ;;  %1001 = vmatmul.f32.gmra.mxu0 %v1980_v8 }
  0x89   : > { %1040 = vmatmul.f32.vlgmr.msrb.gmra.mxu1 %v1947_v12  ;;  %1101 = vmatpush.msra.mxu2 %v915_v37  ;;  %v2520_v12 = vld [vmem:[#allocation2_spill] sm:$0xff] }
  0x8a   : > { %1146 = vmatpush.msra.mxu3 %v2188_v5  ;;  %1218 = vmatpush.msra.mxu1 %v1217_v63 }
  0x8b   : > { %1105 = vmatpush.msra.mxu2 %v921_v13  ;;  %1181 = vmatpush.msra.mxu0 %v2335_v43 }
  0x8c   : > { %1148 = vmatpush.msra.mxu3 %v2204_v39  ;;  %1224 = vmatpush.msra.mxu1 %v1223_v3 }
  0x8d   : > { %1109 = vmatpush.msra.mxu2 %v927_v10  ;;  %1250 = vmatpush.msrb.mxu0 %v1214_v9 }
  0x8e   : > { %1150 = vmatpush.msra.mxu3 %v2216_v34  ;;  %1280 = vmatpush.msrb.mxu1 %v2328_v23 }
  0x8f   : > { %1113 = vmatpush.msra.mxu2 %v933_v17  ;;  %1253 = vmatpush.msrb.mxu0 %v1220_v48 }
  0x90   : > { %1152 = vmatpush.msra.mxu3 %v2232_v36  ;;  %1115 = vmatmul.f32.vlgmr.msra.gmra.mxu2 %v1891_v26 }
  0x91   : > { %1046 = vmatmul.f32.gmra.mxu1 %v2000_v30  ;;  %1187 = vmatmul.f32.vlgmr.msra.gmra.mxu0 %v2520_v12 }
  0x92   : > { %1154 = vmatpush.msra.mxu3 %v2248_v46  ;;  %1313 = vmatpush.msrb.mxu2 %v1215_v62 }
  0x93   : > { %1156 = vmatmul.f32.vlgmr.msra.gmra.mxu3 %v1891_v26  ;;  %1282 = vmatpush.msrb.mxu1 %v2335_v43 }
  0x94   : > { %1342 = vmatpush.msrb.mxu3 %v2328_v23  ;;  %1317 = vmatpush.msrb.mxu2 %v1221_v44 }
  0x96   : > { %1344 = vmatpush.msrb.mxu3 %v2335_v43 }
  0x98   : > { %1119 = vmatmul.f32.gmra.mxu2 %v1955_v32 }
  0x99   : > { %1195 = vmatmul.f32.gmra.mxu0 %v2198_v18  ;;  %1226 = vmatmul.f32.vlgmr.msra.gmra.mxu1 %v1987_v60 }
  0x9b   : > { %1160 = vmatmul.f32.gmra.mxu3 %v1955_v32 }
  0xa0   : > { %1319 = vmatmul.f32.vlgmr.msrb.gmra.mxu2 %v1987_v60 }
  0xa1   : > { %1230 = vmatmul.f32.gmra.mxu1 %v2086_v15  ;;  %1256 = vmatmul.f32.vlgmr.msrb.gmra.mxu0 %v2008_v55 }
  0xa3   : > { %1346 = vmatmul.f32.vlgmr.msrb.gmra.mxu3 %v1987_v60 }
  0xa8   : > { %1323 = vmatmul.f32.gmra.mxu2 %v2086_v15 }
  0xa9   : > { %1261 = vmatmul.f32.gmra.mxu0 %v2120_v45  ;;  %1286 = vmatmul.f32.vlgmr.msrb.gmra.mxu1 %v2026_v24 }
  0xab   : > { %1350 = vmatmul.f32.gmra.mxu3 %v2086_v15 }
  0xb1   : > { %1292 = vmatmul.f32.gmra.mxu1 %v2144_v11 }
  0xb4   : > { %v268_v26 = vpop.f32.mrf.mxu0 }
  0xb8   : > { %v479_v6 = vpop.f32.mrf.mxu3 }
  0xb9   : > { %v377_v30 = vpop.f32.mrf.mxu1  ;;  %v435_v5 = vpop.f32.mrf.mxu2 }
  0xba   : > { %v216_v32 = vpop.permute.xlu0 %215 }
  0xbb   : > { %v269_v8 = vadd.f32 %v268_v26, %v216_v32 }
  0xbd   : > { %v378_v22 = vadd.f32 %v377_v30, %v269_v8 }
  0xbe   : > { %v276_v60 = vpop.f32.mrf.mxu0 }
  0xbf   : > { %v436_v55 = vadd.f32 %v435_v5, %v378_v22 }
  0xc0   : > { %v485_v24 = vpop.f32.mrf.mxu3 }
  0xc1   : > { %v480_v20 = vadd.f32 %v479_v6, %v436_v55  ;;  %v381_v41 = vpop.f32.mrf.mxu1  ;;  %v440_v45 = vpop.f32.mrf.mxu2 }
  0xc3   : > { %v221_v56 = vpop.permute.xlu0 %220 }
  0xc4   : > { %v277_v47 = vadd.f32 %v276_v60, %v221_v56 }
  0xc6   : > { %v382_v16 = vadd.f32 %v381_v41, %v277_v47 }
  0xc8   : > { %v441_v52 = vadd.f32 %v440_v45, %v382_v16 }
  0xc9   : > { %v626_v11 = vpop.f32.mrf.mxu2 }
  0xca   : > { %v486_v15 = vadd.f32 %v485_v24, %v441_v52 }
  0xcb   : > { %v665_v18 = vpop.f32.mrf.mxu3 }
  0xd2   : > { %v554_v29 = vpop.f32.mrf.mxu0 }
  0xd3   : > { %v555_v53 = vadd.f32 %v554_v29, %v480_v20 }
  0xd9   : > { %v634_v40 = vpop.f32.mrf.mxu2 }
  0xdc   : > { %v595_v33 = vpop.f32.mrf.mxu1  ;;  %v669_v34 = vpop.f32.mrf.mxu3 }
  0xdd   : > { %v558_v39 = vpop.f32.mrf.mxu0  ;;  %v596_v21 = vadd.f32 %v595_v33, %v555_v53 }
  0xde   : > { %v559_v54 = vadd.f32 %v558_v39, %v486_v15 }
  0xdf   : > { %v627_v38 = vadd.f32 %v626_v11, %v596_v21 }
  0xe1   : > { %v666_v35 = vadd.f32 %v665_v18, %v627_v38 }
  0xe3   : > { %v695_v36 = vpop.f32.mrf.mxu2 }
  0xe4   : > { %v696_v19 = vadd.f32 %v695_v36, %v666_v35 }
  0xe6   : > { %v725_v51 = vpop.f32.mrf.mxu3 }
  0xe7   : > { %v599_v0 = vpop.f32.mrf.mxu1  ;;  %v726_v2 = vadd.f32 %v725_v51, %v696_v19 }
  0xe8   : > { %v600_v1 = vadd.f32 %v599_v0, %v559_v54 }
  0xea   : > { %v758_v59 = vpop.f32.mrf.mxu0  ;;  %v635_v42 = vadd.f32 %v634_v40, %v600_v1 }
  0xeb   : > { %v759_v62 = vadd.f32 %v758_v59, %v726_v2 }
  0xec   : > { %v670_v58 = vadd.f32 %v669_v34, %v635_v42 }
  0xed   : > { %v700_v14 = vpop.f32.mrf.mxu2 }
  0xee   : > { %v701_v4 = vadd.f32 %v700_v14, %v670_v58 }
  0xf0   : > { %v731_v13 = vpop.f32.mrf.mxu3 }
  0xf1   : > { %v785_v46 = vpop.f32.mrf.mxu1  ;;  %v732_v63 = vadd.f32 %v731_v13, %v701_v4 }
  0xf2   : > { %v2414_v49 = vadd.f32 %v785_v46, %v759_v62 }
  0xf3   : > { %v762_v37 = vpop.f32.mrf.mxu0 }
  0xf4   : > { %v1354_v8 = vsub.f32 0.0, %v2414_v49  ;;  %v763_v22 = vadd.f32 %v762_v37, %v732_v63 }
  0xf6   : > { %v1358_v20 = vmul.f32 1.442695, %v1354_v8 }
  0xf8   : > { %1659 = vpow2.f32 %v1358_v20 }
  0xfb   : > { %v789_v17 = vpop.f32.mrf.mxu1 }
  0xfc   : > { %v2417_v55 = vadd.f32 %v789_v17, %v763_v22 }
  0xfd   : > { %v997_v10 = vpop.f32.mrf.mxu0 }
  0xfe   : > { %v830_v57 = vpop.f32.mrf.mxu2  ;;  %v1356_v47 = vsub.f32 0.0, %v2417_v55  ;;  %v1660_v39 = vpop.eup %1659 }
  0xff   : > { %v831_v50 = vadd.f32 %v830_v57, %v216_v32  ;;  %v1366_v51 = vadd.f32 1.0, %v1660_v39 }
 0x100   : > { %v939_v61 = vpop.f32.mrf.mxu3  ;;  %v1362_v29 = vmul.f32 1.442695, %v1356_v47 }
 0x101   : > { %v940_v9 = vadd.f32 %v939_v61, %v831_v50  ;;  %v1381_v63 = vand.u32 2147483648, %v1366_v51  ;;  %vm1375_vm2 = vweird.f32 %v1366_v51 }
 0x102   : > { %1661 = vpow2.f32 %v1362_v29 }
 0x103   : > { %v998_v44 = vadd.f32 %v997_v10, %v940_v9  ;;  %1663 = vrcp.f32 %v1366_v51  ;;  %v1382_v22 = vor.u32 1.1754944e-38, %v1381_v63 }
 0x105   : > { %v1002_v7 = vpop.f32.mrf.mxu0 }
 0x106   : > { %v1041_v31 = vpop.f32.mrf.mxu1 }
 0x107   : > { %v838_v23 = vpop.f32.mrf.mxu2  ;;  %v1042_v3 = vadd.f32 %v1041_v31, %v998_v44 }
 0x108   : > { %v839_v28 = vadd.f32 %v838_v23, %v221_v56  ;;  %v1662_v53 = vpop.eup %1661 }
 0x109   : > { %v943_v43 = vpop.f32.mrf.mxu3  ;;  %v2423_v38 = vadd.f32 1.0, %v1662_v53  ;;  %v1664_v35 = vpop.eup %1663 }
 0x10a   : > { %v944_v12 = vadd.f32 %v943_v43, %v839_v28  ;;  %v1371_v42 = vmul.f32 %v1664_v35, %v1366_v51  ;;  %vm1376_vm1 = vweird.f32 %v1664_v35 }
 0x10b   : > { %vm1377_vm3 = vmor %vm1375_vm2, %vm1376_vm1  ;;  %vm1405_vm10 = vweird.f32 %v2423_v38  ;;  %v1409_v29 = vand.u32 2147483647, %v2423_v38 }
 0x10c   : > { %v1003_v6 = vadd.f32 %v1002_v7, %v944_v12  ;;  %v1372_v2 = vsub.f32 1.0, %v1371_v42 }
 0x10d   : > { %vm1410_vm13 = vcmp.eq.f32.partialorder %v1409_v29, 8.507059e+37 }
 0x10e   : > { %v1047_v27 = vpop.f32.mrf.mxu1  ;;  %v1188_v48 = vpop.f32.mrf.mxu0 }
 0x10f   : > { %v1048_v56 = vadd.f32 %v1047_v27, %v1003_v6  ;;  %v1373_v27 = vmul.f32 %v1664_v35, %v1372_v2 }
 0x111   : > { %v1374_v28 = vadd.f32 %v1664_v35, %v1373_v27 }
 0x113   : > { %v1116_v25 = vpop.f32.mrf.mxu2 }
 0x114   : > { %v1117_v5 = vadd.f32 %v1116_v25, %v1042_v3  ;;  %v1379_v3 = vand.u32 2147483647, %v1366_v51 }
 0x116   : > { %v1157_v26 = vpop.f32.mrf.mxu3  ;;  %v1196_v30 = vpop.f32.mrf.mxu0  ;;  %vm1380_vm5 = vcmp.eq.f32.partialorder %v1379_v3, 8.507059e+37 }
 0x117   : > { %v1227_v32 = vpop.f32.mrf.mxu1  ;;  %v1158_v60 = vadd.f32 %v1157_v26, %v1117_v5 }
 0x119   : > { %v1189_v24 = vadd.f32 %v1188_v48, %v1158_v60 }
 0x11b   : > { %v1120_v41 = vpop.f32.mrf.mxu2  ;;  %v1228_v11 = vadd.f32 %v1227_v32, %v1189_v24  ;;  %v1378_v32 = vsel %vm1377_vm3, %v1664_v35, %v1374_v28 }
 0x11c   : > { %v1121_v52 = vadd.f32 %v1120_v41, %v1048_v56  ;;  %v1383_v60 = vsel %vm1380_vm5, %v1382_v22, %v1378_v32 }
 0x11e   : > { %v1161_v45 = vpop.f32.mrf.mxu3  ;;  %v1257_v15 = vpop.f32.mrf.mxu0 }
 0x11f   : > { %v1231_v16 = vpop.f32.mrf.mxu1  ;;  %v1162_v18 = vadd.f32 %v1161_v45, %v1121_v52  ;;  %v1258_v40 = vadd.f32 %v1257_v15, %v1228_v11  ;;  %v2433_v52 = vmul.f32 %v1383_v60, %v2414_v49 }
 0x121   : > { %v1197_v59 = vadd.f32 %v1196_v30, %v1162_v18 }
 0x123   : > { %v1320_v33 = vpop.f32.mrf.mxu2  ;;  %v1232_v14 = vadd.f32 %v1231_v16, %v1197_v59  ;;  %v1411_v16 = vand.u32 2147483648, %v2423_v38 }
 0x126   : > { %v1347_v0 = vpop.f32.mrf.mxu3  ;;  %v1262_v46 = vpop.f32.mrf.mxu0 }
 0x127   : > { %v1287_v34 = vpop.f32.mrf.mxu1  ;;  %v1263_v10 = vadd.f32 %v1262_v46, %v1232_v14 }
 0x128   : > { %v1288_v36 = vadd.f32 %v1287_v34, %v1258_v40 }
 0x12a   : > { %v1321_v37 = vadd.f32 %v1320_v33, %v1288_v36 }
 0x12b   : > { %v1324_v57 = vpop.f32.mrf.mxu2 }
 0x12c   : > { %v2420_v13 = vadd.f32 %v1347_v0, %v1321_v37  ;;  %v1412_v0 = vor.u32 1.1754944e-38, %v1411_v16 }
 0x12e   : > { %v1355_v21 = vsub.f32 0.0, %v2420_v13  ;;  %v1351_v1 = vpop.f32.mrf.mxu3 }
 0x12f   : > { %v1293_v17 = vpop.f32.mrf.mxu1 }
 0x130   : > { %v1360_v54 = vmul.f32 1.442695, %v1355_v21  ;;  %v1294_v61 = vadd.f32 %v1293_v17, %v1263_v10 }
 0x132   : > { %1665 = vpow2.f32 %v1360_v54  ;;  %v1325_v7 = vadd.f32 %v1324_v57, %v1294_v61 }
 0x133   : > { %1667 = vrcp.f32 %v2423_v38 }
 0x134   : > { %v2426_v31 = vadd.f32 %v1351_v1, %v1325_v7 }
 0x136   : > { %v1357_v19 = vsub.f32 0.0, %v2426_v31 }
 0x138   : > { %v1666_v50 = vpop.eup %1665  ;;  %v1364_v23 = vmul.f32 1.442695, %v1357_v19 }
 0x139   : > { %v1367_v58 = vadd.f32 1.0, %v1666_v50  ;;  %v1668_v43 = vpop.eup %1667 }
 0x13a   : > { %1669 = vpow2.f32 %v1364_v23  ;;  %v1401_v9 = vmul.f32 %v1668_v43, %v2423_v38  ;;  %vm1406_vm7 = vweird.f32 %v1668_v43 }
 0x13b   : > { %1671 = vrcp.f32 %v1367_v58  ;;  %v1396_v30 = vand.u32 2147483648, %v1367_v58  ;;  %v1394_v5 = vand.u32 2147483647, %v1367_v58  ;;  %vm1390_vm6 = vweird.f32 %v1367_v58  ;;  %vm2435_vm11 = vmor %vm1405_vm10, %vm1406_vm7 }
 0x13c   : > { %v1402_v62 = vsub.f32 1.0, %v1401_v9 }
 0x13d   : > { %v1397_v56 = vor.u32 1.1754944e-38, %v1396_v30  ;;  %vm1395_vm9 = vcmp.eq.f32.partialorder %v1394_v5, 8.507059e+37 }
 0x13e   : > { %v1403_v26 = vmul.f32 %v1668_v43, %v1402_v62 }
 0x140   : > { %v1670_v48 = vpop.eup %1669  ;;  %v1404_v41 = vadd.f32 %v1668_v43, %v1403_v26 }
 0x141   : > { %v1672_v4 = vpop.eup %1671  ;;  %v1369_v44 = vadd.f32 1.0, %v1670_v48 }
 0x142   : > { %v1386_v25 = vmul.f32 %v1672_v4, %v1367_v58  ;;  %vm1391_vm4 = vweird.f32 %v1672_v4  ;;  %v1408_v33 = vsel %vm2435_vm11, %v1668_v43, %v1404_v41 }
 0x143   : > { %1673 = vrcp.f32 %v1369_v44  ;;  %vm1392_vm8 = vmor %vm1390_vm6, %vm1391_vm4  ;;  %v1426_v39 = vand.u32 2147483648, %v1369_v44  ;;  %v1424_v34 = vand.u32 2147483647, %v1369_v44  ;;  %vm1420_vm14 = vweird.f32 %v1369_v44 }
 0x144   : > { %v1387_v12 = vsub.f32 1.0, %v1386_v25  ;;  %v1413_v36 = vsel %vm1410_vm13, %v1412_v0, %v1408_v33 }
 0x145   : > { %v1427_v51 = vor.u32 1.1754944e-38, %v1426_v39  ;;  %vm1425_vm0 = vcmp.eq.f32.partialorder %v1424_v34, 8.507059e+37  ;;  %v2448_v14 = vmul.f32 %v1413_v36, %v2417_v55 }
 0x146   : > { %v1388_v8 = vmul.f32 %v1672_v4, %v1387_v12 }
 0x148   : > { %v1389_v6 = vadd.f32 %v1672_v4, %v1388_v8 }
 0x149   : > { %v1674_v20 = vpop.eup %1673 }
 0x14a   : > { %v1393_v47 = vsel %vm1392_vm8, %v1672_v4, %v1389_v6  ;;  %v1416_v45 = vmul.f32 %v1674_v20, %v1369_v44  ;;  %vm1421_vm12 = vweird.f32 %v1674_v20 }
 0x14b   : > { %v1398_v24 = vsel %vm1395_vm9, %v1397_v56, %v1393_v47  ;;  %vm1422_vm15 = vmor %vm1420_vm14, %vm1421_vm12 }
 0x14c   : > { %v2441_v11 = vmul.f32 %v1398_v24, %v2420_v13  ;;  %v1417_v18 = vsub.f32 1.0, %v1416_v45 }
 0x14e   : > { %v1418_v40 = vmul.f32 %v1674_v20, %v1417_v18  ;;  %v1434_v49 = vadd.f32 %v2441_v11, %v2433_v52 }
 0x150   : > { %v1419_v59 = vadd.f32 %v1674_v20, %v1418_v40  ;;  %1435 = vadd.xlane.f32.xlu1 %v1434_v49 }
 0x152   : > { %v1423_v37 = vsel %vm1422_vm15, %v1674_v20, %v1419_v59 }
 0x153   : > { %v1428_v46 = vsel %vm1425_vm0, %v1427_v51, %v1423_v37 }
 0x154   : > { %v2451_v13 = vmul.f32 %v1428_v46, %v2426_v31 }
 0x156   : > { %v1437_v53 = vadd.f32 %v2451_v13, %v2448_v14 }
 0x158   : > { %1438 = vadd.xlane.f32.xlu1 %v1437_v53 }
 0x1c3   : > { %v1436_v10 = vpop.xlane.xlu1 %1435 }
 0x1c4   : > { %v1440_v21 = vmul.f32 0.00390625, %v1436_v10 }
 0x1c6   : > { %v1442_v17 = vsub.f32 %v2433_v52, %v1440_v21  ;;  %v1443_v57 = vsub.f32 %v2441_v11, %v1440_v21 }
 0x1c8   : > { %v1446_v38 = vmul.f32 %v1442_v17, %v1442_v17  ;;  %v1447_v54 = vmul.f32 %v1443_v57, %v1443_v57 }
 0x1ca   : > { %v1450_v61 = vadd.f32 %v1447_v54, %v1446_v38 }
 0x1cb   : > { %v1439_v1 = vpop.xlane.xlu1 %1438 }
 0x1cc   : > { %v1441_v7 = vmul.f32 0.00390625, %v1439_v1  ;;  %1451 = vadd.xlane.f32.xlu2 %v1450_v61 }
 0x1ce   : > { %v1444_v55 = vsub.f32 %v2448_v14, %v1441_v7  ;;  %v1445_v35 = vsub.f32 %v2451_v13, %v1441_v7 }
 0x1d0   : > { %v1448_v31 = vmul.f32 %v1444_v55, %v1444_v55  ;;  %v1449_v42 = vmul.f32 %v1445_v35, %v1445_v35 }
 0x1d2   : > { %v1453_v19 = vadd.f32 %v1449_v42, %v1448_v31 }
 0x1d4   : > { %1454 = vadd.xlane.f32.xlu2 %v1453_v19 }
 0x23f   : > { %v1452_v50 = vpop.xlane.xlu2 %1451 }
 0x240   : > { %v1456_v23 = vmul.f32 0.003921569, %v1452_v50 }
 0x242   : > { %v1458_v58 = vadd.f32 0.0001, %v1456_v23 }
 0x244   : > { %v1460_v43 = vmul.f32 4.0, %v1458_v58 }
 0x246   : > { %1675 = vrcp.f32 %v1460_v43  ;;  %v1473_v28 = vand.u32 2147483648, %v1460_v43  ;;  %v1471_v63 = vand.u32 2147483647, %v1460_v43  ;;  %vm1467_vm2 = vweird.f32 %v1460_v43 }
 0x247   : > { %v1455_v2 = vpop.xlane.xlu2 %1454 }
 0x248   : > { %v1457_v9 = vmul.f32 0.003921569, %v1455_v2  ;;  %v1474_v26 = vor.u32 1.1754944e-38, %v1473_v28  ;;  %vm1472_vm4 = vcmp.eq.f32.partialorder %v1471_v63, 8.507059e+37 }
 0x24a   : > { %v1459_v27 = vadd.f32 0.0001, %v1457_v9 }
 0x24c   : > { %v1676_v48 = vpop.eup %1675  ;;  %v1461_v4 = vmul.f32 4.0, %v1459_v27 }
 0x24d   : > { %v1463_v62 = vmul.f32 %v1676_v48, %v1460_v43  ;;  %vm1468_vm1 = vweird.f32 %v1676_v48 }
 0x24e   : > { %1677 = vrcp.f32 %v1461_v4  ;;  %vm1469_vm3 = vmor %vm1467_vm2, %vm1468_vm1  ;;  %v1485_v20 = vand.u32 2147483647, %v1461_v4  ;;  %v1487_v60 = vand.u32 2147483648, %v1461_v4  ;;  %vm1481_vm6 = vweird.f32 %v1461_v4 }
 0x24f   : > { %v1464_v44 = vsub.f32 1.0, %v1463_v62 }
 0x250   : > { %v1488_v15 = vor.u32 1.1754944e-38, %v1487_v60  ;;  %vm1486_vm8 = vcmp.eq.f32.partialorder %v1485_v20, 8.507059e+37 }
 0x251   : > { %v1465_v25 = vmul.f32 %v1676_v48, %v1464_v44 }
 0x253   : > { %v1466_v3 = vadd.f32 %v1676_v48, %v1465_v25 }
 0x254   : > { %v1678_v12 = vpop.eup %1677 }
 0x255   : > { %v1470_v30 = vsel %vm1469_vm3, %v1676_v48, %v1466_v3  ;;  %v1477_v32 = vmul.f32 %v1678_v12, %v1461_v4  ;;  %vm1482_vm5 = vweird.f32 %v1678_v12 }
 0x256   : > { %v1475_v8 = vsel %vm1472_vm4, %v1474_v26, %v1470_v30  ;;  %vm1483_vm7 = vmor %vm1481_vm6, %vm1482_vm5 }
 0x257   : > { %v1490_v5 = vmul.f32 %v1475_v8, %v1446_v38  ;;  %v1491_v22 = vmul.f32 %v1475_v8, %v1447_v54  ;;  %v1478_v6 = vsub.f32 1.0, %v1477_v32 }
 0x259   : > { %v1494_v41 = vadd.f32 0.5, %v1490_v5  ;;  %v1495_v56 = vadd.f32 0.5, %v1491_v22  ;;  %v1479_v47 = vmul.f32 %v1678_v12, %v1478_v6 }
 0x25b   : > { %v1498_v45 = vsub.f32 0.0, %v1494_v41  ;;  %v1499_v16 = vsub.f32 0.0, %v1495_v56  ;;  %v1480_v24 = vadd.f32 %v1678_v12, %v1479_v47 }
 0x25d   : > { %v1502_v29 = vmul.f32 1.442695, %v1498_v45  ;;  %v1504_v18 = vmul.f32 1.442695, %v1499_v16  ;;  %v1484_v33 = vsel %vm1483_vm7, %v1678_v12, %v1480_v24 }
 0x25e   : > { %v1489_v39 = vsel %vm1486_vm8, %v1488_v15, %v1484_v33 }
 0x25f   : > { %1679 = vpow2.f32 %v1502_v29  ;;  %v1492_v40 = vmul.f32 %v1489_v39, %v1448_v31  ;;  %v1493_v34 = vmul.f32 %v1489_v39, %v1449_v42 }
 0x260   : > { %1681 = vpow2.f32 %v1504_v18 }
 0x261   : > { %v1496_v49 = vadd.f32 0.5, %v1492_v40  ;;  %v1497_v0 = vadd.f32 0.5, %v1493_v34 }
 0x263   : > { %v1500_v59 = vsub.f32 0.0, %v1496_v49  ;;  %v1501_v36 = vsub.f32 0.0, %v1497_v0 }
 0x265   : > { %v1680_v51 = vpop.eup %1679  ;;  %v1506_v37 = vmul.f32 1.442695, %v1500_v59  ;;  %v1508_v10 = vmul.f32 1.442695, %v1501_v36 }
 0x266   : > { %v1682_v46 = vpop.eup %1681  ;;  %v1510_v53 = vadd.f32 1.0, %v1680_v51 }
 0x267   : > { %v1511_v21 = vadd.f32 1.0, %v1682_v46  ;;  %1683 = vpow2.f32 %v1506_v37 }
 0x268   : > { %1685 = vrcp.f32 %v1510_v53  ;;  %v1523_v31 = vand.u32 2147483647, %v1510_v53  ;;  %v1525_v42 = vand.u32 2147483648, %v1510_v53  ;;  %vm1519_vm11 = vweird.f32 %v1510_v53 }
 0x269   : > { %1687 = vrcp.f32 %v1511_v21  ;;  %v1540_v23 = vand.u32 2147483648, %v1511_v21  ;;  %v1538_v43 = vand.u32 2147483647, %v1511_v21  ;;  %vm1534_vm13 = vweird.f32 %v1511_v21 }
 0x26a   : > { %1689 = vpow2.f32 %v1508_v10  ;;  %v1526_v27 = vor.u32 1.1754944e-38, %v1525_v42  ;;  %vm1524_vm14 = vcmp.eq.f32.partialorder %v1523_v31, 8.507059e+37 }
 0x26b   : > { %v1541_v62 = vor.u32 1.1754944e-38, %v1540_v23  ;;  %vm1539_vm0 = vcmp.eq.f32.partialorder %v1538_v43, 8.507059e+37 }
 0x26d   : > { %v1684_v17 = vpop.eup %1683 }
 0x26e   : > { %v1686_v57 = vpop.eup %1685  ;;  %v1512_v38 = vadd.f32 1.0, %v1684_v17 }
 0x26f   : > { %v1688_v54 = vpop.eup %1687  ;;  %v1515_v61 = vmul.f32 %v1686_v57, %v1510_v53  ;;  %vm1520_vm9 = vweird.f32 %v1686_v57 }
 0x270   : > { %v1690_v1 = vpop.eup %1689  ;;  %v1530_v7 = vmul.f32 %v1688_v54, %v1511_v21  ;;  %1691 = vrcp.f32 %v1512_v38  ;;  %vm1535_vm10 = vweird.f32 %v1688_v54  ;;  %vm1521_vm12 = vmor %vm1519_vm11, %vm1520_vm9  ;;  %v1555_v32 = vand.u32 2147483648, %v1512_v38 }
 0x271   : > { %v1516_v55 = vsub.f32 1.0, %v1515_v61  ;;  %v1513_v35 = vadd.f32 1.0, %v1690_v1  ;;  %vm1536_vm15 = vmor %vm1534_vm13, %vm1535_vm10  ;;  %v1553_v22 = vand.u32 2147483647, %v1512_v38  ;;  %vm1549_vm2 = vweird.f32 %v1512_v38 }
 0x272   : > { %v1531_v19 = vsub.f32 1.0, %v1530_v7  ;;  %v1556_v41 = vor.u32 1.1754944e-38, %v1555_v32 }
 0x273   : > { %v1517_v50 = vmul.f32 %v1686_v57, %v1516_v55  ;;  %1693 = vrcp.f32 %v1513_v35  ;;  %v1570_v60 = vand.u32 2147483648, %v1513_v35  ;;  %vm1554_vm5 = vcmp.eq.f32.partialorder %v1553_v22, 8.507059e+37 }
 0x274   : > { %v1532_v58 = vmul.f32 %v1688_v54, %v1531_v19  ;;  %vm1564_vm6 = vweird.f32 %v1513_v35 }
 0x275   : > { %v1518_v2 = vadd.f32 %v1686_v57, %v1517_v50  ;;  %v1571_v16 = vor.u32 1.1754944e-38, %v1570_v60 }
 0x276   : > { %v1692_v9 = vpop.eup %1691  ;;  %v1533_v48 = vadd.f32 %v1688_v54, %v1532_v58 }
 0x277   : > { %v1522_v4 = vsel %vm1521_vm12, %v1686_v57, %v1518_v2  ;;  %v1545_v44 = vmul.f32 %v1692_v9, %v1512_v38  ;;  %vm1550_vm1 = vweird.f32 %v1692_v9 }
 0x278   : > { %v1527_v28 = vsel %vm1524_vm14, %v1526_v27, %v1522_v4  ;;  %v1537_v25 = vsel %vm1536_vm15, %v1688_v54, %v1533_v48  ;;  %vm1551_vm3 = vmor %vm1549_vm2, %vm1550_vm1 }
 0x279   : > { %v1694_v63 = vpop.eup %1693  ;;  %v1542_v3 = vsel %vm1539_vm0, %v1541_v62, %v1537_v25  ;;  %v1574_v12 = vmul.f32 %v1527_v28, %v2433_v52  ;;  %v1546_v26 = vsub.f32 1.0, %v1545_v44  ;;  %v1568_v52 = vand.u32 2147483647, %v1513_v35 }
 0x27a   : > { %v1575_v30 = vmul.f32 %v1542_v3, %v2441_v11  ;;  %v1560_v8 = vmul.f32 %v1694_v63, %v1513_v35  ;;  %vm1565_vm4 = vweird.f32 %v1694_v63 }
 0x27b   : > { %1578 = vst [vmem:[%s2463_s6] sm:$0xff] %v1574_v12  ;;  %v1547_v5 = vmul.f32 %v1692_v9, %v1546_v26  ;;  %vm1566_vm7 = vmor %vm1564_vm6, %vm1565_vm4  ;;  %vm1569_vm8 = vcmp.eq.f32.partialorder %v1568_v52, 8.507059e+37 }
 0x27c   : > { %1579 = vst [vmem:[%s2463_s6 + $0x8] sm:$0xff] %v1575_v30  ;;  %v1561_v6 = vsub.f32 1.0, %v1560_v8 }
 0x27d   : > { %v1548_v20 = vadd.f32 %v1692_v9, %v1547_v5 }
 0x27e   : > { %v1562_v56 = vmul.f32 %v1694_v63, %v1561_v6 }
 0x27f   : > { %v1552_v47 = vsel %vm1551_vm3, %v1692_v9, %v1548_v20 }
 0x280   : > { %v1557_v11 = vsel %vm1554_vm5, %v1556_v41, %v1552_v47  ;;  %v1563_v45 = vadd.f32 %v1694_v63, %v1562_v56 }
 0x281   : > { %v1576_v24 = vmul.f32 %v1557_v11, %v2448_v14 }
 0x282   : > { %v1567_v15 = vsel %vm1566_vm7, %v1694_v63, %v1563_v45 }
 0x283   : > { %v1572_v29 = vsel %vm1569_vm8, %v1571_v16, %v1567_v15  ;;  %1580 = vst [vmem:[%s2463_s6 + $0x10] sm:$0xff] %v1576_v24 }
 0x284   : > { %v1577_v18 = vmul.f32 %v1572_v29, %v2451_v13 }
 0x286   : > { %1581 = vst [vmem:[%s2463_s6 + $0x18] sm:$0xff] %v1577_v18 }
 0x287 PF: > { %s13_s12 = sadd.s32 1, %s1701_s12  }
 0x288   : > { %p10_p4 = scmp.ge.s32.totalorder %s13_s12, 4  }
 0x28a   :  { %12 = sbr.rel (!%p10_p4) target bundleno = 1 (0x1), region = 62 }

// kernel: c2f_attention_forward.7
= control target key start
LH: loop header
LB: loop body
LE: loop exit
PB: predicated region body
PF: predicated region fallthrough
CT: control target
= control target key end

     0   :  { %s1716_s18 = smov 0   ;;  %s2116_s0 = inlined_call_operand.vmem [shape: f32[2,32,256], index: 0, kind: input, shape index: {}]   ;;  %s2117_s1 = inlined_call_operand.vmem [shape: f32[2,16,256], index: 1, kind: input, shape index: {}]   ;;  %s2118_s2 = inlined_call_operand.vmem [shape: f32[32,32], index: 2, kind: input, shape index: {}]   ;;  %s2119_s3 = inlined_call_operand.vmem [shape: f32[32,16], index: 3, kind: input, shape index: {}]   ;;  %s2120_s4 = inlined_call_operand.vmem [shape: f32[32,1], index: 4, kind: input, shape index: {}]   ;;  %s2121_s5 = inlined_call_operand.vmem [shape: f32[2,32,256], index: 5, kind: output, shape index: {}]  }
   0x1 LB: > { %s1618_s19 = sadd.s32 4294967295, %s1683_s18   ;;  %p1622_p0 = scmp.ge.s32.totalorder %s1683_s18, 1  ;;  %s1683_s18 = sphi %s1716_s18, %s15_s18  }
   0x2   : > { %p197_p1 = scmp.lt.s32.totalorder %s1683_s18, 3 }
   0x4   : > { %p198_p2 = pnand %p1622_p0, %p197_p1 }
   0x5   : > { %p230_p3 = scmp.lt.s32.totalorder (!%p198_p2), %s1618_s19, 1 }
   0x6   : > { %201 = sbr.rel (%p198_p2) target bundleno = 379 (0x17b), region = 40 }
   0xb   : > { %v257_v0 = vld [vmem:[%s2119_s3] sm:$0xff]  ;;  %vm265_vm0 = vcmask 130048   ;;  %v258_v1 = vld [vmem:[%s2119_s3 + $0x8] sm:$0xff]  ;;  %s2123_s19 = smov (!%p230_p3, %s1618_s19), 1  ;;  %v259_v6 = vld [vmem:[%s2119_s3 + $0x10] sm:$0xff]  ;;  %vm782_vm1 = vcmask 261120  }
   0xc   : > { %v267_v2 = vsel %vm265_vm0, %v257_v0, 0  ;;  %v270_v3 = vsel %vm265_vm0, %v258_v1, 0  ;;  %s1632_s26 = sshll.u32 %s2123_s19, 5  ;;  %v273_v9 = vsel %vm265_vm0, %v259_v6, 0  ;;  %v260_v27 = vld [vmem:[%s2119_s3 + $0x18] sm:$0xff]  ;;  %s1631_s7 = sshll.u32 %s2123_s19, 6 }
   0xd   : > { %v1734_v4 = vand.u32 4294901760, %v267_v2  ;;  %v1736_v5 = vand.u32 4294901760, %v270_v3  ;;  %s239_s29 = scalar_lea.vmem %s2117_s1, %s1632_s26  ;;  %v1760_v20 = vand.u32 4294901760, %v273_v9  ;;  %v276_v37 = vsel %vm265_vm0, %v260_v27, 0  ;;  %s1806_s10 = scalar_lea.vmem %s2116_s0, %s1631_s7  ;;  %v246_v27 = vld [vmem:[%s2118_s2 + $0x8] sm:$0xff] }
   0xe   : > { %v263_v10 = vld [vmem:[%s239_s29 + $0x10] sm:$0xff]  ;;  %v261_v11 = vld [vmem:[%s239_s29] sm:$0xff]  ;;  %v264_v13 = vld [vmem:[%s239_s29 + $0x18] sm:$0xff]  ;;  %v1779_v45 = vand.u32 4294901760, %v276_v37  ;;  %s2058_s6 = scalar_lea.vmem %s2121_s5, %s1631_s7 }
   0xf   : > { %v1743_v7 = vsub.f32 %v267_v2, %v1734_v4  ;;  %v1746_v8 = vsub.f32 %v270_v3, %v1736_v5  ;;  %v292_v14 = vand.u32 4294901760, %v263_v10  ;;  %v294_v15 = vand.u32 4294901760, %v261_v11  ;;  %v262_v17 = vld [vmem:[%s239_s29 + $0x8] sm:$0xff]  ;;  %v255_v52 = vld [vmem:[%s1806_s10 + $0x30] sm:$0xff]  ;;  %v253_v57 = vld [vmem:[%s1806_s10 + $0x20] sm:$0xff] }
  0x10   : > { %v544_v16 = vand.u32 4294901760, %v264_v13  ;;  %v546_v21 = vand.u32 4294901760, %v262_v17  ;;  %v1771_v32 = vsub.f32 %v273_v9, %v1760_v20  ;;  %v1785_v47 = vsub.f32 %v276_v37, %v1779_v45  ;;  %v251_v63 = vld [vmem:[%s1806_s10 + $0x10] sm:$0xff]  ;;  %v249_v9 = vld [vmem:[%s1806_s10] sm:$0xff] }
  0x11   : > { %v1753_v12 = vand.u32 4294901760, %v1743_v7  ;;  %v1758_v19 = vand.u32 4294901760, %v1746_v8  ;;  %293 = vmatpush.msra.mxu0 %v292_v14  ;;  %v344_v22 = vsub.f32 %v263_v10, %v292_v14  ;;  %v350_v23 = vsub.f32 %v261_v11, %v294_v15  ;;  %428 = vmatpush.msra.mxu3 %v292_v14 }
  0x12   : > { %v596_v24 = vsub.f32 %v264_v13, %v544_v16  ;;  %v602_v26 = vsub.f32 %v262_v17, %v546_v21  ;;  %v1777_v43 = vand.u32 4294901760, %v1771_v32  ;;  %v1790_v49 = vand.u32 4294901760, %v1785_v47 }
  0x13   : > { %v299_v18 = vsub.f32 %v1743_v7, %v1753_v12  ;;  %295 = vmatpush.msra.mxu0 %v294_v15  ;;  %388 = vmatpush.msra.mxu2 %v344_v22  ;;  %v345_v28 = vand.u32 4294901760, %v344_v22  ;;  %v351_v30 = vand.u32 4294901760, %v350_v23  ;;  %v307_v31 = vsub.f32 %v1746_v8, %v1758_v19 }
  0x14   : > { %v597_v29 = vand.u32 4294901760, %v596_v24  ;;  %430 = vmatpush.msra.mxu3 %v294_v15  ;;  %v603_v33 = vand.u32 4294901760, %v602_v26  ;;  %v315_v46 = vsub.f32 %v1771_v32, %v1777_v43  ;;  %v323_v50 = vsub.f32 %v1785_v47, %v1790_v49 }
  0x15   : > { %v1762_v25 = vand.u32 4294901760, %v299_v18  ;;  %391 = vmatpush.msra.mxu2 %v350_v23  ;;  %434 = vmatmul.f32.vlgmr.msra.gmra.mxu3 %v1753_v12  ;;  %v346_v34 = vsub.f32 %v344_v22, %v345_v28  ;;  %v352_v36 = vsub.f32 %v350_v23, %v351_v30  ;;  %v308_v42 = vand.u32 4294901760, %v307_v31  ;;  %v252_v31 = vld [vmem:[%s1806_s10 + $0x18] sm:$0xff] }
  0x16   : > { %v598_v35 = vsub.f32 %v596_v24, %v597_v29  ;;  %394 = vmatmul.f32.vlgmr.msra.gmra.mxu2 %v1743_v7  ;;  %473 = vmatpush.msrb.mxu0 %v345_v28  ;;  %v604_v38 = vsub.f32 %v602_v26, %v603_v33  ;;  %v316_v48 = vand.u32 4294901760, %v315_v46  ;;  %v324_v51 = vand.u32 4294901760, %v323_v50 }
  0x17   : > { %301 = vmatmul.f32.vlgmr.msra.gmra.mxu0 %v1762_v25  ;;  %545 = vmatpush.msrb.mxu2 %v544_v16  ;;  %v347_v39 = vand.u32 4294901760, %v346_v34  ;;  %v353_v41 = vand.u32 4294901760, %v352_v36  ;;  %v1813_v53 = vand.u32 4294901760, %v255_v52  ;;  %v1822_v58 = vand.u32 4294901760, %v253_v57  ;;  %v247_v36 = vld [vmem:[%s2118_s2 + $0x10] sm:$0xff] }
  0x18   : > { %v599_v40 = vand.u32 4294901760, %v598_v35  ;;  %477 = vmatpush.msrb.mxu0 %v351_v30  ;;  %v605_v44 = vand.u32 4294901760, %v604_v38  ;;  %v811_v0 = vand.u32 4294901760, %v251_v63  ;;  %v813_v10 = vand.u32 4294901760, %v249_v9 }
  0x19   : > { %348 = vmatpush.msra.mxu1 %v347_v39  ;;  %547 = vmatpush.msrb.mxu2 %v546_v21  ;;  %v861_v54 = vsub.f32 %v255_v52, %v1813_v53  ;;  %v867_v60 = vsub.f32 %v253_v57, %v1822_v58  ;;  %v1089_v34 = vand.u32 4294901760, %v252_v31  ;;  %v250_v39 = vld [vmem:[%s1806_s10 + $0x8] sm:$0xff] }
  0x1a   : > { %600 = vmatpush.msrb.mxu3 %v599_v40  ;;  %640 = vmatpush.msra.mxu0 %v596_v24  ;;  %v873_v2 = vsub.f32 %v251_v63, %v811_v0  ;;  %v879_v13 = vsub.f32 %v249_v9, %v813_v10  ;;  %v254_v24 = vld [vmem:[%s1806_s10 + $0x28] sm:$0xff]  ;;  %v790_v40 = vsel %vm782_vm1, %v247_v36, 0  ;;  %v1351_v63 = vld [vmem:[%s2120_s4] sm:$0xff] }
  0x1b   : > { %354 = vmatpush.msra.mxu1 %v353_v41  ;;  %725 = vmatpush.msra.mxu2 %v597_v29  ;;  %v862_v55 = vand.u32 4294901760, %v861_v54  ;;  %v868_v61 = vand.u32 4294901760, %v867_v60  ;;  %v787_v29 = vsel %vm782_vm1, %v246_v27, 0 }
  0x1c   : > { %606 = vmatpush.msrb.mxu3 %v605_v44  ;;  %356 = vmatmul.f32.vlgmr.msra.gmra.mxu1 %v1734_v4  ;;  %v874_v3 = vand.u32 4294901760, %v873_v2 }
  0x1d   : > { %510 = vmatpush.msrb.mxu1 %v292_v14  ;;  %440 = vmatmul.f32.gmra.mxu3 %v1758_v19  ;;  %v863_v56 = vsub.f32 %v861_v54, %v862_v55  ;;  %v869_v62 = vsub.f32 %v867_v60, %v868_v61  ;;  %v880_v14 = vand.u32 4294901760, %v879_v13 }
  0x1e   : > { %399 = vmatmul.f32.gmra.mxu2 %v1746_v8  ;;  %762 = vmatpush.msra.mxu3 %v544_v16  ;;  %v875_v6 = vsub.f32 %v873_v2, %v874_v3 }
  0x1f   : > { %309 = vmatmul.f32.gmra.mxu0 %v308_v42  ;;  %512 = vmatpush.msrb.mxu1 %v294_v15  ;;  %v864_v59 = vand.u32 4294901760, %v863_v56  ;;  %v870_v1 = vand.u32 4294901760, %v869_v62  ;;  %v881_v15 = vsub.f32 %v879_v13, %v880_v14 }
  0x20   : > { %643 = vmatpush.msra.mxu0 %v602_v26  ;;  %729 = vmatpush.msra.mxu2 %v603_v33  ;;  %v876_v11 = vand.u32 4294901760, %v875_v6  ;;  %v1860_v26 = vand.u32 4294901760, %v254_v24  ;;  %v1353_v6 = vld [vmem:[%s2120_s4 + $0x10] sm:$0xff] }
  0x21   : > { %680 = vmatpush.msra.mxu1 %v544_v16  ;;  %764 = vmatpush.msra.mxu3 %v546_v21  ;;  %v256_v16 = vld [vmem:[%s1806_s10 + $0x38] sm:$0xff]  ;;  %v882_v18 = vand.u32 4294901760, %v881_v15 }
  0x22   : > { %v1840_v17 = vand.u32 4294901760, %v256_v16 }
  0x23   : > { %682 = vmatpush.msra.mxu1 %v546_v21 }
  0x24   : > { %360 = vmatmul.f32.gmra.mxu1 %v1736_v5  ;;  %v1844_v21 = vsub.f32 %v256_v16, %v1840_v17 }
  0x25   : > { %446 = vmatmul.f32.gmra.mxu3 %v1777_v43 }
  0x26   : > { %404 = vmatmul.f32.gmra.mxu2 %v1771_v32 }
  0x27   : > { %317 = vmatmul.f32.gmra.mxu0 %v316_v48 }
  0x2c   : > { %364 = vmatmul.f32.gmra.mxu1 %v1760_v20 }
  0x2d   : > { %452 = vmatmul.f32.gmra.mxu3 %v1790_v49 }
  0x2e   : > { %409 = vmatmul.f32.gmra.mxu2 %v1785_v47 }
  0x2f   : > { %325 = vmatmul.f32.gmra.mxu0 %v324_v51 }
  0x34   : > { %368 = vmatmul.f32.gmra.mxu1 %v1779_v45 }
  0x35   : > { %608 = vmatmul.f32.vlgmr.msrb.gmra.mxu3 %v1734_v4 }
  0x36   : > { %553 = vmatmul.f32.vlgmr.msrb.gmra.mxu2 %v1762_v25  ;;  %959 = vmatpush.msrb.mxu3 %v1813_v53 }
  0x37   : > { %479 = vmatmul.f32.vlgmr.msrb.gmra.mxu0 %v1734_v4  ;;  %915 = vmatpush.msrb.mxu2 %v861_v54 }
  0x38   : > { %808 = vmatpush.msrb.mxu0 %v1813_v53  ;;  %961 = vmatpush.msrb.mxu3 %v1822_v58 }
  0x39   : > { %918 = vmatpush.msrb.mxu2 %v867_v60 }
  0x3a   : > { %810 = vmatpush.msrb.mxu0 %v1822_v58  ;;  %963 = vmatpush.msrb.mxu3 %v811_v0 }
  0x3b   : > { %921 = vmatpush.msrb.mxu2 %v873_v2  ;;  %v1352_v2 = vld [vmem:[%s2120_s4 + $0x8] sm:$0xff] }
  0x3c   : > { %514 = vmatmul.f32.vlgmr.msrb.gmra.mxu1 %v1734_v4  ;;  %812 = vmatpush.msrb.mxu0 %v811_v0 }
  0x3d   : > { %612 = vmatmul.f32.gmra.mxu3 %v1736_v5  ;;  %865 = vmatpush.msrb.mxu1 %v864_v59 }
  0x3e   : > { %561 = vmatmul.f32.gmra.mxu2 %v308_v42  ;;  %814 = vmatpush.msrb.mxu0 %v813_v10  ;;  %v1091_v42 = vand.u32 4294901760, %v250_v39 }
  0x3f   : > { %483 = vmatmul.f32.gmra.mxu0 %v1736_v5  ;;  %871 = vmatpush.msrb.mxu1 %v870_v1 }
  0x40   : > { %965 = vmatpush.msrb.mxu3 %v813_v10  ;;  %924 = vmatpush.msrb.mxu2 %v879_v13  ;;  %v1157_v46 = vsub.f32 %v250_v39, %v1091_v42 }
  0x41   : > { %877 = vmatpush.msrb.mxu1 %v876_v11 }
  0x42   : > { %v1158_v50 = vand.u32 4294901760, %v1157_v46 }
  0x43   : > { %883 = vmatpush.msrb.mxu1 %v882_v18 }
  0x44   : > { %518 = vmatmul.f32.gmra.mxu1 %v1736_v5  ;;  %v1159_v52 = vsub.f32 %v1157_v46, %v1158_v50 }
  0x45   : > { %616 = vmatmul.f32.gmra.mxu3 %v1760_v20 }
  0x46   : > { %569 = vmatmul.f32.gmra.mxu2 %v316_v48  ;;  %v1903_v48 = vand.u32 4294901760, %v790_v40 }
  0x47   : > { %487 = vmatmul.f32.gmra.mxu0 %v1760_v20 }
  0x4c   : > { %522 = vmatmul.f32.gmra.mxu1 %v1760_v20 }
  0x4d   : > { %620 = vmatmul.f32.gmra.mxu3 %v1779_v45 }
  0x4e   : > { %577 = vmatmul.f32.gmra.mxu2 %v324_v51  ;;  %v248_v51 = vld [vmem:[%s2118_s2 + $0x18] sm:$0xff] }
  0x4f   : > { %491 = vmatmul.f32.gmra.mxu0 %v1779_v45  ;;  %v793_v54 = vsel %vm782_vm1, %v248_v51, 0 }
  0x50   : > { %v1924_v57 = vand.u32 4294901760, %v793_v54 }
  0x52   : > { %v1932_v59 = vsub.f32 %v793_v54, %v1924_v57 }
  0x54   : > { %526 = vmatmul.f32.gmra.mxu1 %v1779_v45 }
  0x55   : > { %766 = vmatmul.f32.vlgmr.msra.gmra.mxu3 %v1734_v4 }
  0x56   : > { %731 = vmatmul.f32.vlgmr.msra.gmra.mxu2 %v1734_v4  ;;  %v1140_v4 = vand.u32 4294901760, %v1844_v21 }
  0x57   : > { %646 = vmatmul.f32.vlgmr.msra.gmra.mxu0 %v1743_v7  ;;  %1086 = vmatpush.msra.mxu2 %v1840_v17  ;;  %v245_v7 = vld [vmem:[%s2118_s2] sm:$0xff] }
  0x58   : > { %1006 = vmatpush.msra.mxu0 %v862_v55  ;;  %v784_v22 = vsel %vm782_vm1, %v245_v7, 0  ;;  %v1141_v23 = vsub.f32 %v1844_v21, %v1140_v4  ;;  %v1160_v55 = vand.u32 4294901760, %v1159_v52 }
  0x59   : > { %1088 = vmatpush.msra.mxu2 %v1860_v26 }
  0x5a   : > { %1010 = vmatpush.msra.mxu0 %v868_v61  ;;  %v1142_v25 = vand.u32 4294901760, %v1141_v23  ;;  %v1939_v61 = vand.u32 4294901760, %v1932_v59 }
  0x5b   : > { %1090 = vmatpush.msra.mxu2 %v1089_v34 }
  0x5c   : > { %1014 = vmatpush.msra.mxu0 %v874_v3  ;;  %686 = vmatmul.f32.vlgmr.msra.gmra.mxu1 %v1753_v12  ;;  %v1145_v12 = vsub.f32 %v254_v24, %v1860_v26  ;;  %v842_v62 = vsub.f32 %v1932_v59, %v1939_v61 }
  0x5d   : > { %770 = vmatmul.f32.gmra.mxu3 %v1736_v5  ;;  %1049 = vmatpush.msra.mxu1 %v1813_v53  ;;  %v1913_v53 = vsub.f32 %v790_v40, %v1903_v48 }
  0x5e   : > { %1018 = vmatpush.msra.mxu0 %v880_v14  ;;  %735 = vmatmul.f32.gmra.mxu2 %v1736_v5  ;;  %v1146_v5 = vand.u32 4294901760, %v1145_v12  ;;  %v843_v1 = vand.u32 4294901760, %v842_v62 }
  0x5f   : > { %651 = vmatmul.f32.gmra.mxu0 %v1746_v8  ;;  %1051 = vmatpush.msra.mxu1 %v1822_v58  ;;  %v1863_v8 = vand.u32 4294901760, %v784_v22  ;;  %v1922_v56 = vand.u32 4294901760, %v1913_v53 }
  0x60   : > { %1143 = vmatpush.msra.mxu3 %v1142_v25  ;;  %v1147_v30 = vsub.f32 %v1145_v12, %v1146_v5  ;;  %1092 = vmatpush.msra.mxu2 %v1091_v42 }
  0x61   : > { %1053 = vmatpush.msra.mxu1 %v811_v0  ;;  %v1873_v28 = vsub.f32 %v784_v22, %v1863_v8  ;;  %v834_v58 = vsub.f32 %v1913_v53, %v1922_v56  ;;  %v1685_v0 = vmov 0  }
  0x62   : > { %v1148_v33 = vand.u32 4294901760, %v1147_v30  ;;  %1643 = vset.pattern.permute.xlu0 %v1685_v0  ;;  %1644 = vset.pattern.permute.xlu1 %v1685_v0 }
  0x63   : > { %1055 = vmatpush.msra.mxu1 %v813_v10  ;;  %v1880_v35 = vand.u32 4294901760, %v1873_v28  ;;  %v835_v60 = vand.u32 4294901760, %v834_v58  ;;  %1357 = vperm.xlu0 %1643, %v1351_v63  }
  0x64   : > { %692 = vmatmul.f32.gmra.mxu1 %v1758_v19  ;;  %1149 = vmatpush.msra.mxu3 %v1148_v33  ;;  %v1151_v19 = vsub.f32 %v252_v31, %v1089_v34 }
  0x65   : > { %774 = vmatmul.f32.gmra.mxu3 %v1760_v20  ;;  %1367 = vperm.xlu1 %1644, %v1353_v6  }
  0x66   : > { %739 = vmatmul.f32.gmra.mxu2 %v1760_v20  ;;  %v1152_v37 = vand.u32 4294901760, %v1151_v19  ;;  %v818_v20 = vsub.f32 %v1873_v28, %v1880_v35 }
  0x67   : > { %656 = vmatmul.f32.gmra.mxu0 %v1771_v32  ;;  %v1882_v32 = vand.u32 4294901760, %v787_v29 }
  0x68   : > { %v1153_v41 = vsub.f32 %v1151_v19, %v1152_v37 }
  0x69   : > { %v1892_v38 = vsub.f32 %v787_v29, %v1882_v32 }
  0x6a   : > { %v1154_v44 = vand.u32 4294901760, %v1153_v41 }
  0x6b   : > { %1362 = vperm.xlu0 %1643, %v1352_v2  }
  0x6c   : > { %698 = vmatmul.f32.gmra.mxu1 %v1777_v43  ;;  %v1901_v43 = vand.u32 4294901760, %v1892_v38  ;;  %1155 = vmatpush.msra.mxu3 %v1154_v44 }
  0x6d   : > { %778 = vmatmul.f32.gmra.mxu3 %v1779_v45 }
  0x6e   : > { %743 = vmatmul.f32.gmra.mxu2 %v1779_v45  ;;  %v826_v45 = vsub.f32 %v1892_v38, %v1901_v43  ;;  %1161 = vmatpush.msra.mxu3 %v1160_v55 }
  0x6f   : > { %661 = vmatmul.f32.gmra.mxu0 %v1785_v47  ;;  %v1898_v47 = vand.u32 4294901760, %v818_v20 }
  0x74   : > { %704 = vmatmul.f32.gmra.mxu1 %v1790_v49  ;;  %v827_v49 = vand.u32 4294901760, %v826_v45 }
  0x75   : > { %969 = vmatmul.f32.vlgmr.msrb.gmra.mxu3 %v1880_v35 }
  0x76   : > { %927 = vmatmul.f32.vlgmr.msrb.gmra.mxu2 %v1873_v28  ;;  %1327 = vmatpush.msrb.mxu3 %v1840_v17 }
  0x77   : > { %820 = vmatmul.f32.vlgmr.msrb.gmra.mxu0 %v1898_v47  ;;  %1284 = vmatpush.msrb.mxu2 %v1140_v4 }
  0x78   : > { %1193 = vmatpush.msrb.mxu0 %v1844_v21  ;;  %1329 = vmatpush.msrb.mxu3 %v1860_v26 }
  0x79   : > { %1288 = vmatpush.msrb.mxu2 %v1146_v5 }
  0x7a   : > { %1196 = vmatpush.msrb.mxu0 %v1145_v12  ;;  %1331 = vmatpush.msrb.mxu3 %v1089_v34 }
  0x7b   : > { %1292 = vmatpush.msrb.mxu2 %v1152_v37 }
  0x7c   : > { %1199 = vmatpush.msrb.mxu0 %v1151_v19  ;;  %885 = vmatmul.f32.vlgmr.msrb.gmra.mxu1 %v1863_v8 }
  0x7d   : > { %975 = vmatmul.f32.gmra.mxu3 %v1901_v43  ;;  %1237 = vmatpush.msrb.mxu1 %v1840_v17  ;;  %v1354_v17 = vld [vmem:[%s2120_s4 + $0x18] sm:$0xff] }
  0x7e   : > { %932 = vmatmul.f32.gmra.mxu2 %v1892_v38  ;;  %1202 = vmatpush.msrb.mxu0 %v1157_v46 }
  0x7f   : > { %828 = vmatmul.f32.gmra.mxu0 %v827_v49  ;;  %1239 = vmatpush.msrb.mxu1 %v1860_v26 }
  0x80   : > { %1296 = vmatpush.msrb.mxu2 %v1158_v50  ;;  %1333 = vmatpush.msrb.mxu3 %v1091_v42 }
  0x81   : > { %1241 = vmatpush.msrb.mxu1 %v1089_v34  ;;  %1372 = vperm.xlu1 %1644, %v1354_v17  }
  0x83   : > { %1243 = vmatpush.msrb.mxu1 %v1091_v42 }
  0x84   : > { %889 = vmatmul.f32.gmra.mxu1 %v1882_v32 }
  0x85   : > { %981 = vmatmul.f32.gmra.mxu3 %v1922_v56 }
  0x86   : > { %937 = vmatmul.f32.gmra.mxu2 %v1913_v53 }
  0x87   : > { %836 = vmatmul.f32.gmra.mxu0 %v835_v60 }
  0x8c   : > { %893 = vmatmul.f32.gmra.mxu1 %v1903_v48 }
  0x8d   : > { %987 = vmatmul.f32.gmra.mxu3 %v1939_v61 }
  0x8e   : > { %942 = vmatmul.f32.gmra.mxu2 %v1932_v59 }
  0x8f   : > { %844 = vmatmul.f32.gmra.mxu0 %v843_v1 }
  0x94   : > { %v302_v3 = vpop.f32.mrf.mxu0  ;;  %897 = vmatmul.f32.gmra.mxu1 %v1924_v57 }
  0x95   : > { %1163 = vmatmul.f32.vlgmr.msra.gmra.mxu3 %v1863_v8 }
  0x96   : > { %1098 = vmatmul.f32.vlgmr.msra.gmra.mxu2 %v1898_v47 }
  0x97   : > { %1020 = vmatmul.f32.vlgmr.msra.gmra.mxu0 %v1863_v8 }
  0x98   : > { %v435_v9 = vpop.f32.mrf.mxu3 }
  0x99   : > { %v357_v11 = vpop.f32.mrf.mxu1  ;;  %v395_v14 = vpop.f32.mrf.mxu2 }
  0x9a   : > { %v358_v13 = vadd.f32 %v357_v11, %v302_v3 }
  0x9c   : > { %v310_v10 = vpop.f32.mrf.mxu0  ;;  %v396_v15 = vadd.f32 %v395_v14, %v358_v13  ;;  %1057 = vmatmul.f32.vlgmr.msra.gmra.mxu1 %v1863_v8 }
  0x9d   : > { %1167 = vmatmul.f32.gmra.mxu3 %v1882_v32 }
  0x9e   : > { %v436_v16 = vadd.f32 %v435_v9, %v396_v15  ;;  %1106 = vmatmul.f32.gmra.mxu2 %v827_v49 }
  0x9f   : > { %1024 = vmatmul.f32.gmra.mxu0 %v1882_v32 }
  0xa0   : > { %v441_v18 = vpop.f32.mrf.mxu3 }
  0xa1   : > { %v361_v7 = vpop.f32.mrf.mxu1  ;;  %v400_v22 = vpop.f32.mrf.mxu2 }
  0xa2   : > { %v362_v4 = vadd.f32 %v361_v7, %v310_v10 }
  0xa4   : > { %v318_v21 = vpop.f32.mrf.mxu0  ;;  %v401_v23 = vadd.f32 %v400_v22, %v362_v4  ;;  %1061 = vmatmul.f32.gmra.mxu1 %v1882_v32 }
  0xa5   : > { %1171 = vmatmul.f32.gmra.mxu3 %v1903_v48 }
  0xa6   : > { %v442_v24 = vadd.f32 %v441_v18, %v401_v23  ;;  %1114 = vmatmul.f32.gmra.mxu2 %v835_v60 }
  0xa7   : > { %1028 = vmatmul.f32.gmra.mxu0 %v1903_v48 }
  0xa8   : > { %v447_v25 = vpop.f32.mrf.mxu3 }
  0xa9   : > { %v365_v12 = vpop.f32.mrf.mxu1  ;;  %v405_v5 = vpop.f32.mrf.mxu2 }
  0xaa   : > { %v366_v27 = vadd.f32 %v365_v12, %v318_v21 }
  0xac   : > { %v326_v26 = vpop.f32.mrf.mxu0  ;;  %v406_v29 = vadd.f32 %v405_v5, %v366_v27  ;;  %1065 = vmatmul.f32.gmra.mxu1 %v1903_v48 }
  0xad   : > { %1175 = vmatmul.f32.gmra.mxu3 %v1924_v57 }
  0xae   : > { %v448_v30 = vadd.f32 %v447_v25, %v406_v29  ;;  %1122 = vmatmul.f32.gmra.mxu2 %v843_v1 }
  0xaf   : > { %1032 = vmatmul.f32.gmra.mxu0 %v1924_v57 }
  0xb0   : > { %v453_v31 = vpop.f32.mrf.mxu3 }
  0xb1   : > { %v369_v33 = vpop.f32.mrf.mxu1  ;;  %v410_v36 = vpop.f32.mrf.mxu2 }
  0xb2   : > { %v370_v19 = vadd.f32 %v369_v33, %v326_v26 }
  0xb4   : > { %v480_v34 = vpop.f32.mrf.mxu0  ;;  %v411_v20 = vadd.f32 %v410_v36, %v370_v19  ;;  %1069 = vmatmul.f32.gmra.mxu1 %v1924_v57 }
  0xb5   : > { %v481_v37 = vadd.f32 %v480_v34, %v436_v16  ;;  %1335 = vmatmul.f32.vlgmr.msrb.gmra.mxu3 %v1863_v8 }
  0xb6   : > { %v454_v39 = vadd.f32 %v453_v31, %v411_v20  ;;  %1298 = vmatmul.f32.vlgmr.msrb.gmra.mxu2 %v1863_v8 }
  0xb7   : > { %1205 = vmatmul.f32.vlgmr.msrb.gmra.mxu0 %v1873_v28 }
  0xb8   : > { %v609_v40 = vpop.f32.mrf.mxu3 }
  0xb9   : > { %v515_v42 = vpop.f32.mrf.mxu1  ;;  %v554_v47 = vpop.f32.mrf.mxu2 }
  0xba   : > { %v1978_v46 = vadd.f32 %v515_v42, %v481_v37  ;;  %v610_v50 = vadd.f32 %v609_v40, %v554_v47 }
  0xbc   : > { %v484_v41 = vpop.f32.mrf.mxu0  ;;  %1247 = vmatmul.f32.vlgmr.msrb.gmra.mxu1 %v1880_v35 }
  0xbd   : > { %v485_v44 = vadd.f32 %v484_v41, %v442_v24  ;;  %1339 = vmatmul.f32.gmra.mxu3 %v1882_v32 }
  0xbe   : > { %1302 = vmatmul.f32.gmra.mxu2 %v1882_v32 }
  0xbf   : > { %1210 = vmatmul.f32.gmra.mxu0 %v1892_v38 }
  0xc0   : > { %v613_v28 = vpop.f32.mrf.mxu3 }
  0xc1   : > { %v519_v52 = vpop.f32.mrf.mxu1  ;;  %v562_v54 = vpop.f32.mrf.mxu2 }
  0xc2   : > { %v1984_v45 = vadd.f32 %v519_v52, %v485_v44  ;;  %v614_v55 = vadd.f32 %v613_v28, %v562_v54 }
  0xc4   : > { %v488_v51 = vpop.f32.mrf.mxu0  ;;  %1253 = vmatmul.f32.gmra.mxu1 %v1901_v43 }
  0xc5   : > { %v489_v8 = vadd.f32 %v488_v51, %v448_v30  ;;  %1343 = vmatmul.f32.gmra.mxu3 %v1903_v48 }
  0xc6   : > { %1306 = vmatmul.f32.gmra.mxu2 %v1903_v48 }
  0xc7   : > { %1215 = vmatmul.f32.gmra.mxu0 %v1913_v53 }
  0xc8   : > { %v617_v35 = vpop.f32.mrf.mxu3 }
  0xc9   : > { %v523_v49 = vpop.f32.mrf.mxu1  ;;  %v570_v60 = vpop.f32.mrf.mxu2 }
  0xca   : > { %v1990_v58 = vadd.f32 %v523_v49, %v489_v8  ;;  %v618_v62 = vadd.f32 %v617_v35, %v570_v60 }
  0xcc   : > { %v492_v38 = vpop.f32.mrf.mxu0  ;;  %1259 = vmatmul.f32.gmra.mxu1 %v1922_v56 }
  0xcd   : > { %v493_v32 = vadd.f32 %v492_v38, %v454_v39  ;;  %1347 = vmatmul.f32.gmra.mxu3 %v1924_v57 }
  0xce   : > { %1310 = vmatmul.f32.gmra.mxu2 %v1924_v57 }
  0xcf   : > { %1220 = vmatmul.f32.gmra.mxu0 %v1932_v59 }
  0xd0   : > { %v621_v43 = vpop.f32.mrf.mxu3 }
  0xd1   : > { %v527_v53 = vpop.f32.mrf.mxu1  ;;  %v578_v0 = vpop.f32.mrf.mxu2 }
  0xd2   : > { %v1996_v48 = vadd.f32 %v527_v53, %v493_v32  ;;  %v622_v2 = vadd.f32 %v621_v43, %v578_v0 }
  0xd4   : > { %v647_v63 = vpop.f32.mrf.mxu0  ;;  %1265 = vmatmul.f32.gmra.mxu1 %v1939_v61 }
  0xd5   : > { %v648_v1 = vadd.f32 %v647_v63, %v610_v50 }
  0xd8   : > { %v767_v3 = vpop.f32.mrf.mxu3 }
  0xd9   : > { %v687_v9 = vpop.f32.mrf.mxu1  ;;  %v732_v56 = vpop.f32.mrf.mxu2 }
  0xda   : > { %v688_v10 = vadd.f32 %v687_v9, %v648_v1 }
  0xdc   : > { %v652_v6 = vpop.f32.mrf.mxu0  ;;  %v733_v11 = vadd.f32 %v732_v56, %v688_v10 }
  0xdd   : > { %v653_v59 = vadd.f32 %v652_v6, %v614_v55 }
  0xde   : > { %v1999_v13 = vadd.f32 %v767_v3, %v733_v11 }
  0xe0   : > { %v771_v57 = vpop.f32.mrf.mxu3 }
  0xe1   : > { %v693_v15 = vpop.f32.mrf.mxu1  ;;  %v736_v18 = vpop.f32.mrf.mxu2 }
  0xe2   : > { %v694_v17 = vadd.f32 %v693_v15, %v653_v59 }
  0xe4   : > { %v657_v14 = vpop.f32.mrf.mxu0  ;;  %v737_v21 = vadd.f32 %v736_v18, %v694_v17 }
  0xe5   : > { %v658_v16 = vadd.f32 %v657_v14, %v618_v62  ;;  %v2009_v62 = vpop.permute.xlu0 %1357 }
  0xe6   : > { %v2001_v7 = vadd.f32 %v771_v57, %v737_v21 }
  0xe8   : > { %v775_v4 = vpop.f32.mrf.mxu3 }
  0xe9   : > { %v699_v22 = vpop.f32.mrf.mxu1  ;;  %v740_v25 = vpop.f32.mrf.mxu2 }
  0xea   : > { %v700_v24 = vadd.f32 %v699_v22, %v658_v16 }
  0xec   : > { %v662_v61 = vpop.f32.mrf.mxu0  ;;  %v741_v26 = vadd.f32 %v740_v25, %v700_v24 }
  0xed   : > { %v663_v23 = vadd.f32 %v662_v61, %v622_v2  ;;  %v2018_v11 = vpop.permute.xlu0 %1362 }
  0xee   : > { %v2003_v12 = vadd.f32 %v775_v4, %v741_v26 }
  0xf0   : > { %v779_v27 = vpop.f32.mrf.mxu3 }
  0xf1   : > { %v705_v5 = vpop.f32.mrf.mxu1  ;;  %v744_v31 = vpop.f32.mrf.mxu2 }
  0xf2   : > { %v706_v30 = vadd.f32 %v705_v5, %v663_v23  ;;  %v2029_v23 = vpop.permute.xlu1 %1367 }
  0xf4   : > { %v821_v29 = vpop.f32.mrf.mxu0  ;;  %v745_v33 = vadd.f32 %v744_v31, %v706_v30 }
  0xf5   : > { %v822_v51 = vadd.f32 %v821_v29, %v1978_v46 }
  0xf6   : > { %v2005_v34 = vadd.f32 %v779_v27, %v745_v33 }
  0xf8   : > { %v970_v19 = vpop.f32.mrf.mxu3 }
  0xf9   : > { %v886_v37 = vpop.f32.mrf.mxu1  ;;  %v928_v20 = vpop.f32.mrf.mxu2 }
  0xfa   : > { %v887_v52 = vadd.f32 %v886_v37, %v822_v51 }
  0xfc   : > { %v829_v36 = vpop.f32.mrf.mxu0  ;;  %v929_v35 = vadd.f32 %v928_v20, %v887_v52 }
  0xfd   : > { %v830_v49 = vadd.f32 %v829_v36, %v1984_v45 }
  0xfe   : > { %v971_v32 = vadd.f32 %v970_v19, %v929_v35 }
 0x100   : > { %v976_v39 = vpop.f32.mrf.mxu3 }
 0x101   : > { %v890_v41 = vpop.f32.mrf.mxu1  ;;  %v933_v42 = vpop.f32.mrf.mxu2 }
 0x102   : > { %v891_v60 = vadd.f32 %v890_v41, %v830_v49  ;;  %v2039_v41 = vpop.permute.xlu1 %1372 }
 0x104   : > { %v837_v40 = vpop.f32.mrf.mxu0  ;;  %v934_v1 = vadd.f32 %v933_v42, %v891_v60 }
 0x105   : > { %v838_v3 = vadd.f32 %v837_v40, %v1990_v58 }
 0x106   : > { %v977_v9 = vadd.f32 %v976_v39, %v934_v1 }
 0x108   : > { %v982_v44 = vpop.f32.mrf.mxu3 }
 0x109   : > { %v894_v50 = vpop.f32.mrf.mxu1  ;;  %v938_v28 = vpop.f32.mrf.mxu2 }
 0x10a   : > { %v895_v59 = vadd.f32 %v894_v50, %v838_v3 }
 0x10c   : > { %v845_v47 = vpop.f32.mrf.mxu0  ;;  %v939_v16 = vadd.f32 %v938_v28, %v895_v59 }
 0x10d   : > { %v846_v58 = vadd.f32 %v845_v47, %v1996_v48 }
 0x10e   : > { %v983_v4 = vadd.f32 %v982_v44, %v939_v16 }
 0x110   : > { %v988_v8 = vpop.f32.mrf.mxu3 }
 0x111   : > { %v898_v54 = vpop.f32.mrf.mxu1  ;;  %v943_v38 = vpop.f32.mrf.mxu2 }
 0x112   : > { %v899_v61 = vadd.f32 %v898_v54, %v846_v58 }
 0x114   : > { %v1021_v55 = vpop.f32.mrf.mxu0  ;;  %v944_v31 = vadd.f32 %v943_v38, %v899_v61 }
 0x115   : > { %v1022_v43 = vadd.f32 %v1021_v55, %v971_v32 }
 0x116   : > { %v989_v36 = vadd.f32 %v988_v8, %v944_v31 }
 0x118   : > { %v2011_v53 = vpop.f32.mrf.mxu3 }
 0x119   : > { %v1058_v0 = vpop.f32.mrf.mxu1  ;;  %v1099_v46 = vpop.f32.mrf.mxu2 }
 0x11a   : > { %v1059_v2 = vadd.f32 %v1058_v0, %v1022_v43  ;;  %v1100_v35 = vadd.f32 %v1099_v46, %v1999_v13 }
 0x11c   : > { %v1025_v63 = vpop.f32.mrf.mxu0  ;;  %v2015_v6 = vadd.f32 %v2009_v62, %v1059_v2 }
 0x11d   : > { %v1026_v10 = vadd.f32 %v1025_v63, %v977_v9  ;;  %v1165_v9 = vadd.f32 %v2011_v53, %v1100_v35 }
 0x11e   : > { %v1383_v45 = vsub.f32 0.0, %v2015_v6 }
 0x120   : > { %v1391_v56 = vmul.f32 1.442695, %v1383_v45  ;;  %v2020_v57 = vpop.f32.mrf.mxu3 }
 0x121   : > { %v1062_v15 = vpop.f32.mrf.mxu1  ;;  %v2022_v18 = vpop.f32.mrf.mxu2 }
 0x122   : > { %1645 = vpow2.f32 %v1391_v56  ;;  %v1063_v17 = vadd.f32 %v1062_v15, %v1026_v10 }
 0x124   : > { %v1029_v14 = vpop.f32.mrf.mxu0  ;;  %v2026_v21 = vadd.f32 %v2018_v11, %v1063_v17  ;;  %v1108_v17 = vadd.f32 %v2022_v18, %v2001_v7 }
 0x125   : > { %v1030_v25 = vadd.f32 %v1029_v14, %v983_v4 }
 0x126   : > { %v1385_v22 = vsub.f32 0.0, %v2026_v21 }
 0x128   : > { %v1646_v24 = vpop.eup %1645  ;;  %v1395_v26 = vmul.f32 1.442695, %v1385_v22  ;;  %v2031_v27 = vpop.f32.mrf.mxu3 }
 0x129   : > { %v1407_v5 = vadd.f32 1.0, %v1646_v24  ;;  %v1066_v30 = vpop.f32.mrf.mxu1  ;;  %v2033_v33 = vpop.f32.mrf.mxu2 }
 0x12a   : > { %1647 = vpow2.f32 %v1395_v26  ;;  %v1067_v48 = vadd.f32 %v1066_v30, %v1030_v25 }
 0x12b   : > { %1649 = vrcp.f32 %v1407_v5  ;;  %v1426_v38 = vand.u32 2147483648, %v1407_v5  ;;  %v1424_v32 = vand.u32 2147483647, %v1407_v5  ;;  %vm1420_vm3 = vweird.f32 %v1407_v5 }
 0x12c   : > { %v1033_v29 = vpop.f32.mrf.mxu0  ;;  %v2036_v19 = vadd.f32 %v2029_v23, %v1067_v48 }
 0x12d   : > { %v1034_v39 = vadd.f32 %v1033_v29, %v989_v36  ;;  %v1427_v3 = vor.u32 1.1754944e-38, %v1426_v38  ;;  %vm1425_vm5 = vcmp.eq.f32.partialorder %v1424_v32, 8.507059e+37 }
 0x12e   : > { %v1387_v37 = vsub.f32 0.0, %v2036_v19 }
 0x130   : > { %v1648_v20 = vpop.eup %1647  ;;  %v1399_v40 = vmul.f32 1.442695, %v1387_v37  ;;  %v2041_v42 = vpop.f32.mrf.mxu3 }
 0x131   : > { %v1650_v44 = vpop.eup %1649  ;;  %v1409_v47 = vadd.f32 1.0, %v1648_v20  ;;  %v1070_v50 = vpop.f32.mrf.mxu1 }
 0x132   : > { %v1416_v51 = vmul.f32 %v1650_v44, %v1407_v5  ;;  %1651 = vpow2.f32 %v1399_v40  ;;  %v1071_v52 = vadd.f32 %v1070_v50, %v1034_v39  ;;  %v2043_v54 = vpop.f32.mrf.mxu2  ;;  %vm1421_vm2 = vweird.f32 %v1650_v44 }
 0x133   : > { %1653 = vrcp.f32 %v1409_v47  ;;  %vm1422_vm4 = vmor %vm1420_vm3, %vm1421_vm2  ;;  %v1456_v58 = vand.u32 2147483648, %v1409_v47  ;;  %v1454_v22 = vand.u32 2147483647, %v1409_v47  ;;  %vm1450_vm7 = vweird.f32 %v1409_v47 }
 0x134   : > { %v1206_v28 = vpop.f32.mrf.mxu0  ;;  %v1417_v8 = vsub.f32 1.0, %v1416_v51  ;;  %v2046_v55 = vadd.f32 %v2039_v41, %v1071_v52  ;;  %v1116_v39 = vadd.f32 %v2033_v33, %v2003_v12  ;;  %v1124_v32 = vadd.f32 %v2043_v54, %v2005_v34 }
 0x135   : > { %v1207_v53 = vadd.f32 %v1206_v28, %v1165_v9  ;;  %v1457_v30 = vor.u32 1.1754944e-38, %v1456_v58  ;;  %vm1455_vm9 = vcmp.eq.f32.partialorder %v1454_v22, 8.507059e+37 }
 0x136   : > { %v1418_v49 = vmul.f32 %v1650_v44, %v1417_v8  ;;  %v1389_v60 = vsub.f32 0.0, %v2046_v55  ;;  %v1173_v33 = vadd.f32 %v2031_v27, %v1116_v39 }
 0x138   : > { %v1652_v43 = vpop.eup %1651  ;;  %v1419_v63 = vadd.f32 %v1650_v44, %v1418_v49  ;;  %v1403_v0 = vmul.f32 1.442695, %v1389_v60  ;;  %v1336_v1 = vpop.f32.mrf.mxu3 }
 0x139   : > { %v1654_v2 = vpop.eup %1653  ;;  %v2051_v59 = vadd.f32 1.0, %v1652_v43  ;;  %v1248_v46 = vpop.f32.mrf.mxu1 }
 0x13a   : > { %v1423_v45 = vsel %vm1422_vm4, %v1650_v44, %v1419_v63  ;;  %v1446_v10 = vmul.f32 %v1654_v2, %v1409_v47  ;;  %1655 = vpow2.f32 %v1403_v0  ;;  %v1299_v56 = vpop.f32.mrf.mxu2  ;;  %v1249_v4 = vadd.f32 %v1248_v46, %v1207_v53 }
 0x13b   : > { %v1428_v14 = vsel %vm1425_vm5, %v1427_v3, %v1423_v45  ;;  %1657 = vrcp.f32 %v2051_v59  ;;  %vm1451_vm6 = vweird.f32 %v1654_v2  ;;  %v1486_v28 = vand.u32 2147483648, %v2051_v59 }
 0x13c   : > { %v1211_v13 = vpop.f32.mrf.mxu0  ;;  %v1535_v15 = vmul.f32 %v1428_v14, %v2015_v6  ;;  %v1447_v16 = vsub.f32 1.0, %v1446_v10  ;;  %v1300_v24 = vadd.f32 %v1299_v56, %v1249_v4  ;;  %vm1452_vm8 = vmor %vm1450_vm7, %vm1451_vm6  ;;  %v1169_v6 = vadd.f32 %v2020_v57, %v1108_v17 }
 0x13d   : > { %v1484_v8 = vand.u32 2147483647, %v2051_v59  ;;  %vm1480_vm11 = vweird.f32 %v2051_v59  ;;  %v1177_v53 = vadd.f32 %v2041_v42, %v1124_v32 }
 0x13e   : > { %1543 = vst [vmem:[%s2058_s6] sm:$0xff] %v1535_v15  ;;  %v1448_v61 = vmul.f32 %v1654_v2, %v1447_v16  ;;  %v1337_v48 = vadd.f32 %v1336_v1, %v1300_v24  ;;  %v1212_v40 = vadd.f32 %v1211_v13, %v1169_v6 }
 0x13f   : > { %vm1485_vm13 = vcmp.eq.f32.partialorder %v1484_v8, 8.507059e+37 }
 0x140   : > { %v1656_v25 = vpop.eup %1655  ;;  %v1449_v26 = vadd.f32 %v1654_v2, %v1448_v61  ;;  %v1340_v5 = vpop.f32.mrf.mxu3  ;;  %v2074_v50 = vadd.f32 %v2009_v62, %v1337_v48  ;;  %v1487_v62 = vor.u32 1.1754944e-38, %v1486_v28 }
 0x141   : > { %v1658_v29 = vpop.eup %1657  ;;  %v2066_v31 = vadd.f32 1.0, %v1656_v25  ;;  %v1254_v7 = vpop.f32.mrf.mxu1 }
 0x142   : > { %v1453_v18 = vsel %vm1452_vm8, %v1654_v2, %v1449_v26  ;;  %v1476_v36 = vmul.f32 %v1658_v29, %v2051_v59  ;;  %v1303_v37 = vpop.f32.mrf.mxu2  ;;  %v1255_v51 = vadd.f32 %v1254_v7, %v1212_v40  ;;  %vm1481_vm10 = vweird.f32 %v1658_v29 }
 0x143   : > { %v1458_v20 = vsel %vm1455_vm9, %v1457_v30, %v1453_v18  ;;  %1659 = vrcp.f32 %v2066_v31  ;;  %v1384_v12 = vsub.f32 0.0, %v2074_v50  ;;  %vm1482_vm12 = vmor %vm1480_vm11, %vm1481_vm10  ;;  %v1516_v34 = vand.u32 2147483648, %v2066_v31 }
 0x144   : > { %v1216_v44 = vpop.f32.mrf.mxu0  ;;  %v1537_v57 = vmul.f32 %v1458_v20, %v2026_v21  ;;  %v1477_v47 = vsub.f32 1.0, %v1476_v36  ;;  %v1304_v35 = vadd.f32 %v1303_v37, %v1255_v51  ;;  %v1514_v14 = vand.u32 2147483647, %v2066_v31 }
 0x145   : > { %v1393_v21 = vmul.f32 1.442695, %v1384_v12  ;;  %v1217_v60 = vadd.f32 %v1216_v44, %v1173_v33  ;;  %vm1510_vm15 = vweird.f32 %v2066_v31  ;;  %v1517_v58 = vor.u32 1.1754944e-38, %v1516_v34 }
 0x146   : > { %1545 = vst [vmem:[%s2058_s6 + $0x10] sm:$0xff] %v1537_v57  ;;  %v1478_v52 = vmul.f32 %v1658_v29, %v1477_v47  ;;  %v1341_v43 = vadd.f32 %v1340_v5, %v1304_v35  ;;  %vm1515_vm1 = vcmp.eq.f32.partialorder %v1514_v14, 8.507059e+37 }
 0x147   : > { %1661 = vpow2.f32 %v1393_v21 }
 0x148   : > { %v1479_v38 = vadd.f32 %v1658_v29, %v1478_v52  ;;  %v1344_v0 = vpop.f32.mrf.mxu3  ;;  %v2086_v9 = vadd.f32 %v2018_v11, %v1341_v43 }
 0x149   : > { %v1660_v49 = vpop.eup %1659  ;;  %v1260_v63 = vpop.f32.mrf.mxu1 }
 0x14a   : > { %v1483_v1 = vsel %vm1482_vm12, %v1658_v29, %v1479_v38  ;;  %v1506_v27 = vmul.f32 %v1660_v49, %v2066_v31  ;;  %v1307_v2 = vpop.f32.mrf.mxu2  ;;  %v1261_v59 = vadd.f32 %v1260_v63, %v1217_v60  ;;  %v1386_v54 = vsub.f32 0.0, %v2086_v9 }
 0x14b   : > { %v1488_v3 = vsel %vm1485_vm13, %v1487_v62, %v1483_v1  ;;  %vm1511_vm14 = vweird.f32 %v1660_v49 }
 0x14c   : > { %v1539_v13 = vmul.f32 %v1488_v3, %v2036_v19  ;;  %v1507_v46 = vsub.f32 1.0, %v1506_v27  ;;  %v1221_v45 = vpop.f32.mrf.mxu0  ;;  %v1308_v10 = vadd.f32 %v1307_v2, %v1261_v59  ;;  %v1397_v15 = vmul.f32 1.442695, %v1386_v54  ;;  %vm1512_vm0 = vmor %vm1510_vm15, %vm1511_vm14 }
 0x14d   : > { %v1662_v16 = vpop.eup %1661  ;;  %v1222_v19 = vadd.f32 %v1221_v45, %v1177_v53 }
 0x14e   : > { %1547 = vst [vmem:[%s2058_s6 + $0x20] sm:$0xff] %v1539_v13  ;;  %v1508_v56 = vmul.f32 %v1660_v49, %v1507_v46  ;;  %v1345_v11 = vadd.f32 %v1344_v0, %v1308_v10  ;;  %v1408_v4 = vadd.f32 1.0, %v1662_v16  ;;  %1663 = vpow2.f32 %v1397_v15 }
 0x150   : > { %v1509_v17 = vadd.f32 %v1660_v49, %v1508_v56  ;;  %v2096_v61 = vadd.f32 %v2029_v23, %v1345_v11  ;;  %1665 = vrcp.f32 %v1408_v4  ;;  %v1348_v5 = vpop.f32.mrf.mxu3  ;;  %v1441_v40 = vand.u32 2147483648, %v1408_v4 }
 0x151   : > { %v1266_v22 = vpop.f32.mrf.mxu1  ;;  %v1439_v47 = vand.u32 2147483647, %v1408_v4  ;;  %vm1435_vm3 = vweird.f32 %v1408_v4 }
 0x152   : > { %v1513_v24 = vsel %vm1512_vm0, %v1660_v49, %v1509_v17  ;;  %v1267_v25 = vadd.f32 %v1266_v22, %v1222_v19  ;;  %v1311_v42 = vpop.f32.mrf.mxu2  ;;  %v1388_v30 = vsub.f32 0.0, %v2096_v61 }
 0x153   : > { %v1518_v26 = vsel %vm1515_vm1, %v1517_v58, %v1513_v24  ;;  %vm1440_vm5 = vcmp.eq.f32.partialorder %v1439_v47, 8.507059e+37 }
 0x154   : > { %v1541_v29 = vmul.f32 %v1518_v26, %v2046_v55  ;;  %v1312_v6 = vadd.f32 %v1311_v42, %v1267_v25  ;;  %v1401_v31 = vmul.f32 1.442695, %v1388_v30  ;;  %v1664_v7 = vpop.eup %1663 }
 0x155   : > { %v1410_v18 = vadd.f32 1.0, %v1664_v7 }
 0x156   : > { %1549 = vst [vmem:[%s2058_s6 + $0x30] sm:$0xff] %v1541_v29  ;;  %v1349_v48 = vadd.f32 %v1348_v5, %v1312_v6  ;;  %1667 = vpow2.f32 %v1401_v31  ;;  %v1666_v36 = vpop.eup %1665 }
 0x157   : > { %v1431_v37 = vmul.f32 %v1666_v36, %v1408_v4  ;;  %1669 = vrcp.f32 %v1410_v18  ;;  %vm1436_vm2 = vweird.f32 %v1666_v36  ;;  %v1471_v21 = vand.u32 2147483648, %v1410_v18 }
 0x158   : > { %v2102_v23 = vadd.f32 %v2039_v41, %v1349_v48  ;;  %vm1437_vm4 = vmor %vm1435_vm3, %vm1436_vm2  ;;  %v1442_v41 = vor.u32 1.1754944e-38, %v1441_v40  ;;  %v1469_v32 = vand.u32 2147483647, %v1410_v18  ;;  %vm1465_vm7 = vweird.f32 %v1410_v18 }
 0x159   : > { %v1432_v39 = vsub.f32 1.0, %v1431_v37  ;;  %v1472_v0 = vor.u32 1.1754944e-38, %v1471_v21 }
 0x15a   : > { %v1390_v20 = vsub.f32 0.0, %v2102_v23  ;;  %vm1470_vm9 = vcmp.eq.f32.partialorder %v1469_v32, 8.507059e+37 }
 0x15b   : > { %v1433_v57 = vmul.f32 %v1666_v36, %v1432_v39 }
 0x15c   : > { %v1405_v55 = vmul.f32 1.442695, %v1390_v20  ;;  %v1668_v44 = vpop.eup %1667 }
 0x15d   : > { %v1412_v28 = vadd.f32 1.0, %v1668_v44  ;;  %v1670_v51 = vpop.eup %1669  ;;  %v1434_v52 = vadd.f32 %v1666_v36, %v1433_v57 }
 0x15e   : > { %1671 = vpow2.f32 %v1405_v55  ;;  %v1461_v8 = vmul.f32 %v1670_v51, %v1410_v18  ;;  %vm1466_vm6 = vweird.f32 %v1670_v51 }
 0x15f   : > { %1673 = vrcp.f32 %v1412_v28  ;;  %v1438_v12 = vsel %vm1437_vm4, %v1666_v36, %v1434_v52  ;;  %vm1467_vm8 = vmor %vm1465_vm7, %vm1466_vm6  ;;  %v1501_v59 = vand.u32 2147483648, %v1412_v28  ;;  %v1499_v46 = vand.u32 2147483647, %v1412_v28 }
 0x160   : > { %v1443_v33 = vsel %vm1440_vm5, %v1442_v41, %v1438_v12  ;;  %v1462_v35 = vsub.f32 1.0, %v1461_v8  ;;  %vm1495_vm11 = vweird.f32 %v1412_v28 }
 0x161   : > { %v1536_v38 = vmul.f32 %v1443_v33, %v2074_v50  ;;  %v1502_v45 = vor.u32 1.1754944e-38, %v1501_v59  ;;  %vm1500_vm13 = vcmp.eq.f32.partialorder %v1499_v46, 8.507059e+37 }
 0x162   : > { %v1463_v62 = vmul.f32 %v1670_v51, %v1462_v35 }
 0x163   : > { %1544 = vst [vmem:[%s2058_s6 + $0x8] sm:$0xff] %v1536_v38 }
 0x164   : > { %v1672_v49 = vpop.eup %1671  ;;  %v1464_v63 = vadd.f32 %v1670_v51, %v1463_v62 }
 0x165   : > { %v1414_v60 = vadd.f32 1.0, %v1672_v49  ;;  %v1674_v43 = vpop.eup %1673 }
 0x166   : > { %v1491_v1 = vmul.f32 %v1674_v43, %v1412_v28  ;;  %v1468_v27 = vsel %vm1467_vm8, %v1670_v51, %v1464_v63  ;;  %vm1496_vm10 = vweird.f32 %v1674_v43 }
 0x167   : > { %1675 = vrcp.f32 %v1414_v60  ;;  %v1473_v2 = vsel %vm1470_vm9, %v1472_v0, %v1468_v27  ;;  %vm1497_vm12 = vmor %vm1495_vm11, %vm1496_vm10  ;;  %v1529_v16 = vand.u32 2147483647, %v1414_v60  ;;  %vm1525_vm15 = vweird.f32 %v1414_v60 }
 0x168   : > { %v1492_v3 = vsub.f32 1.0, %v1491_v1  ;;  %v1538_v50 = vmul.f32 %v1473_v2, %v2086_v9  ;;  %v1531_v9 = vand.u32 2147483648, %v1414_v60 }
 0x169   : > { %vm1530_vm1 = vcmp.eq.f32.partialorder %v1529_v16, 8.507059e+37 }
 0x16a   : > { %v1493_v13 = vmul.f32 %v1674_v43, %v1492_v3  ;;  %1546 = vst [vmem:[%s2058_s6 + $0x18] sm:$0xff] %v1538_v50  ;;  %v1532_v19 = vor.u32 1.1754944e-38, %v1531_v9 }
 0x16c   : > { %v1494_v54 = vadd.f32 %v1674_v43, %v1493_v13 }
 0x16d   : > { %v1676_v34 = vpop.eup %1675 }
 0x16e   : > { %v1521_v10 = vmul.f32 %v1676_v34, %v1414_v60  ;;  %v1498_v56 = vsel %vm1497_vm12, %v1674_v43, %v1494_v54  ;;  %vm1526_vm14 = vweird.f32 %v1676_v34 }
 0x16f   : > { %v1503_v14 = vsel %vm1500_vm13, %v1502_v45, %v1498_v56  ;;  %vm1527_vm0 = vmor %vm1525_vm15, %vm1526_vm14 }
 0x170   : > { %v1522_v53 = vsub.f32 1.0, %v1521_v10  ;;  %v1540_v15 = vmul.f32 %v1503_v14, %v2096_v61 }
 0x172   : > { %v1523_v11 = vmul.f32 %v1676_v34, %v1522_v53  ;;  %1548 = vst [vmem:[%s2058_s6 + $0x28] sm:$0xff] %v1540_v15 }
 0x174   : > { %v1524_v17 = vadd.f32 %v1676_v34, %v1523_v11 }
 0x176   : > { %v1528_v58 = vsel %vm1527_vm0, %v1676_v34, %v1524_v17 }
 0x177   : > { %v1533_v4 = vsel %vm1530_vm1, %v1532_v19, %v1528_v58 }
 0x178   : > { %v1542_v22 = vmul.f32 %v1533_v4, %v2102_v23 }
 0x17a   : > { %1550 = vst [vmem:[%s2058_s6 + $0x38] sm:$0xff] %v1542_v22 }
 0x17b PF: > { %s15_s18 = sadd.s32 1, %s1683_s18  }
 0x17c   : > { %p12_p4 = scmp.ge.s32.totalorder %s15_s18, 4  }
 0x17e   :  { %14 = sbr.rel (!%p12_p4) target bundleno = 1 (0x1), region = 73 }

</bundles_post_ra>
